<compile_context>
chip_gen: v7x
topology: tpu7x:2x2x1
jax: 0.10.0
libtpu: 0.0.40
codegen_flags: <defaults>
</compile_context>

<pallas_src>
import functools

import jax
import jax.numpy as jnp
import numpy as np
from jax.experimental import pallas as pl
from jax.experimental.pallas import tpu as pltpu


# ---------------------------------------------------------------------------
# In-kernel helpers
# ---------------------------------------------------------------------------
def _zero_halo_ring(pad_scr):
    """Zero only the 1-pixel border ring of the halo scratch.

    The interior is fully overwritten by every depthwise-conv stage, so the
    ring alone keeps the zero-padding invariant (do NOT write the ring
    anywhere else)."""
    hp, wp, c = pad_scr.shape
    pad_scr[0:1, :, :] = jnp.zeros((1, wp, c), jnp.float32)
    pad_scr[hp - 1:hp, :, :] = jnp.zeros((1, wp, c), jnp.float32)
    pad_scr[:, 0:1, :] = jnp.zeros((hp, 1, c), jnp.float32)
    pad_scr[:, wp - 1:wp, :] = jnp.zeros((hp, 1, c), jnp.float32)


def _dw3x3_halo(pad_scr, x_f32, wgt, shift, stride, hout, wout):
    """3x3 depthwise conv (padding=1, given stride) + folded-BN shift.

    x_f32: (H, W, C) f32 interior; pad_scr: (H+2, W+2, C) f32 scratch whose
    border ring is already zero."""
    h, w, c = x_f32.shape
    pad_scr[pl.ds(1, h), pl.ds(1, w), :] = x_f32
    ap = pad_scr[...]
    acc = jnp.zeros((hout, wout, c), jnp.float32)
    for kh in range(3):                       # static 3x3 stencil, unrolled
        for kw in range(3):
            xs = ap[kh:kh + (hout - 1) * stride + 1:stride,
                    kw:kw + (wout - 1) * stride + 1:stride, :]
            acc = acc + xs * wgt[kh, kw]
    return acc + shift                        # folded BN, no ReLU after dw


def _store_lane_dense(o_ref, out_f32, hout, wout, cout):
    """Scatter (Hout*Wout, Cout) into the lane-dense (1, Hout, Wout*Cout) block."""
    out3 = out_f32.reshape(hout, wout, cout)
    for wi in range(wout):                    # cheap VMEM stores; HBM DMA is dense
        o_ref[0, :, wi * cout:(wi + 1) * cout] = out3[:, wi, :].astype(o_ref.dtype)


# ---------------------------------------------------------------------------
# Basic ShuffleUnit (stride=1, in_c == out_c): identity shortcut + residual,
# channel split in VMEM, shuffle folded into scattered weights.
# ---------------------------------------------------------------------------
def _basic_unit_kernel(x_ref, w1_ref, s1_ref, wd_ref, sd_ref, w2s_ref, s2s_ref,
                       p_ref, o_ref, pad_scr, *, h, w, cin):
    split = cin // 2
    _zero_halo_ring(pad_scr)

    x2d = x_ref[0].reshape(h * w, cin)                    # (H*W, Cin) bf16
    sc = x2d[:, :split]                                   # identity shortcut
    xr = x2d[:, split:]

    # pw1: 1x1 conv + BN + ReLU (bf16 MXU, f32 accumulate)
    a = jnp.maximum(
        jnp.dot(xr, w1_ref[...], preferred_element_type=jnp.float32)
        + s1_ref[...], 0.0)

    # dw3x3 stride-1 + BN
    d = _dw3x3_halo(pad_scr, a.reshape(h, w, split), wd_ref[...], sd_ref[...],
                    1, h, w)

    # pw2: 1x1 conv + BN + ReLU; columns pre-scattered to ODD output channels
    r = jnp.maximum(
        jnp.dot(d.reshape(h * w, split).astype(jnp.bfloat16), w2s_ref[...],
                preferred_element_type=jnp.float32)
        + s2s_ref[...], 0.0)

    # identity shortcut scattered to EVEN output channels (exact 0/1 permutation
    # matmul on the idle MXU) -> adding the two == concat + channel_shuffle(2)
    scp = jnp.dot(sc, p_ref[...], preferred_element_type=jnp.float32)

    _store_lane_dense(o_ref, scp + r, h, w, cin)


# ---------------------------------------------------------------------------
# Downsample ShuffleUnit (stride!=1 or in_c != out_c): both branches fused,
# one read of x, shuffle folded into scattered weights.
# ---------------------------------------------------------------------------
def _down_unit_kernel(x_ref, w1_ref, s1_ref, wd_ref, sd_ref, w2s_ref, s2s_ref,
                      wds_ref, sds_ref, wps_ref, sps_ref, o_ref, pad_scr,
                      *, h, w, cin, out_c, stride, hout, wout):
    _zero_halo_ring(pad_scr)

    x2d = x_ref[0].reshape(h * w, cin)                    # bf16

    # --- residual branch: pw1 -> dw3x3 -> pw2 (odd output channels)
    a = jnp.maximum(
        jnp.dot(x2d, w1_ref[...], preferred_element_type=jnp.float32)
        + s1_ref[...], 0.0)
    d = _dw3x3_halo(pad_scr, a.reshape(h, w, cin), wd_ref[...], sd_ref[...],
                    stride, hout, wout)
    r = jnp.maximum(
        jnp.dot(d.reshape(hout * wout, cin).astype(jnp.bfloat16), w2s_ref[...],
                preferred_element_type=jnp.float32)
        + s2s_ref[...], 0.0)

    # --- shortcut branch: dw3x3 -> pw (even output channels); reuses the same
    #     halo scratch (border ring is still zero).
    dsc = _dw3x3_halo(pad_scr, x_ref[0].astype(jnp.float32), wds_ref[...],
                      sds_ref[...], stride, hout, wout)
    sc = jnp.maximum(
        jnp.dot(dsc.reshape(hout * wout, cin).astype(jnp.bfloat16), wps_ref[...],
                preferred_element_type=jnp.float32)
        + sps_ref[...], 0.0)

    _store_lane_dense(o_ref, r + sc, hout, wout, out_c)


# ---------------------------------------------------------------------------
# Wrappers (NHWC, bf16 activations in HBM)
# ---------------------------------------------------------------------------
def shuffle_unit_pallas(x_nhwc, params, stride, in_c, out_c):
    N, H, W, C = x_nhwc.shape
    assert C == in_c
    Hout = (H + 2 - 3) // stride + 1
    Wout = (W + 2 - 3) // stride + 1
    kp = params["kernel"]
    cparams = pltpu.CompilerParams(
        dimension_semantics=("parallel",),
        vmem_limit_bytes=48 * 1024 * 1024)
    out_shape = jax.ShapeDtypeStruct((N, Hout, Wout * out_c), jnp.bfloat16)
    out_spec = pl.BlockSpec((1, Hout, Wout * out_c), lambda n: (n, 0, 0))

    if stride == 1 and in_c == out_c:
        split = in_c // 2
        kernel = functools.partial(_basic_unit_kernel, h=H, w=W, cin=C)
        out_flat = pl.pallas_call(
            kernel,
            out_shape=out_shape,
            grid=(N,),
            in_specs=[
                pl.BlockSpec((1, H, W, C), lambda n: (n, 0, 0, 0)),
                pl.BlockSpec((split, split), lambda n: (0, 0)),
                pl.BlockSpec((1, split), lambda n: (0, 0)),
                pl.BlockSpec((3, 3, split), lambda n: (0, 0, 0)),
                pl.BlockSpec((1, split), lambda n: (0, 0)),
                pl.BlockSpec((split, C), lambda n: (0, 0)),
                pl.BlockSpec((1, C), lambda n: (0, 0)),
                pl.BlockSpec((split, C), lambda n: (0, 0)),
            ],
            out_specs=out_spec,
            scratch_shapes=[pltpu.VMEM((H + 2, W + 2, split), jnp.float32)],
            compiler_params=cparams,
        )(x_nhwc, kp["w1"], kp["s1"], kp["wd"], kp["sd"], kp["w2s"], kp["s2s"],
          kp["P"])
    else:
        kernel = functools.partial(_down_unit_kernel, h=H, w=W, cin=C,
                                   out_c=out_c, stride=stride,
                                   hout=Hout, wout=Wout)
        out_flat = pl.pallas_call(
            kernel,
            out_shape=out_shape,
            grid=(N,),
            in_specs=[
                pl.BlockSpec((1, H, W, C), lambda n: (n, 0, 0, 0)),
                pl.BlockSpec((C, C), lambda n: (0, 0)),
                pl.BlockSpec((1, C), lambda n: (0, 0)),
                pl.BlockSpec((3, 3, C), lambda n: (0, 0, 0)),
                pl.BlockSpec((1, C), lambda n: (0, 0)),
                pl.BlockSpec((C, out_c), lambda n: (0, 0)),
                pl.BlockSpec((1, out_c), lambda n: (0, 0)),
                pl.BlockSpec((3, 3, C), lambda n: (0, 0, 0)),
                pl.BlockSpec((1, C), lambda n: (0, 0)),
                pl.BlockSpec((C, out_c), lambda n: (0, 0)),
                pl.BlockSpec((1, out_c), lambda n: (0, 0)),
            ],
            out_specs=out_spec,
            scratch_shapes=[pltpu.VMEM((H + 2, W + 2, C), jnp.float32)],
            compiler_params=cparams,
        )(x_nhwc, kp["w1"], kp["s1"], kp["wd"], kp["sd"], kp["w2s"], kp["s2s"],
          kp["wds"], kp["sds"], kp["wps"], kp["sps"])

    return out_flat.reshape(N, Hout, Wout, out_c)   # contiguous, free reshape


def shuffle_unit_forward(x_nchw, params, stride, in_c, out_c):
    x = jnp.transpose(x_nchw, (0, 2, 3, 1)).astype(jnp.bfloat16)   # NCHW->NHWC
    y = shuffle_unit_pallas(x, params, stride, in_c, out_c)
    return jnp.transpose(y, (0, 3, 1, 2))                           # NHWC->NCHW


# ---------------------------------------------------------------------------
# Parameter construction: conv bias + BN folded into (w', shift'); the
# channel_shuffle(groups=2) of the unit output is folded into the last
# 1x1-conv weight columns (residual -> odd channels, shortcut -> even).
# ---------------------------------------------------------------------------
def _rand_bn(key, c):
    k1, k2, k3, k4 = jax.random.split(key, 4)
    gamma = jax.random.uniform(k1, (c,), jnp.float32, 0.5, 1.5)
    beta = jax.random.normal(k2, (c,), jnp.float32) * 0.1
    mean = jax.random.normal(k3, (c,), jnp.float32) * 0.1
    var = jax.random.uniform(k4, (c,), jnp.float32, 0.5, 1.5)
    s = gamma / jnp.sqrt(var + 1e-5)
    return s, beta, mean


def _make_pw(key, cin, cout):
    k1, k2, k3 = jax.random.split(key, 3)
    w = jax.random.normal(k1, (cin, cout), jnp.float32) * 0.1
    b = jax.random.normal(k2, (cout,), jnp.float32) * 0.1
    s, beta, mean = _rand_bn(k3, cout)
    w_f = (w * s[None, :]).astype(jnp.bfloat16)      # bf16 weights for the MXU
    shift = ((b - mean) * s + beta).reshape(1, cout)
    return w_f, shift


def _make_dw(key, c):
    k1, k2, k3 = jax.random.split(key, 3)
    w = jax.random.normal(k1, (3, 3, c), jnp.float32) * 0.1
    b = jax.random.normal(k2, (c,), jnp.float32) * 0.1
    s, beta, mean = _rand_bn(k3, c)
    w_f = w * s                                      # f32 (VPU stencil)
    shift = ((b - mean) * s + beta).reshape(1, c)
    return w_f, shift


def _scatter_cols(w, shift, out_c, parity):
    """Scatter 1x1-conv output columns to every other output channel."""
    cin = w.shape[0]
    ws = jnp.zeros((cin, out_c), w.dtype).at[:, parity::2].set(w)
    ss = jnp.zeros((1, out_c), shift.dtype).at[:, parity::2].set(shift)
    return ws, ss


def make_params(key, in_c, out_c, stride):
    ks = jax.random.split(key, 5)
    if stride == 1 and in_c == out_c:
        c = in_c // 2
        w1, s1 = _make_pw(ks[0], c, c)
        wd, sd = _make_dw(ks[1], c)
        w2, s2 = _make_pw(ks[2], c, c)
        w2s, s2s = _scatter_cols(w2, s2, out_c, 1)          # residual -> odd
        P = (jnp.zeros((c, out_c), jnp.bfloat16)
             .at[jnp.arange(c), 2 * jnp.arange(c)].set(1.0))  # identity -> even
        return {
            "residual": dict(w1=w1, s1=s1, wd=wd, sd=sd, w2=w2, s2=s2),
            "kernel": dict(w1=w1, s1=s1, wd=wd, sd=sd, w2s=w2s, s2s=s2s, P=P),
        }
    half = out_c // 2
    w1, s1 = _make_pw(ks[0], in_c, in_c)
    wd, sd = _make_dw(ks[1], in_c)
    w2, s2 = _make_pw(ks[2], in_c, half)
    wds, sds = _make_dw(ks[3], in_c)
    wp, sp = _make_pw(ks[4], in_c, half)
    w2s, s2s = _scatter_cols(w2, s2, out_c, 1)              # residual -> odd
    wps, sps = _scatter_cols(wp, sp, out_c, 0)              # shortcut -> even
    return {
        "residual": dict(w1=w1, s1=s1, wd=wd, sd=sd, w2=w2, s2=s2),
        "shortcut": dict(wd=wds, sd=sds, wp=wp, sp=sp),
        "kernel": dict(w1=w1, s1=s1, wd=wd, sd=sd, w2s=w2s, s2s=s2s,
                       wds=wds, sds=sds, wps=wps, sps=sps),
    }


# ---------------------------------------------------------------------------
# Pure-JAX reference (unscattered weights; explicit concat + channel_shuffle)
# ---------------------------------------------------------------------------
def _ref_pw(x, wgt, shift, relu=True):
    n, h, ww, c = x.shape
    y = jnp.dot(x.reshape(-1, c).astype(jnp.bfloat16), wgt,
                preferred_element_type=jnp.float32)
    y = (y + shift).reshape(n, h, ww, -1)
    return jnp.maximum(y, 0.0) if relu else y


def _ref_dw(x, wgt, shift, stride):
    xp = jnp.pad(x.astype(jnp.float32), ((0, 0), (1, 1), (1, 1), (0, 0)))
    n, hp, wp, c = xp.shape
    hout = (hp - 3) // stride + 1
    wout = (wp - 3) // stride + 1
    acc = jnp.zeros((n, hout, wout, c), jnp.float32)
    for kh in range(3):
        for kw in range(3):
            xs = xp[:, kh:kh + (hout - 1) * stride + 1:stride,
                    kw:kw + (wout - 1) * stride + 1:stride, :]
            acc = acc + xs * wgt[kh, kw]
    return acc + shift


def ref_shuffle_unit(x_nchw, params, stride, in_c, out_c):
    x = jnp.transpose(x_nchw, (0, 2, 3, 1)).astype(jnp.bfloat16)
    if stride == 1 and in_c == out_c:
        split = in_c // 2
        sc = x[..., :split].astype(jnp.float32)
        pr = params["residual"]
        r = _ref_pw(x[..., split:], pr["w1"], pr["s1"], True)
        r = _ref_dw(r, pr["wd"], pr["sd"], stride)
        r = _ref_pw(r, pr["w2"], pr["s2"], True)
    else:
        pr, ps = params["residual"], params["shortcut"]
        r = _ref_pw(x, pr["w1"], pr["s1"], True)
        r = _ref_dw(r, pr["wd"], pr["sd"], stride)
        r = _ref_pw(r, pr["w2"], pr["s2"], True)
        sc = _ref_dw(x, ps["wd"], ps["sd"], stride)
        sc = _ref_pw(sc, ps["wp"], ps["sp"], True)
    cat = jnp.concatenate([sc, r], axis=-1)
    n, h, ww, c = cat.shape
    cpg = c // 2
    shuf = (cat.reshape(n, h, ww, 2, cpg)
               .transpose(0, 1, 2, 4, 3)
               .reshape(n, h, ww, c))
    return jnp.transpose(shuf.astype(jnp.bfloat16), (0, 3, 1, 2))


if __name__ == "__main__":
    key = jax.random.PRNGKey(0)
    k1, k2, k3, k4 = jax.random.split(key, 4)

    # Case 1: basic ShuffleUnit (stride=1, in_channels == out_channels)
    N, C, H, W = 2, 32, 16, 16
    x1 = jax.random.normal(k1, (N, C, H, W), jnp.float32)
    p1 = make_params(k2, C, C, 1)
    out1 = jax.block_until_ready(shuffle_unit_forward(x1, p1, 1, C, C))
    ref1 = jax.block_until_ready(ref_shuffle_unit(x1, p1, 1, C, C))
    assert out1.shape == (N, C, H, W)
    np.testing.assert_allclose(np.asarray(out1.astype(jnp.float32)),
                               np.asarray(ref1.astype(jnp.float32)),
                               rtol=2e-2, atol=2e-2)

    # Case 2: downsample ShuffleUnit (stride=2, in_channels != out_channels)
    in_c, out_c = 16, 32
    x2 = jax.random.normal(k3, (N, in_c, H, W), jnp.float32)
    p2 = make_params(k4, in_c, out_c, 2)
    out2 = jax.block_until_ready(shuffle_unit_forward(x2, p2, 2, in_c, out_c))
    ref2 = jax.block_until_ready(ref_shuffle_unit(x2, p2, 2, in_c, out_c))
    assert out2.shape == (N, out_c, H // 2, W // 2)
    np.testing.assert_allclose(np.asarray(out2.astype(jnp.float32)),
                               np.asarray(ref2.astype(jnp.float32)),
                               rtol=2e-2, atol=2e-2)

    print("KERNEL_OK")
</pallas_src>

<mosaic_0001>
module attributes {stable_mosaic.version = 11 : i64} {
  func.func @_basic_unit_kernel(%arg0: i32, %arg1: memref<1x16x16x32xbf16, #tpu.memory_space<vmem>>, %arg2: memref<16x16xbf16, #tpu.memory_space<vmem>>, %arg3: memref<1x16xf32, #tpu.memory_space<vmem>>, %arg4: memref<3x3x16xf32, #tpu.memory_space<vmem>>, %arg5: memref<1x16xf32, #tpu.memory_space<vmem>>, %arg6: memref<16x32xbf16, #tpu.memory_space<vmem>>, %arg7: memref<1x32xf32, #tpu.memory_space<vmem>>, %arg8: memref<16x32xbf16, #tpu.memory_space<vmem>>, %arg9: memref<1x16x512xbf16, #tpu.memory_space<vmem>>, %arg10: memref<18x18x16xf32, #tpu.memory_space<vmem>>) attributes {dimension_semantics = [#tpu.dimension_semantics<parallel>], iteration_bounds = array<i64: 2>, scalar_prefetch = 0 : i64, scratch_operands = 1 : i64, tpu.core_type = #tpu.core_type<tc>, window_params = [{transform_indices = @transform_0, window_bounds = array<i64: 1, 16, 16, 32>}, {pipeline_mode = #tpu.pipeline_mode<synchronous>, transform_indices = @transform_1, window_bounds = array<i64: 16, 16>}, {pipeline_mode = #tpu.pipeline_mode<synchronous>, transform_indices = @transform_2, window_bounds = array<i64: 1, 16>}, {pipeline_mode = #tpu.pipeline_mode<synchronous>, transform_indices = @transform_3, window_bounds = array<i64: 3, 3, 16>}, {pipeline_mode = #tpu.pipeline_mode<synchronous>, transform_indices = @transform_4, window_bounds = array<i64: 1, 16>}, {pipeline_mode = #tpu.pipeline_mode<synchronous>, transform_indices = @transform_5, window_bounds = array<i64: 16, 32>}, {pipeline_mode = #tpu.pipeline_mode<synchronous>, transform_indices = @transform_6, window_bounds = array<i64: 1, 32>}, {pipeline_mode = #tpu.pipeline_mode<synchronous>, transform_indices = @transform_7, window_bounds = array<i64: 16, 32>}, {transform_indices = @transform_8, window_bounds = array<i64: 1, 16, 512>}]} {
    %cst = arith.constant 0.000000e+00 : f32
    %0 = vector.broadcast %cst : f32 to vector<1x18x16xf32>
    %c0 = arith.constant 0 : index
    %c0_0 = arith.constant 0 : index
    %c0_1 = arith.constant 0 : index
    %1 = vector.load %arg10[%c0, %c0_0, %c0_1] : memref<18x18x16xf32, #tpu.memory_space<vmem>>, vector<1x18x16xf32>
    tpu.vector_store %arg10[%c0, %c0_0, %c0_1], %0 {strides = array<i32>} : memref<18x18x16xf32, #tpu.memory_space<vmem>>, vector<1x18x16xf32>,
    %cst_2 = arith.constant 0.000000e+00 : f32
    %2 = vector.broadcast %cst_2 : f32 to vector<1x18x16xf32>
    %c17 = arith.constant 17 : index
    %c0_3 = arith.constant 0 : index
    %c0_4 = arith.constant 0 : index
    %3 = vector.load %arg10[%c17, %c0_3, %c0_4] : memref<18x18x16xf32, #tpu.memory_space<vmem>>, vector<1x18x16xf32>
    tpu.vector_store %arg10[%c17, %c0_3, %c0_4], %2 {strides = array<i32>} : memref<18x18x16xf32, #tpu.memory_space<vmem>>, vector<1x18x16xf32>,
    %cst_5 = arith.constant 0.000000e+00 : f32
    %4 = vector.broadcast %cst_5 : f32 to vector<18x1x16xf32>
    %c0_6 = arith.constant 0 : index
    %c0_7 = arith.constant 0 : index
    %c0_8 = arith.constant 0 : index
    %5 = vector.load %arg10[%c0_6, %c0_7, %c0_8] : memref<18x18x16xf32, #tpu.memory_space<vmem>>, vector<18x1x16xf32>
    tpu.vector_store %arg10[%c0_6, %c0_7, %c0_8], %4 {strides = array<i32>} : memref<18x18x16xf32, #tpu.memory_space<vmem>>, vector<18x1x16xf32>,
    %cst_9 = arith.constant 0.000000e+00 : f32
    %6 = vector.broadcast %cst_9 : f32 to vector<18x1x16xf32>
    %c0_10 = arith.constant 0 : index
    %c17_11 = arith.constant 17 : index
    %c0_12 = arith.constant 0 : index
    %7 = vector.load %arg10[%c0_10, %c17_11, %c0_12] : memref<18x18x16xf32, #tpu.memory_space<vmem>>, vector<18x1x16xf32>
    tpu.vector_store %arg10[%c0_10, %c17_11, %c0_12], %6 {strides = array<i32>} : memref<18x18x16xf32, #tpu.memory_space<vmem>>, vector<18x1x16xf32>,
    %c0_13 = arith.constant 0 : index
    %c0_14 = arith.constant 0 : index
    %c0_15 = arith.constant 0 : index
    %c0_16 = arith.constant 0 : index
    %8 = vector.load %arg1[%c0_13, %c0_14, %c0_15, %c0_16] : memref<1x16x16x32xbf16, #tpu.memory_space<vmem>>, vector<1x16x16x32xbf16>
    %9 = vector.shape_cast %8 : vector<1x16x16x32xbf16> to vector<16x16x32xbf16>
    %10 = vector.shape_cast %9 : vector<16x16x32xbf16> to vector<256x32xbf16>
    %11 = vector.extract_strided_slice %10 {offsets = [0, 0], sizes = [256, 16], strides = [1, 1]} : vector<256x32xbf16> to vector<256x16xbf16>
    %12 = vector.extract_strided_slice %10 {offsets = [0, 16], sizes = [256, 16], strides = [1, 1]} : vector<256x32xbf16> to vector<256x16xbf16>
    %c0_17 = arith.constant 0 : index
    %c0_18 = arith.constant 0 : index
    %13 = vector.load %arg2[%c0_17, %c0_18] : memref<16x16xbf16, #tpu.memory_space<vmem>>, vector<16x16xbf16>
    %cst_19 = arith.constant dense<0.000000e+00> : vector<256x16xf32>
    %14 = tpu.matmul %12, %13, %cst_19 {dimension_numbers = #tpu.dot_dimension_numbers<[1], [0], [0], [1], [0, 0, 1, 1], [], []>} : vector<256x16xbf16>, vector<16x16xbf16>, vector<256x16xf32> -> vector<256x16xf32>
    %c0_20 = arith.constant 0 : index
    %c0_21 = arith.constant 0 : index
    %15 = vector.load %arg3[%c0_20, %c0_21] : memref<1x16xf32, #tpu.memory_space<vmem>>, vector<1x16xf32>
    %16 = vector.broadcast %15 : vector<1x16xf32> to vector<256x16xf32>
    %17 = arith.addf %14, %16 : vector<256x16xf32>
    %cst_22 = arith.constant 0.000000e+00 : f32
    %18 = vector.broadcast %cst_22 : f32 to vector<256x16xf32>
    %19 = arith.maximumf %17, %18 : vector<256x16xf32>
    %20 = vector.shape_cast %19 : vector<256x16xf32> to vector<16x16x16xf32>
    %c0_23 = arith.constant 0 : index
    %c0_24 = arith.constant 0 : index
    %c0_25 = arith.constant 0 : index
    %21 = vector.load %arg4[%c0_23, %c0_24, %c0_25] : memref<3x3x16xf32, #tpu.memory_space<vmem>>, vector<3x3x16xf32>
    %c0_26 = arith.constant 0 : index
    %c0_27 = arith.constant 0 : index
    %22 = vector.load %arg5[%c0_26, %c0_27] : memref<1x16xf32, #tpu.memory_space<vmem>>, vector<1x16xf32>
    %c1 = arith.constant 1 : index
    %c1_28 = arith.constant 1 : index
    %c0_29 = arith.constant 0 : index
    %23 = vector.load %arg10[%c1, %c1_28, %c0_29] : memref<18x18x16xf32, #tpu.memory_space<vmem>>, vector<16x16x16xf32>
    tpu.vector_store %arg10[%c1, %c1_28, %c0_29], %20 {strides = array<i32>} : memref<18x18x16xf32, #tpu.memory_space<vmem>>, vector<16x16x16xf32>,
    %c0_30 = arith.constant 0 : index
    %c0_31 = arith.constant 0 : index
    %c0_32 = arith.constant 0 : index
    %24 = vector.load %arg10[%c0_30, %c0_31, %c0_32] : memref<18x18x16xf32, #tpu.memory_space<vmem>>, vector<18x18x16xf32>
    %cst_33 = arith.constant 0.000000e+00 : f32
    %25 = vector.broadcast %cst_33 : f32 to vector<16x16x16xf32>
    %26 = vector.extract_strided_slice %24 {offsets = [0, 0, 0], sizes = [16, 16, 16], strides = [1, 1, 1]} : vector<18x18x16xf32> to vector<16x16x16xf32>
    %27 = vector.extract_strided_slice %21 {offsets = [0, 0, 0], sizes = [1, 1, 16], strides = [1, 1, 1]} : vector<3x3x16xf32> to vector<1x1x16xf32>
    %28 = vector.shape_cast %27 : vector<1x1x16xf32> to vector<16xf32>
    %29 = vector.shape_cast %28 : vector<16xf32> to vector<1x1x16xf32>
    %30 = vector.broadcast %29 : vector<1x1x16xf32> to vector<16x16x16xf32>
    %31 = arith.mulf %26, %30 : vector<16x16x16xf32>
    %32 = arith.addf %25, %31 : vector<16x16x16xf32>
    %33 = vector.extract_strided_slice %24 {offsets = [0, 1, 0], sizes = [16, 16, 16], strides = [1, 1, 1]} : vector<18x18x16xf32> to vector<16x16x16xf32>
    %34 = vector.extract_strided_slice %21 {offsets = [0, 1, 0], sizes = [1, 1, 16], strides = [1, 1, 1]} : vector<3x3x16xf32> to vector<1x1x16xf32>
    %35 = vector.shape_cast %34 : vector<1x1x16xf32> to vector<16xf32>
    %36 = vector.shape_cast %35 : vector<16xf32> to vector<1x1x16xf32>
    %37 = vector.broadcast %36 : vector<1x1x16xf32> to vector<16x16x16xf32>
    %38 = arith.mulf %33, %37 : vector<16x16x16xf32>
    %39 = arith.addf %32, %38 : vector<16x16x16xf32>
    %40 = vector.extract_strided_slice %24 {offsets = [0, 2, 0], sizes = [16, 16, 16], strides = [1, 1, 1]} : vector<18x18x16xf32> to vector<16x16x16xf32>
    %41 = vector.extract_strided_slice %21 {offsets = [0, 2, 0], sizes = [1, 1, 16], strides = [1, 1, 1]} : vector<3x3x16xf32> to vector<1x1x16xf32>
    %42 = vector.shape_cast %41 : vector<1x1x16xf32> to vector<16xf32>
    %43 = vector.shape_cast %42 : vector<16xf32> to vector<1x1x16xf32>
    %44 = vector.broadcast %43 : vector<1x1x16xf32> to vector<16x16x16xf32>
    %45 = arith.mulf %40, %44 : vector<16x16x16xf32>
    %46 = arith.addf %39, %45 : vector<16x16x16xf32>
    %47 = vector.extract_strided_slice %24 {offsets = [1, 0, 0], sizes = [16, 16, 16], strides = [1, 1, 1]} : vector<18x18x16xf32> to vector<16x16x16xf32>
    %48 = vector.extract_strided_slice %21 {offsets = [1, 0, 0], sizes = [1, 1, 16], strides = [1, 1, 1]} : vector<3x3x16xf32> to vector<1x1x16xf32>
    %49 = vector.shape_cast %48 : vector<1x1x16xf32> to vector<16xf32>
    %50 = vector.shape_cast %49 : vector<16xf32> to vector<1x1x16xf32>
    %51 = vector.broadcast %50 : vector<1x1x16xf32> to vector<16x16x16xf32>
    %52 = arith.mulf %47, %51 : vector<16x16x16xf32>
    %53 = arith.addf %46, %52 : vector<16x16x16xf32>
    %54 = vector.extract_strided_slice %24 {offsets = [1, 1, 0], sizes = [16, 16, 16], strides = [1, 1, 1]} : vector<18x18x16xf32> to vector<16x16x16xf32>
    %55 = vector.extract_strided_slice %21 {offsets = [1, 1, 0], sizes = [1, 1, 16], strides = [1, 1, 1]} : vector<3x3x16xf32> to vector<1x1x16xf32>
    %56 = vector.shape_cast %55 : vector<1x1x16xf32> to vector<16xf32>
    %57 = vector.shape_cast %56 : vector<16xf32> to vector<1x1x16xf32>
    %58 = vector.broadcast %57 : vector<1x1x16xf32> to vector<16x16x16xf32>
    %59 = arith.mulf %54, %58 : vector<16x16x16xf32>
    %60 = arith.addf %53, %59 : vector<16x16x16xf32>
    %61 = vector.extract_strided_slice %24 {offsets = [1, 2, 0], sizes = [16, 16, 16], strides = [1, 1, 1]} : vector<18x18x16xf32> to vector<16x16x16xf32>
    %62 = vector.extract_strided_slice %21 {offsets = [1, 2, 0], sizes = [1, 1, 16], strides = [1, 1, 1]} : vector<3x3x16xf32> to vector<1x1x16xf32>
    %63 = vector.shape_cast %62 : vector<1x1x16xf32> to vector<16xf32>
    %64 = vector.shape_cast %63 : vector<16xf32> to vector<1x1x16xf32>
    %65 = vector.broadcast %64 : vector<1x1x16xf32> to vector<16x16x16xf32>
    %66 = arith.mulf %61, %65 : vector<16x16x16xf32>
    %67 = arith.addf %60, %66 : vector<16x16x16xf32>
    %68 = vector.extract_strided_slice %24 {offsets = [2, 0, 0], sizes = [16, 16, 16], strides = [1, 1, 1]} : vector<18x18x16xf32> to vector<16x16x16xf32>
    %69 = vector.extract_strided_slice %21 {offsets = [2, 0, 0], sizes = [1, 1, 16], strides = [1, 1, 1]} : vector<3x3x16xf32> to vector<1x1x16xf32>
    %70 = vector.shape_cast %69 : vector<1x1x16xf32> to vector<16xf32>
    %71 = vector.shape_cast %70 : vector<16xf32> to vector<1x1x16xf32>
    %72 = vector.broadcast %71 : vector<1x1x16xf32> to vector<16x16x16xf32>
    %73 = arith.mulf %68, %72 : vector<16x16x16xf32>
    %74 = arith.addf %67, %73 : vector<16x16x16xf32>
    %75 = vector.extract_strided_slice %24 {offsets = [2, 1, 0], sizes = [16, 16, 16], strides = [1, 1, 1]} : vector<18x18x16xf32> to vector<16x16x16xf32>
    %76 = vector.extract_strided_slice %21 {offsets = [2, 1, 0], sizes = [1, 1, 16], strides = [1, 1, 1]} : vector<3x3x16xf32> to vector<1x1x16xf32>
    %77 = vector.shape_cast %76 : vector<1x1x16xf32> to vector<16xf32>
    %78 = vector.shape_cast %77 : vector<16xf32> to vector<1x1x16xf32>
    %79 = vector.broadcast %78 : vector<1x1x16xf32> to vector<16x16x16xf32>
    %80 = arith.mulf %75, %79 : vector<16x16x16xf32>
    %81 = arith.addf %74, %80 : vector<16x16x16xf32>
    %82 = vector.extract_strided_slice %24 {offsets = [2, 2, 0], sizes = [16, 16, 16], strides = [1, 1, 1]} : vector<18x18x16xf32> to vector<16x16x16xf32>
    %83 = vector.extract_strided_slice %21 {offsets = [2, 2, 0], sizes = [1, 1, 16], strides = [1, 1, 1]} : vector<3x3x16xf32> to vector<1x1x16xf32>
    %84 = vector.shape_cast %83 : vector<1x1x16xf32> to vector<16xf32>
    %85 = vector.shape_cast %84 : vector<16xf32> to vector<1x1x16xf32>
    %86 = vector.broadcast %85 : vector<1x1x16xf32> to vector<16x16x16xf32>
    %87 = arith.mulf %82, %86 : vector<16x16x16xf32>
    %88 = arith.addf %81, %87 : vector<16x16x16xf32>
    %89 = vector.shape_cast %22 : vector<1x16xf32> to vector<1x1x16xf32>
    %90 = vector.broadcast %89 : vector<1x1x16xf32> to vector<16x16x16xf32>
    %91 = arith.addf %88, %90 : vector<16x16x16xf32>
    %92 = vector.shape_cast %91 : vector<16x16x16xf32> to vector<256x16xf32>
    %93 = arith.truncf %92 : vector<256x16xf32> to vector<256x16xbf16>
    %c0_34 = arith.constant 0 : index
    %c0_35 = arith.constant 0 : index
    %94 = vector.load %arg6[%c0_34, %c0_35] : memref<16x32xbf16, #tpu.memory_space<vmem>>, vector<16x32xbf16>
    %cst_36 = arith.constant dense<0.000000e+00> : vector<256x32xf32>
    %95 = tpu.matmul %93, %94, %cst_36 {dimension_numbers = #tpu.dot_dimension_numbers<[1], [0], [0], [1], [0, 0, 1, 1], [], []>} : vector<256x16xbf16>, vector<16x32xbf16>, vector<256x32xf32> -> vector<256x32xf32>
    %c0_37 = arith.constant 0 : index
    %c0_38 = arith.constant 0 : index
    %96 = vector.load %arg7[%c0_37, %c0_38] : memref<1x32xf32, #tpu.memory_space<vmem>>, vector<1x32xf32>
    %97 = vector.broadcast %96 : vector<1x32xf32> to vector<256x32xf32>
    %98 = arith.addf %95, %97 : vector<256x32xf32>
    %cst_39 = arith.constant 0.000000e+00 : f32
    %99 = vector.broadcast %cst_39 : f32 to vector<256x32xf32>
    %100 = arith.maximumf %98, %99 : vector<256x32xf32>
    %c0_40 = arith.constant 0 : index
    %c0_41 = arith.constant 0 : index
    %101 = vector.load %arg8[%c0_40, %c0_41] : memref<16x32xbf16, #tpu.memory_space<vmem>>, vector<16x32xbf16>
    %cst_42 = arith.constant dense<0.000000e+00> : vector<256x32xf32>
    %102 = tpu.matmul %11, %101, %cst_42 {dimension_numbers = #tpu.dot_dimension_numbers<[1], [0], [0], [1], [0, 0, 1, 1], [], []>} : vector<256x16xbf16>, vector<16x32xbf16>, vector<256x32xf32> -> vector<256x32xf32>
    %103 = arith.addf %102, %100 : vector<256x32xf32>
    %104 = vector.shape_cast %103 : vector<256x32xf32> to vector<16x16x32xf32>
    %105 = vector.extract_strided_slice %104 {offsets = [0, 0, 0], sizes = [16, 1, 32], strides = [1, 1, 1]} : vector<16x16x32xf32> to vector<16x1x32xf32>
    %106 = vector.shape_cast %105 : vector<16x1x32xf32> to vector<16x32xf32>
    %107 = arith.truncf %106 : vector<16x32xf32> to vector<16x32xbf16>
    %c0_43 = arith.constant 0 : index
    %c0_44 = arith.constant 0 : index
    %c0_45 = arith.constant 0 : index
    %108 = vector.load %arg9[%c0_43, %c0_44, %c0_45] : memref<1x16x512xbf16, #tpu.memory_space<vmem>>, vector<1x16x32xbf16>
    %109 = vector.shape_cast %108 : vector<1x16x32xbf16> to vector<16x32xbf16>
    %110 = vector.shape_cast %107 : vector<16x32xbf16> to vector<1x16x32xbf16>
    tpu.vector_store %arg9[%c0_43, %c0_44, %c0_45], %110 {strides = array<i32>} : memref<1x16x512xbf16, #tpu.memory_space<vmem>>, vector<1x16x32xbf16>,
    %111 = vector.extract_strided_slice %104 {offsets = [0, 1, 0], sizes = [16, 1, 32], strides = [1, 1, 1]} : vector<16x16x32xf32> to vector<16x1x32xf32>
    %112 = vector.shape_cast %111 : vector<16x1x32xf32> to vector<16x32xf32>
    %113 = arith.truncf %112 : vector<16x32xf32> to vector<16x32xbf16>
    %c0_46 = arith.constant 0 : index
    %c0_47 = arith.constant 0 : index
    %c32 = arith.constant 32 : index
    %114 = vector.load %arg9[%c0_46, %c0_47, %c32] : memref<1x16x512xbf16, #tpu.memory_space<vmem>>, vector<1x16x32xbf16>
    %115 = vector.shape_cast %114 : vector<1x16x32xbf16> to vector<16x32xbf16>
    %116 = vector.shape_cast %113 : vector<16x32xbf16> to vector<1x16x32xbf16>
    tpu.vector_store %arg9[%c0_46, %c0_47, %c32], %116 {strides = array<i32>} : memref<1x16x512xbf16, #tpu.memory_space<vmem>>, vector<1x16x32xbf16>,
    %117 = vector.extract_strided_slice %104 {offsets = [0, 2, 0], sizes = [16, 1, 32], strides = [1, 1, 1]} : vector<16x16x32xf32> to vector<16x1x32xf32>
    %118 = vector.shape_cast %117 : vector<16x1x32xf32> to vector<16x32xf32>
    %119 = arith.truncf %118 : vector<16x32xf32> to vector<16x32xbf16>
    %c0_48 = arith.constant 0 : index
    %c0_49 = arith.constant 0 : index
    %c64 = arith.constant 64 : index
    %120 = vector.load %arg9[%c0_48, %c0_49, %c64] : memref<1x16x512xbf16, #tpu.memory_space<vmem>>, vector<1x16x32xbf16>
    %121 = vector.shape_cast %120 : vector<1x16x32xbf16> to vector<16x32xbf16>
    %122 = vector.shape_cast %119 : vector<16x32xbf16> to vector<1x16x32xbf16>
    tpu.vector_store %arg9[%c0_48, %c0_49, %c64], %122 {strides = array<i32>} : memref<1x16x512xbf16, #tpu.memory_space<vmem>>, vector<1x16x32xbf16>,
    %123 = vector.extract_strided_slice %104 {offsets = [0, 3, 0], sizes = [16, 1, 32], strides = [1, 1, 1]} : vector<16x16x32xf32> to vector<16x1x32xf32>
    %124 = vector.shape_cast %123 : vector<16x1x32xf32> to vector<16x32xf32>
    %125 = arith.truncf %124 : vector<16x32xf32> to vector<16x32xbf16>
    %c0_50 = arith.constant 0 : index
    %c0_51 = arith.constant 0 : index
    %c96 = arith.constant 96 : index
    %126 = vector.load %arg9[%c0_50, %c0_51, %c96] : memref<1x16x512xbf16, #tpu.memory_space<vmem>>, vector<1x16x32xbf16>
    %127 = vector.shape_cast %126 : vector<1x16x32xbf16> to vector<16x32xbf16>
    %128 = vector.shape_cast %125 : vector<16x32xbf16> to vector<1x16x32xbf16>
    tpu.vector_store %arg9[%c0_50, %c0_51, %c96], %128 {strides = array<i32>} : memref<1x16x512xbf16, #tpu.memory_space<vmem>>, vector<1x16x32xbf16>,
    %129 = vector.extract_strided_slice %104 {offsets = [0, 4, 0], sizes = [16, 1, 32], strides = [1, 1, 1]} : vector<16x16x32xf32> to vector<16x1x32xf32>
    %130 = vector.shape_cast %129 : vector<16x1x32xf32> to vector<16x32xf32>
    %131 = arith.truncf %130 : vector<16x32xf32> to vector<16x32xbf16>
    %c0_52 = arith.constant 0 : index
    %c0_53 = arith.constant 0 : index
    %c128 = arith.constant 128 : index
    %132 = vector.load %arg9[%c0_52, %c0_53, %c128] : memref<1x16x512xbf16, #tpu.memory_space<vmem>>, vector<1x16x32xbf16>
    %133 = vector.shape_cast %132 : vector<1x16x32xbf16> to vector<16x32xbf16>
    %134 = vector.shape_cast %131 : vector<16x32xbf16> to vector<1x16x32xbf16>
    tpu.vector_store %arg9[%c0_52, %c0_53, %c128], %134 {strides = array<i32>} : memref<1x16x512xbf16, #tpu.memory_space<vmem>>, vector<1x16x32xbf16>,
    %135 = vector.extract_strided_slice %104 {offsets = [0, 5, 0], sizes = [16, 1, 32], strides = [1, 1, 1]} : vector<16x16x32xf32> to vector<16x1x32xf32>
    %136 = vector.shape_cast %135 : vector<16x1x32xf32> to vector<16x32xf32>
    %137 = arith.truncf %136 : vector<16x32xf32> to vector<16x32xbf16>
    %c0_54 = arith.constant 0 : index
    %c0_55 = arith.constant 0 : index
    %c160 = arith.constant 160 : index
    %138 = vector.load %arg9[%c0_54, %c0_55, %c160] : memref<1x16x512xbf16, #tpu.memory_space<vmem>>, vector<1x16x32xbf16>
    %139 = vector.shape_cast %138 : vector<1x16x32xbf16> to vector<16x32xbf16>
    %140 = vector.shape_cast %137 : vector<16x32xbf16> to vector<1x16x32xbf16>
    tpu.vector_store %arg9[%c0_54, %c0_55, %c160], %140 {strides = array<i32>} : memref<1x16x512xbf16, #tpu.memory_space<vmem>>, vector<1x16x32xbf16>,
    %141 = vector.extract_strided_slice %104 {offsets = [0, 6, 0], sizes = [16, 1, 32], strides = [1, 1, 1]} : vector<16x16x32xf32> to vector<16x1x32xf32>
    %142 = vector.shape_cast %141 : vector<16x1x32xf32> to vector<16x32xf32>
    %143 = arith.truncf %142 : vector<16x32xf32> to vector<16x32xbf16>
    %c0_56 = arith.constant 0 : index
    %c0_57 = arith.constant 0 : index
    %c192 = arith.constant 192 : index
    %144 = vector.load %arg9[%c0_56, %c0_57, %c192] : memref<1x16x512xbf16, #tpu.memory_space<vmem>>, vector<1x16x32xbf16>
    %145 = vector.shape_cast %144 : vector<1x16x32xbf16> to vector<16x32xbf16>
    %146 = vector.shape_cast %143 : vector<16x32xbf16> to vector<1x16x32xbf16>
    tpu.vector_store %arg9[%c0_56, %c0_57, %c192], %146 {strides = array<i32>} : memref<1x16x512xbf16, #tpu.memory_space<vmem>>, vector<1x16x32xbf16>,
    %147 = vector.extract_strided_slice %104 {offsets = [0, 7, 0], sizes = [16, 1, 32], strides = [1, 1, 1]} : vector<16x16x32xf32> to vector<16x1x32xf32>
    %148 = vector.shape_cast %147 : vector<16x1x32xf32> to vector<16x32xf32>
    %149 = arith.truncf %148 : vector<16x32xf32> to vector<16x32xbf16>
    %c0_58 = arith.constant 0 : index
    %c0_59 = arith.constant 0 : index
    %c224 = arith.constant 224 : index
    %150 = vector.load %arg9[%c0_58, %c0_59, %c224] : memref<1x16x512xbf16, #tpu.memory_space<vmem>>, vector<1x16x32xbf16>
    %151 = vector.shape_cast %150 : vector<1x16x32xbf16> to vector<16x32xbf16>
    %152 = vector.shape_cast %149 : vector<16x32xbf16> to vector<1x16x32xbf16>
    tpu.vector_store %arg9[%c0_58, %c0_59, %c224], %152 {strides = array<i32>} : memref<1x16x512xbf16, #tpu.memory_space<vmem>>, vector<1x16x32xbf16>,
    %153 = vector.extract_strided_slice %104 {offsets = [0, 8, 0], sizes = [16, 1, 32], strides = [1, 1, 1]} : vector<16x16x32xf32> to vector<16x1x32xf32>
    %154 = vector.shape_cast %153 : vector<16x1x32xf32> to vector<16x32xf32>
    %155 = arith.truncf %154 : vector<16x32xf32> to vector<16x32xbf16>
    %c0_60 = arith.constant 0 : index
    %c0_61 = arith.constant 0 : index
    %c256 = arith.constant 256 : index
    %156 = vector.load %arg9[%c0_60, %c0_61, %c256] : memref<1x16x512xbf16, #tpu.memory_space<vmem>>, vector<1x16x32xbf16>
    %157 = vector.shape_cast %156 : vector<1x16x32xbf16> to vector<16x32xbf16>
    %158 = vector.shape_cast %155 : vector<16x32xbf16> to vector<1x16x32xbf16>
    tpu.vector_store %arg9[%c0_60, %c0_61, %c256], %158 {strides = array<i32>} : memref<1x16x512xbf16, #tpu.memory_space<vmem>>, vector<1x16x32xbf16>,
    %159 = vector.extract_strided_slice %104 {offsets = [0, 9, 0], sizes = [16, 1, 32], strides = [1, 1, 1]} : vector<16x16x32xf32> to vector<16x1x32xf32>
    %160 = vector.shape_cast %159 : vector<16x1x32xf32> to vector<16x32xf32>
    %161 = arith.truncf %160 : vector<16x32xf32> to vector<16x32xbf16>
    %c0_62 = arith.constant 0 : index
    %c0_63 = arith.constant 0 : index
    %c288 = arith.constant 288 : index
    %162 = vector.load %arg9[%c0_62, %c0_63, %c288] : memref<1x16x512xbf16, #tpu.memory_space<vmem>>, vector<1x16x32xbf16>
    %163 = vector.shape_cast %162 : vector<1x16x32xbf16> to vector<16x32xbf16>
    %164 = vector.shape_cast %161 : vector<16x32xbf16> to vector<1x16x32xbf16>
    tpu.vector_store %arg9[%c0_62, %c0_63, %c288], %164 {strides = array<i32>} : memref<1x16x512xbf16, #tpu.memory_space<vmem>>, vector<1x16x32xbf16>,
    %165 = vector.extract_strided_slice %104 {offsets = [0, 10, 0], sizes = [16, 1, 32], strides = [1, 1, 1]} : vector<16x16x32xf32> to vector<16x1x32xf32>
    %166 = vector.shape_cast %165 : vector<16x1x32xf32> to vector<16x32xf32>
    %167 = arith.truncf %166 : vector<16x32xf32> to vector<16x32xbf16>
    %c0_64 = arith.constant 0 : index
    %c0_65 = arith.constant 0 : index
    %c320 = arith.constant 320 : index
    %168 = vector.load %arg9[%c0_64, %c0_65, %c320] : memref<1x16x512xbf16, #tpu.memory_space<vmem>>, vector<1x16x32xbf16>
    %169 = vector.shape_cast %168 : vector<1x16x32xbf16> to vector<16x32xbf16>
    %170 = vector.shape_cast %167 : vector<16x32xbf16> to vector<1x16x32xbf16>
    tpu.vector_store %arg9[%c0_64, %c0_65, %c320], %170 {strides = array<i32>} : memref<1x16x512xbf16, #tpu.memory_space<vmem>>, vector<1x16x32xbf16>,
    %171 = vector.extract_strided_slice %104 {offsets = [0, 11, 0], sizes = [16, 1, 32], strides = [1, 1, 1]} : vector<16x16x32xf32> to vector<16x1x32xf32>
    %172 = vector.shape_cast %171 : vector<16x1x32xf32> to vector<16x32xf32>
    %173 = arith.truncf %172 : vector<16x32xf32> to vector<16x32xbf16>
    %c0_66 = arith.constant 0 : index
    %c0_67 = arith.constant 0 : index
    %c352 = arith.constant 352 : index
    %174 = vector.load %arg9[%c0_66, %c0_67, %c352] : memref<1x16x512xbf16, #tpu.memory_space<vmem>>, vector<1x16x32xbf16>
    %175 = vector.shape_cast %174 : vector<1x16x32xbf16> to vector<16x32xbf16>
    %176 = vector.shape_cast %173 : vector<16x32xbf16> to vector<1x16x32xbf16>
    tpu.vector_store %arg9[%c0_66, %c0_67, %c352], %176 {strides = array<i32>} : memref<1x16x512xbf16, #tpu.memory_space<vmem>>, vector<1x16x32xbf16>,
    %177 = vector.extract_strided_slice %104 {offsets = [0, 12, 0], sizes = [16, 1, 32], strides = [1, 1, 1]} : vector<16x16x32xf32> to vector<16x1x32xf32>
    %178 = vector.shape_cast %177 : vector<16x1x32xf32> to vector<16x32xf32>
    %179 = arith.truncf %178 : vector<16x32xf32> to vector<16x32xbf16>
    %c0_68 = arith.constant 0 : index
    %c0_69 = arith.constant 0 : index
    %c384 = arith.constant 384 : index
    %180 = vector.load %arg9[%c0_68, %c0_69, %c384] : memref<1x16x512xbf16, #tpu.memory_space<vmem>>, vector<1x16x32xbf16>
    %181 = vector.shape_cast %180 : vector<1x16x32xbf16> to vector<16x32xbf16>
    %182 = vector.shape_cast %179 : vector<16x32xbf16> to vector<1x16x32xbf16>
    tpu.vector_store %arg9[%c0_68, %c0_69, %c384], %182 {strides = array<i32>} : memref<1x16x512xbf16, #tpu.memory_space<vmem>>, vector<1x16x32xbf16>,
    %183 = vector.extract_strided_slice %104 {offsets = [0, 13, 0], sizes = [16, 1, 32], strides = [1, 1, 1]} : vector<16x16x32xf32> to vector<16x1x32xf32>
    %184 = vector.shape_cast %183 : vector<16x1x32xf32> to vector<16x32xf32>
    %185 = arith.truncf %184 : vector<16x32xf32> to vector<16x32xbf16>
    %c0_70 = arith.constant 0 : index
    %c0_71 = arith.constant 0 : index
    %c416 = arith.constant 416 : index
    %186 = vector.load %arg9[%c0_70, %c0_71, %c416] : memref<1x16x512xbf16, #tpu.memory_space<vmem>>, vector<1x16x32xbf16>
    %187 = vector.shape_cast %186 : vector<1x16x32xbf16> to vector<16x32xbf16>
    %188 = vector.shape_cast %185 : vector<16x32xbf16> to vector<1x16x32xbf16>
    tpu.vector_store %arg9[%c0_70, %c0_71, %c416], %188 {strides = array<i32>} : memref<1x16x512xbf16, #tpu.memory_space<vmem>>, vector<1x16x32xbf16>,
    %189 = vector.extract_strided_slice %104 {offsets = [0, 14, 0], sizes = [16, 1, 32], strides = [1, 1, 1]} : vector<16x16x32xf32> to vector<16x1x32xf32>
    %190 = vector.shape_cast %189 : vector<16x1x32xf32> to vector<16x32xf32>
    %191 = arith.truncf %190 : vector<16x32xf32> to vector<16x32xbf16>
    %c0_72 = arith.constant 0 : index
    %c0_73 = arith.constant 0 : index
    %c448 = arith.constant 448 : index
    %192 = vector.load %arg9[%c0_72, %c0_73, %c448] : memref<1x16x512xbf16, #tpu.memory_space<vmem>>, vector<1x16x32xbf16>
    %193 = vector.shape_cast %192 : vector<1x16x32xbf16> to vector<16x32xbf16>
    %194 = vector.shape_cast %191 : vector<16x32xbf16> to vector<1x16x32xbf16>
    tpu.vector_store %arg9[%c0_72, %c0_73, %c448], %194 {strides = array<i32>} : memref<1x16x512xbf16, #tpu.memory_space<vmem>>, vector<1x16x32xbf16>,
    %195 = vector.extract_strided_slice %104 {offsets = [0, 15, 0], sizes = [16, 1, 32], strides = [1, 1, 1]} : vector<16x16x32xf32> to vector<16x1x32xf32>
    %196 = vector.shape_cast %195 : vector<16x1x32xf32> to vector<16x32xf32>
    %197 = arith.truncf %196 : vector<16x32xf32> to vector<16x32xbf16>
    %c0_74 = arith.constant 0 : index
    %c0_75 = arith.constant 0 : index
    %c480 = arith.constant 480 : index
    %198 = vector.load %arg9[%c0_74, %c0_75, %c480] : memref<1x16x512xbf16, #tpu.memory_space<vmem>>, vector<1x16x32xbf16>
    %199 = vector.shape_cast %198 : vector<1x16x32xbf16> to vector<16x32xbf16>
    %200 = vector.shape_cast %197 : vector<16x32xbf16> to vector<1x16x32xbf16>
    tpu.vector_store %arg9[%c0_74, %c0_75, %c480], %200 {strides = array<i32>} : memref<1x16x512xbf16, #tpu.memory_space<vmem>>, vector<1x16x32xbf16>,
    return
  }
  func.func @transform_0(%arg0: i32) -> (i32, i32, i32, i32) {
    %c0_i32 = arith.constant 0 : i32
    %c0_i32_0 = arith.constant 0 : i32
    %c0_i32_1 = arith.constant 0 : i32
    %c0_i32_2 = arith.constant 0 : i32
    return %arg0, %c0_i32, %c0_i32_0, %c0_i32_1 : i32, i32, i32, i32
  }
  func.func @transform_1(%arg0: i32) -> (i32, i32) {
    %c0_i32 = arith.constant 0 : i32
    %c0_i32_0 = arith.constant 0 : i32
    %c0_i32_1 = arith.constant 0 : i32
    return %c0_i32, %c0_i32_0 : i32, i32
  }
  func.func @transform_2(%arg0: i32) -> (i32, i32) {
    %c0_i32 = arith.constant 0 : i32
    %c0_i32_0 = arith.constant 0 : i32
    %c0_i32_1 = arith.constant 0 : i32
    return %c0_i32, %c0_i32_0 : i32, i32
  }
  func.func @transform_3(%arg0: i32) -> (i32, i32, i32) {
    %c0_i32 = arith.constant 0 : i32
    %c0_i32_0 = arith.constant 0 : i32
    %c0_i32_1 = arith.constant 0 : i32
    %c0_i32_2 = arith.constant 0 : i32
    return %c0_i32, %c0_i32_0, %c0_i32_1 : i32, i32, i32
  }
  func.func @transform_4(%arg0: i32) -> (i32, i32) {
    %c0_i32 = arith.constant 0 : i32
    %c0_i32_0 = arith.constant 0 : i32
    %c0_i32_1 = arith.constant 0 : i32
    return %c0_i32, %c0_i32_0 : i32, i32
  }
  func.func @transform_5(%arg0: i32) -> (i32, i32) {
    %c0_i32 = arith.constant 0 : i32
    %c0_i32_0 = arith.constant 0 : i32
    %c0_i32_1 = arith.constant 0 : i32
    return %c0_i32, %c0_i32_0 : i32, i32
  }
  func.func @transform_6(%arg0: i32) -> (i32, i32) {
    %c0_i32 = arith.constant 0 : i32
    %c0_i32_0 = arith.constant 0 : i32
    %c0_i32_1 = arith.constant 0 : i32
    return %c0_i32, %c0_i32_0 : i32, i32
  }
  func.func @transform_7(%arg0: i32) -> (i32, i32) {
    %c0_i32 = arith.constant 0 : i32
    %c0_i32_0 = arith.constant 0 : i32
    %c0_i32_1 = arith.constant 0 : i32
    return %c0_i32, %c0_i32_0 : i32, i32
  }
  func.func @transform_8(%arg0: i32) -> (i32, i32, i32) {
    %c0_i32 = arith.constant 0 : i32
    %c0_i32_0 = arith.constant 0 : i32
    %c0_i32_1 = arith.constant 0 : i32
    return %arg0, %c0_i32, %c0_i32_0 : i32, i32, i32
  }
}

</mosaic_0001>

<bundles_post_ra>
// kernel: tpu_custom_call.1
= control target key start
LH: loop header
LB: loop body
LE: loop exit
PB: predicated region body
PF: predicated region fallthrough
CT: control target
= control target key end

     0   :  { %13 = vsyncpa [#allocation4], 0  ;;  %s7201_s0 = inlined_call_operand.hbm [shape: bf16[2,16,16,32], index: 0, kind: input, shape index: {}]   ;;  %s7202_s1 = inlined_call_operand.hbm [shape: bf16[16,16], index: 1, kind: input, shape index: {}]   ;;  %s7203_s2 = inlined_call_operand.vmem [shape: f32[1,16], index: 2, kind: input, shape index: {}]   ;;  %s7204_s3 = inlined_call_operand.hbm [shape: f32[3,3,16], index: 3, kind: input, shape index: {}]   ;;  %s7205_s4 = inlined_call_operand.vmem [shape: f32[1,16], index: 4, kind: input, shape index: {}]   ;;  %s7206_s5 = inlined_call_operand.vmem [shape: bf16[16,32], index: 5, kind: input, shape index: {}]   ;;  %s7207_s6 = inlined_call_operand.vmem [shape: f32[1,32], index: 6, kind: input, shape index: {}]   ;;  %s7208_s7 = inlined_call_operand.vmem [shape: bf16[16,32], index: 7, kind: input, shape index: {}]   ;;  %s7209_s8 = inlined_call_operand.hbm [shape: bf16[2,16,512], index: 8, kind: output, shape index: {}]  }
   0x1   :  { %15 = vsyncpa [#allocation4 + $0x1], 0 }
   0x2   :  { %16 = vsyncpa [#allocation7], 0 }
   0x3   :  { %17 = vsyncpa [#allocation5], 0 }
   0x4   :  { %19 = vsyncpa [#allocation5 + $0x1], 0  ;;  %s4580_s27 = smov 0   ;;  %s4582_s28 = smov 0  }
   0x5   :  { %s4584_s29 = smov 0   ;;  %s4586_s30 = smov 0  }
   0x6 LB: > { %s4601_s9 = sadd.s32 4294967295, %s4520_s30   ;;  %s3957_s10 = sadd.s32 4294967294, %s4520_s30   ;;  %s4520_s30 = sphi %s4586_s30, %s7247_s30   ;;  %s4516_s29 = sphi %s4584_s29, %s7246_s29   ;;  %s4512_s28 = sphi %s4582_s28, %s7245_s28   ;;  %s4508_s27 = sphi %s4580_s27, %s7244_s27  }
   0x7   : > { %p45_p0 = scmp.ne.s32.totalorder %s4512_s28, %s4508_s27  ;;  %p7210_p1 = scmp.eq.s32.totalorder %s4601_s9, 0 }
   0x8   : > { %p222_p3 = scmp.eq.s32.totalorder %s3957_s10, 1  ;;  %p3958_p5 = scmp.ge.s32.totalorder %s4520_s30, 1 }
   0x9   : > { %p4610_p4 = por %p7210_p1, %p45_p0  ;;  %p229_p7 = scmp.lt.s32.totalorder %s4520_s30, 3 }
   0xa   : > { %p4615_p6 = por %p222_p3, %p45_p0  ;;  %s4522_s14 = smov [#allocation6]  }
   0xb   : > { %s7215_s11 = scalar_select %p4610_p4, 1, 0 }
   0xc   : > { %s7216_s12 = scalar_select %p4615_p6, 1, 0 }
   0xd   : > { %p4620_p8 = pnand %p3958_p5, %p229_p7  ;;  %s241_s15 = sshll.u32 %s4522_s14, 4  ;;  %s4624_s15 = int_to_ptr.vmem [resolvable:$true] %s241_s15 }
   0xe   : > { %s4523_s17 = smov [#allocation8]   ;;  %s4364_s21 = scalar_lea.hbm %s7202_s1, 128 }
   0xf   : > { %p4278_p9 = pneg %p4620_p8  ;;  %s257_s18 = sshll.u32 %s4523_s17, 4  ;;  %s4635_s18 = int_to_ptr.vmem [resolvable:$true] %s257_s18 }
  0x10   : > { %p4365_p12 = scmp.ne.s32.totalorder %s7202_s1, %s4364_s21  ;;  %p4371_p5 = scmp.lt.u32.totalorder %s4364_s21, %s7202_s1 }
  0x11   : > { %p4631_p11 = pnand %p4278_p9, %p7210_p1 }
  0x13   : > { %p4366_p13 = pneg %p4631_p11 }
  0x15   : > { %p4367_p0 = pnand %p4366_p13, %p4365_p12 }
  0x17   : > { %p4368_p3 = pneg %p4367_p0 }
  0x19   : > { %p4373_p7 = pnand %p4371_p5, %p4368_p3 }
  0x1b   : > { %4376 = shalt.err (!%p4373_p7)
}
  0x1c   : > { %s4377_s26 = scalar_lea.vmem %s4624_s15, 128  ;;  %p4385_p2 = scmp.lt.s32.totalorder %s4624_s15, %s4624_s15 }
  0x1d   : > { %p4378_p9 = scmp.ne.s32.totalorder %s4624_s15, %s4377_s26  ;;  %p4386_p12 = scmp.lt.s32.totalorder %s4377_s26, %s4377_s26 }
  0x1f   : > { %p4380_p10 = pnand %p4378_p9, %p4366_p13  ;;  %p4387_p0 = por %p4386_p12, %p4385_p2 }
  0x21   : > { %p4381_p1 = pneg %p4380_p10 }
  0x23   : > { %p4388_p6 = pnand %p4387_p0, %p4381_p1 }
  0x25   : > { %4391 = shalt.err (!%p4388_p6)
}
  0x26   : > { %s7211_s10 = smov 64   ;;  %s7212_s14 = smov 4  }
  0x27   : > { %4281 = dma.hbm_to_vmem [thread:$0]  (!%p4631_p11), %s7202_s1, 128, %s4624_s15, [#allocation7], %s7211_s10, %s7211_s10, %s7212_s14  }
  0x28   : > { %s4392_s22 = scalar_lea.hbm %s7204_s3, 192 }
  0x29   : > { %p4393_p1 = scmp.ne.s32.totalorder %s7204_s3, %s4392_s22  ;;  %p4399_p10 = scmp.lt.u32.totalorder %s4392_s22, %s7204_s3 }
  0x2b   : > { %p4395_p2 = pnand %p4393_p1, %p4366_p13 }
  0x2d   : > { %p4396_p6 = pneg %p4395_p2 }
  0x2f   : > { %p4401_p3 = pnand %p4399_p10, %p4396_p6 }
  0x31   : > { %4404 = shalt.err (!%p4401_p3)
}
  0x32   : > { %s4405_s15 = scalar_lea.vmem %s4635_s18, 192  ;;  %p4413_p12 = scmp.lt.s32.totalorder %s4635_s18, %s4635_s18 }
  0x33   : > { %p4406_p5 = scmp.ne.s32.totalorder %s4635_s18, %s4405_s15  ;;  %p4414_p0 = scmp.lt.s32.totalorder %s4405_s15, %s4405_s15 }
  0x35   : > { %p4408_p7 = pnand %p4406_p5, %p4366_p13  ;;  %p4415_p1 = por %p4414_p0, %p4413_p12 }
  0x37   : > { %p4409_p9 = pneg %p4408_p7 }
  0x39   : > { %p4416_p2 = pnand %p4415_p1, %p4409_p9 }
  0x3b   : > { %4419 = shalt.err (!%p4416_p2)
}
  0x3c   : > { %4284 = dma.hbm_to_vmem [thread:$0]  (!%p4631_p11), %s7204_s3, 192, %s4635_s18, [#allocation7], %s7211_s10, %s7211_s10, %s7212_s14  }
  0x3d   : > { %s4696_s16 = sadd.s32 1, %s4520_s30   ;;  %s32_s20 = sadd.s32 1, %s4516_s29 }
  0x3e   : > { %s29_s21 = ssub.s32 %s4520_s30, %s4696_s16  ;;  %p39_p13 = scmp.ne.s32.totalorder %s4516_s29, %s4512_s28 }
  0x3f   : > { %p30_p6 = scmp.eq.s32.totalorder %s29_s21, 0  ;;  %p40_p10 = scmp.eq.s32.totalorder %s4520_s30, 0 }
  0x40   : > { %p7219_p3 = scmp.eq.s32.totalorder %s4601_s9, 1  ;;  %p4295_p7 = scmp.lt.s32.totalorder %s4520_s30, 2 }
  0x41   : > { %s4712_s23 = scalar_select %p30_p6, %s4516_s29, %s32_s20  }
  0x42   : > { %p4706_p5 = por %p7219_p3, %p39_p13  ;;  %p41_p9 = por %p40_p10, %p39_p13 }
  0x43   : > { %s283_s24 = sand.u32 1, %s4516_s29   ;;  %s4077_s18 = sshll.u32 %s4520_s30, 11 }
  0x44   : > { %s7220_s22 = scalar_select %p4706_p5, 1, 0 }
  0x45   : > { %s3962_s25 = sshll.u32 %s283_s24, 7  ;;  %s4719_s17 = scalar_lea.hbm %s7201_s0, %s4077_s18 }
  0x46   : > { %s287_s19 = scalar_lea.vmem [#allocation3], %s3962_s25  ;;  %p4723_p11 = pnand %p4295_p7, %p41_p9 }
  0x47   : > { %s294_s21 = sshll.u32 %s287_s19, 4  ;;  %s4727_s10 = scalar_lea.sflag [#allocation4], %s283_s24  ;;  %s4721_s21 = int_to_ptr.vmem [resolvable:$true] %s294_s21 }
  0x48   : > { %s4420_s14 = scalar_lea.hbm %s4719_s17, 2048  ;;  %p4422_p0 = pneg %p4723_p11 }
  0x49   : > { %p4421_p12 = scmp.ne.s32.totalorder %s4719_s17, %s4420_s14  ;;  %s4425_s26 = scalar_lea.hbm %s7201_s0, 4096 }
  0x4a   : > { %p4426_p13 = scmp.lt.u32.totalorder %s4719_s17, %s7201_s0  ;;  %p4427_p6 = scmp.lt.u32.totalorder %s4425_s26, %s4420_s14 }
  0x4b   : > { %p4423_p1 = pnand %p4422_p0, %p4421_p12  ;;  %p4429_p3 = scmp.lt.u32.totalorder %s4420_s14, %s4719_s17 }
  0x4c   : > { %p4428_p10 = por %p4427_p6, %p4426_p13 }
  0x4d   : > { %p4424_p2 = pneg %p4423_p1 }
  0x4e   : > { %p4430_p7 = por %p4429_p3, %p4428_p10 }
  0x50   : > { %p4431_p9 = pnand %p4430_p7, %p4424_p2 }
  0x52   : > { %4434 = shalt.err (!%p4431_p9)
}
  0x53   : > { %s4435_s24 = scalar_lea.vmem %s4721_s21, 2048  ;;  %s4526_s25 = smov [#allocation3]  }
  0x54   : > { %p4436_p12 = scmp.ne.s32.totalorder %s4721_s21, %s4435_s24  ;;  %s4440_s18 = sshll.u32 %s4526_s25, 4  ;;  %s4441_s18 = int_to_ptr.vmem [resolvable:$false] %s4440_s18 }
  0x55   : > { %s4442_s15 = scalar_lea.vmem %s4441_s18, 4096  ;;  %p4443_p4 = scmp.lt.s32.totalorder %s4721_s21, %s4441_s18 }
  0x56   : > { %p4438_p1 = pnand %p4436_p12, %p4422_p0  ;;  %p4444_p13 = scmp.lt.s32.totalorder %s4442_s15, %s4435_s24 }
  0x58   : > { %p4439_p5 = pneg %p4438_p1  ;;  %p4445_p6 = por %p4444_p13, %p4443_p4 }
  0x5a   : > { %p4446_p10 = pnand %p4445_p6, %p4439_p5 }
  0x5c   : > { %4449 = shalt.err (!%p4446_p10)
}
  0x5d   : > { %s7222_s14 = smov 4   ;;  %s7223_s26 = smov 64  }
  0x5e   : > { %4288 = dma.hbm_to_vmem [thread:$0]  (!%p4723_p11), %s4719_s17, 2048, %s4721_s21, %s4727_s10, %s7223_s26, %s7223_s26, %s7222_s14  }
  0x5f   : > { %306 = sbr.rel (%p4620_p8) target bundleno = 1160 (0x488), region = 52 }
  0x66   : > { %s4761_s19 = sand.u32 1, %s4512_s28   ;;  %p7224_p4 = scmp.ne.s32.totalorder %s7215_s11, 0 }
  0x67   : > { %s3966_s24 = sshll.u32 %s4761_s19, 7  ;;  %s309_s25 = scalar_lea.sflag [#allocation4], %s4761_s19 }
  0x68   : > { %s4765_s18 = scalar_lea.vmem [#allocation3], %s3966_s24 }
  0x69   : > { %4495 = dma.done.wait (%p7224_p4), %s309_s25, 2048  }
  0x6a   : > { %4497 = vsyncadd (%p7224_p4), %s309_s25, 4294965248  ;;  %p7225_p5 = scmp.eq.s32.totalorder %s4601_s9, 0 }
  0x6c   : > { %4499 = dma.done.wait (%p7225_p5), [#allocation7], 320   ;;  %p7226_p8 = pmov %p7225_p5 }
  0x6d   : > { %v4776_v0 = vld [vmem:[%s4765_s18] sm:$0xff]   ;;  %v4779_v1 = vld [vmem:[%s4765_s18 + $0x8] sm:$0xff]   ;;  %s4527_s11 = smov 112   ;;  %v4784_v2 = vld [vmem:[%s4765_s18 + $0x10] sm:$0xff]   ;;  %vm354_vm0 = vcmask 130048   ;;  %vm363_vm1 = vcmask 122880   ;;  %v891_v36 = vlaneseq }
  0x6e   : > { %4501 = vsyncadd (%p7226_p8), [#allocation7], 4294966976  ;;  %521 = vrot.lane.b32.xlu0 %v4776_v0, %s4527_s11  ;;  %525 = vrot.lane.b32.xlu1 %v4784_v2, %s4527_s11  ;;  %v4789_v3 = vld [vmem:[%s4765_s18 + $0x18] sm:$0xff]   ;;  %v4794_v4 = vld [vmem:[%s4765_s18 + $0x20] sm:$0xff]   ;;  %v4528_v17 = vmov 0.0   ;;  %vm357_vm2 = vcmask 123904  }
  0x6f   : > { %v4799_v5 = vld [vmem:[%s4765_s18 + $0x28] sm:$0xff]   ;;  %v4804_v6 = vld [vmem:[%s4765_s18 + $0x30] sm:$0xff]   ;;  %v4809_v7 = vld [vmem:[%s4765_s18 + $0x38] sm:$0xff]   ;;  %366 = vst.msk [vmem:[#allocation2 + $0x30] sm:$0x1] %vm363_vm1, %v4528_v17  ;;  %v892_v37 = vshrl.u32 %v891_v36, 7 }
  0x70   : > { %v4814_v8 = vld [vmem:[%s4765_s18 + $0x40] sm:$0xff]   ;;  %v4817_v9 = vld [vmem:[%s4765_s18 + $0x48] sm:$0xff]   ;;  %v4824_v11 = vld [vmem:[%s4765_s18 + $0x50] sm:$0xff]   ;;  %355 = vst.msk [vmem:[#allocation2] sm:$0xff] %vm354_vm0, %v4528_v17  ;;  %vm1059_vm3 = vcmask 1046528   ;;  %vm1304_vm4 = vcmask 1045504  }
  0x71   : > { %v4358_v10 = vld [vmem:[#allocation6] sm:$0xff]   ;;  %v4829_v12 = vld [vmem:[%s4765_s18 + $0x58] sm:$0xff]   ;;  %v4839_v14 = vld [vmem:[%s4765_s18 + $0x68] sm:$0xff]   ;;  %356 = vst.msk [vmem:[#allocation2 + $0x8] sm:$0xff] %vm354_vm0, %v4528_v17  ;;  %v961_v38 = vsub.s32 1, %v892_v37  ;;  %v1206_v40 = vsub.s32 2, %v892_v37 }
  0x72   : > { %523 = vrot.lane.b32.xlu0 %v4779_v1, %s4527_s11  ;;  %527 = vrot.lane.b32.xlu1 %v4789_v3, %s4527_s11  ;;  %v4834_v13 = vld [vmem:[%s4765_s18 + $0x60] sm:$0xff]   ;;  %v4844_v15 = vld [vmem:[%s4765_s18 + $0x70] sm:$0xff]   ;;  %360 = vst.msk [vmem:[#allocation2 + $0x198] sm:$0xff] %vm354_vm0, %v4528_v17  ;;  %361 = vst.msk [vmem:[#allocation2 + $0x1a0] sm:$0xff] %vm354_vm0, %v4528_v17  ;;  %v893_v45 = vsub.s32 0, %v892_v37  ;;  %vm3169_vm5 = vcmask 1041409  }
  0x73   : > { %4162 = vmatprep.subr.bf16.mxu0 %v4358_v10  ;;  %4264 = vmatprep.subr.bf16.mxu1 %v4358_v10  ;;  %v4849_v16 = vld [vmem:[%s4765_s18 + $0x78] sm:$0xff]   ;;  %365 = vst.msk [vmem:[#allocation2 + $0x18] sm:$0x1] %vm363_vm1, %v4528_v17  ;;  %367 = vst.msk [vmem:[#allocation2 + $0x48] sm:$0x1] %vm363_vm1, %v4528_v17  ;;  %v4359_v34 = vld [vmem:[%s7206_s5] sm:$0xff]  }
  0x74   : > { %4163 = vmatpush3.bf16.msra.mxu0 %v4358_v10  ;;  %4265 = vmatpush3.bf16.msra.mxu1 %v4358_v10  ;;  %368 = vst.msk [vmem:[#allocation2 + $0x60] sm:$0x1] %vm363_vm1, %v4528_v17  ;;  %369 = vst.msk [vmem:[#allocation2 + $0x78] sm:$0x1] %vm363_vm1, %v4528_v17  ;;  %v4360_v35 = vld [vmem:[%s7208_s7] sm:$0xff]   ;;  %vm3172_vm6 = vcmask 1042434  }
  0x75   : > { %370 = vst.msk [vmem:[#allocation2 + $0x90] sm:$0x1] %vm363_vm1, %v4528_v17  ;;  %371 = vst.msk [vmem:[#allocation2 + $0xa8] sm:$0x1] %vm363_vm1, %v4528_v17  ;;  %4196 = vmatprep.subr.bf16.mxu1 %v4359_v34  ;;  %4230 = vmatprep.subr.bf16.mxu0 %v4360_v35  ;;  %v800_v39 = vld [vmem:[#allocation8] sm:$0x7] }
  0x76   : > { %529 = vrot.lane.b32.xlu0 %v4794_v4, %s4527_s11  ;;  %531 = vrot.lane.b32.xlu1 %v4799_v5, %s4527_s11  ;;  %372 = vst.msk [vmem:[#allocation2 + $0xc0] sm:$0x1] %vm363_vm1, %v4528_v17  ;;  %373 = vst.msk [vmem:[#allocation2 + $0xd8] sm:$0x1] %vm363_vm1, %v4528_v17  ;;  %v4991_v41 = vrot.slane %v800_v39, %v961_v38  ;;  %v4993_v46 = vrot.slane %v800_v39, %v1206_v40  ;;  %v5001_v50 = vld [vmem:[%s7203_s2] ss:$0 sm:$0xff] }
  0x77   : > { %374 = vst.msk [vmem:[#allocation2 + $0xf0] sm:$0x1] %vm363_vm1, %v4528_v17  ;;  %375 = vst.msk [vmem:[#allocation2 + $0x108] sm:$0x1] %vm363_vm1, %v4528_v17  ;;  %v5003_v51 = vrot.slane %v800_v39, %v893_v45  ;;  %vm3175_vm7 = vcmask 1043459   ;;  %vm3178_vm8 = vcmask 1044484  }
  0x78   : > { %376 = vst.msk [vmem:[#allocation2 + $0x120] sm:$0x1] %vm363_vm1, %v4528_v17  ;;  %377 = vst.msk [vmem:[#allocation2 + $0x138] sm:$0x1] %vm363_vm1, %v4528_v17  ;;  %v838_v43 = vld [vmem:[#allocation2 + $0x8] sm:$0xff]  ;;  %vm3181_vm9 = vcmask 1045509  }
  0x79   : > { %378 = vst.msk [vmem:[#allocation2 + $0x150] sm:$0x1] %vm363_vm1, %v4528_v17  ;;  %379 = vst.msk [vmem:[#allocation2 + $0x168] sm:$0x1] %vm363_vm1, %v4528_v17  ;;  %v964_v48 = vmul.f32 %v4991_v41, %v838_v43  ;;  %v1209_v54 = vmul.f32 %v4993_v46, %v838_v43  ;;  %vm3184_vm10 = vcmask 1046534   ;;  %vm3187_vm11 = vcmask 1047559  }
  0x7a   : > { %533 = vrot.lane.b32.xlu0 %v4804_v6, %s4527_s11  ;;  %535 = vrot.lane.b32.xlu1 %v4809_v7, %s4527_s11  ;;  %380 = vst.msk [vmem:[#allocation2 + $0x180] sm:$0x1] %vm363_vm1, %v4528_v17  ;;  %383 = vst.msk [vmem:[#allocation2 + $0x29] sm:$0x1] %vm363_vm1, %v4528_v17  ;;  %s4529_s17 = smov 64   ;;  %s4530_s21 = smov 32  }
  0x7b   : > { %384 = vst.msk [vmem:[#allocation2 + $0x41] sm:$0x1] %vm363_vm1, %v4528_v17  ;;  %385 = vst.msk [vmem:[#allocation2 + $0x59] sm:$0x1] %vm363_vm1, %v4528_v17  ;;  %v1061_v59 = vrot.slane %v964_v48, 1  ;;  %s3969_s20 = sshll.u32 %s4761_s19, 5 }
  0x7c   : > { %386 = vst.msk [vmem:[#allocation2 + $0x71] sm:$0x1] %vm363_vm1, %v4528_v17  ;;  %387 = vst.msk [vmem:[#allocation2 + $0x89] sm:$0x1] %vm363_vm1, %v4528_v17  ;;  %vm3207_vm12 = vcmask 257024   ;;  %s4531_s15 = smov 96  }
  0x7d   : > { %388 = vst.msk [vmem:[#allocation2 + $0xa1] sm:$0x1] %vm363_vm1, %v4528_v17  ;;  %389 = vst.msk [vmem:[#allocation2 + $0xb9] sm:$0x1] %vm363_vm1, %v4528_v17  ;;  %s6682_s14 = scalar_lea.vmem [#allocation9], %s3969_s20  ;;  %vm3246_vm13 = vcmask 519424  }
  0x7e   : > { %537 = vrot.lane.b32.xlu0 %v4814_v8, %s4527_s11  ;;  %539 = vrot.lane.b32.xlu1 %v4817_v9, %s4527_s11  ;;  %390 = vst.msk [vmem:[#allocation2 + $0xd1] sm:$0x1] %vm363_vm1, %v4528_v17  ;;  %391 = vst.msk [vmem:[#allocation2 + $0xe9] sm:$0x1] %vm363_vm1, %v4528_v17  ;;  %vm3285_vm14 = vcmask 781824   ;;  %vm3324_vm15 = vcmask 1044224  }
  0x7f   : > { %392 = vst.msk [vmem:[#allocation2 + $0x101] sm:$0x1] %vm363_vm1, %v4528_v17  ;;  %393 = vst.msk [vmem:[#allocation2 + $0x119] sm:$0x1] %vm363_vm1, %v4528_v17  ;;  %s4110_s25 = sshll.u32 %s4601_s9, 9  ;;  %s3865_s18 = sshll.u32 %s6682_s14, 4  ;;  %s7155_s18 = int_to_ptr.vmem [resolvable:$true] %s3865_s18 }
  0x80   : > { %394 = vst.msk [vmem:[#allocation2 + $0x131] sm:$0x1] %vm363_vm1, %v4528_v17  ;;  %395 = vst.msk [vmem:[#allocation2 + $0x149] sm:$0x1] %vm363_vm1, %v4528_v17  ;;  %s7153_s10 = scalar_lea.hbm %s7209_s8, %s4110_s25  ;;  %p7241_p0 = scmp.ne.s32.totalorder %s7220_s22, 0 }
  0x81   : > { %396 = vst.msk [vmem:[#allocation2 + $0x161] sm:$0x1] %vm363_vm1, %v4528_v17  ;;  %397 = vst.msk [vmem:[#allocation2 + $0x179] sm:$0x1] %vm363_vm1, %v4528_v17  ;;  %s4532_s9 = smov [#allocation9]  }
  0x82   : > { %541 = vrot.lane.b32.xlu0 %v4824_v11, %s4527_s11  ;;  %543 = vrot.lane.b32.xlu1 %v4829_v12, %s4527_s11  ;;  %398 = vst.msk [vmem:[#allocation2 + $0x191] sm:$0x1] %vm363_vm1, %v4528_v17  ;;  %364 = vst.msk [vmem:[#allocation2] sm:$0x1] %vm363_vm1, %v4528_v17  ;;  %s4454_s20 = sshll.u32 %s4532_s9, 4  ;;  %s4455_s20 = int_to_ptr.vmem [resolvable:$false] %s4454_s20 }
  0x83   : > { %381 = vst.msk [vmem:[#allocation2 + $0x198] sm:$0x1] %vm363_vm1, %v4528_v17  ;;  %p4457_p7 = scmp.lt.s32.totalorder %s7155_s18, %s4455_s20 }
  0x84   : > { %358 = vst.msk [vmem:[#allocation2 + $0x10] sm:$0x3] %vm357_vm2, %v4528_v17  ;;  %362 = vst.msk [vmem:[#allocation2 + $0x1a8] sm:$0x3] %vm357_vm2, %v4528_v17 }
  0x85   : > { %382 = vst.msk [vmem:[#allocation2 + $0x11] sm:$0x1] %vm363_vm1, %v4528_v17  ;;  %399 = vst.msk [vmem:[#allocation2 + $0x1a9] sm:$0x1] %vm363_vm1, %v4528_v17 }
  0x86   : > { %545 = vrot.lane.b32.xlu0 %v4834_v13, %s4527_s11  ;;  %547 = vrot.lane.b32.xlu1 %v4839_v14, %s4527_s11 }
  0x89   : > { %v837_v42 = vld [vmem:[#allocation2] sm:$0xff] }
  0x8a   : > { %549 = vrot.lane.b32.xlu0 %v4844_v15, %s4527_s11  ;;  %551 = vrot.lane.b32.xlu1 %v4849_v16, %s4527_s11  ;;  %v963_v47 = vmul.f32 %v4991_v41, %v837_v42  ;;  %v1208_v52 = vmul.f32 %v4993_v46, %v837_v42  ;;  %v895_v63 = vmul.f32 %v5003_v51, %v837_v42 }
  0x8c   : > { %v839_v44 = vld [vmem:[#allocation2 + $0x10] sm:$0x3]  ;;  %v1060_v58 = vrot.slane %v963_v47, 1 }
  0x8d   : > { %v965_v49 = vmul.f32 %v4991_v41, %v839_v44  ;;  %v1210_v55 = vmul.f32 %v4993_v46, %v839_v44 }
  0x8e   : > { %v1062_v10 = vsel %vm1059_vm3, %v1060_v58, %v1061_v59 }
  0x8f   : > { %v1063_v60 = vrot.slane %v965_v49, 1 }
  0xe0   : > { %v522_v18 = vpop.permute.xlu0 %521  ;;  %v526_v19 = vpop.permute.xlu1 %525 }
  0xe1   : > { %4164 = vmatprep.mubr.msk.bf16.mxu0 %vm354_vm0, %v522_v18 }
  0xe4   : > { %v524_v20 = vpop.permute.xlu0 %523  ;;  %v528_v21 = vpop.permute.xlu1 %527 }
  0xe5   : > { %4165 = vmatmul.mubr.msk.bf16.vlgmr.msra.gmra.mrb[0].mxu0 %vm354_vm0, %v524_v20 }
  0xe6   : > { %4168 = vmatprep.mubr.msk.bf16.mxu0 %vm354_vm0, %v526_v19  ;;  %4231 = vmatpush3.bf16.msra.mxu0 %v4360_v35 }
  0xe8   : > { %v530_v22 = vpop.permute.xlu0 %529  ;;  %v532_v23 = vpop.permute.xlu1 %531 }
  0xec   : > { %v534_v24 = vpop.permute.xlu0 %533  ;;  %v536_v25 = vpop.permute.xlu1 %535 }
  0xed   : > { %4169 = vmatmul.mubr.msk.bf16.gmra.mrb[4].mxu0 %vm354_vm0, %v528_v21 }
  0xee   : > { %4172 = vmatprep.mubr.msk.bf16.mxu0 %vm354_vm0, %v530_v22 }
  0xf0   : > { %v538_v26 = vpop.permute.xlu0 %537  ;;  %v540_v27 = vpop.permute.xlu1 %539 }
  0xf1   : > { %4180 = vmatprep.mubr.msk.bf16.mxu1 %vm354_vm0, %v538_v26 }
  0xf2   : > { %4181 = vmatmul.mubr.msk.bf16.vlgmr.msra.gmra.mrb[0].mxu1 %vm354_vm0, %v540_v27 }
  0xf3   : > { %4197 = vmatpush3.bf16.msra.mxu1 %v4359_v34 }
  0xf4   : > { %v542_v28 = vpop.permute.xlu0 %541  ;;  %v544_v29 = vpop.permute.xlu1 %543 }
  0xf5   : > { %4173 = vmatmul.mubr.msk.bf16.gmra.mrb[8].mxu0 %vm354_vm0, %v532_v23  ;;  %4184 = vmatprep.mubr.msk.bf16.mxu1 %vm354_vm0, %v542_v28 }
  0xf6   : > { %4176 = vmatprep.mubr.msk.bf16.mxu0 %vm354_vm0, %v534_v24 }
  0xf8   : > { %v546_v30 = vpop.permute.xlu0 %545  ;;  %v548_v31 = vpop.permute.xlu1 %547 }
  0xfa   : > { %4185 = vmatmul.mubr.msk.bf16.gmra.mrb[4].mxu1 %vm354_vm0, %v544_v29 }
  0xfb   : > { %4188 = vmatprep.mubr.msk.bf16.mxu1 %vm354_vm0, %v546_v30 }
  0xfc   : > { %v550_v32 = vpop.permute.xlu0 %549  ;;  %v552_v33 = vpop.permute.xlu1 %551 }
  0xfd   : > { %4177 = vmatmul.mubr.msk.bf16.gmra.mrb[12].mxu0 %vm354_vm0, %v536_v25 }
  0xfe   : > { %4232 = vmatprep.mubr.msk.bf16.mxu0 %vm354_vm0, %v4776_v0 }
 0x102   : > { %4189 = vmatmul.mubr.msk.bf16.gmra.mrb[8].mxu1 %vm354_vm0, %v548_v31 }
 0x103   : > { %4192 = vmatprep.mubr.msk.bf16.mxu1 %vm354_vm0, %v550_v32 }
 0x105   : > { %4233 = vmatmul.mubr.msk.bf16.vlgmr.msra.gmra.mrb[16].mxu0 %vm354_vm0, %v4779_v1 }
 0x106   : > { %4236 = vmatprep.mubr.msk.bf16.mxu0 %vm354_vm0, %v4784_v2 }
 0x10a   : > { %4193 = vmatmul.mubr.msk.bf16.gmra.mrb[12].mxu1 %vm354_vm0, %v552_v33 }
 0x10d   : > { %4237 = vmatmul.mubr.msk.bf16.gmra.mrb[20].mxu0 %vm354_vm0, %v4789_v3  ;;  %v896_v3 = vmul.f32 %v5003_v51, %v838_v43 }
 0x10e   : > { %4240 = vmatprep.mubr.msk.bf16.mxu0 %vm354_vm0, %v4794_v4  ;;  %v1305_v4 = vrot.slane %v1208_v52, 2 }
 0x115   : > { %4241 = vmatmul.mubr.msk.bf16.gmra.mrb[24].mxu0 %vm354_vm0, %v4799_v5 }
 0x116   : > { %4244 = vmatprep.mubr.msk.bf16.mxu0 %vm354_vm0, %v4804_v6 }
 0x11d   : > { %4245 = vmatmul.mubr.msk.bf16.gmra.mrb[28].mxu0 %vm354_vm0, %v4809_v7  ;;  %v1306_v7 = vrot.slane %v1209_v54, 2 }
 0x11e   : > { %4248 = vmatprep.mubr.msk.bf16.mxu0 %vm354_vm0, %v4814_v8  ;;  %v1308_v8 = vrot.slane %v1210_v55, 2 }
 0x11f   : > { %v1307_v18 = vsel %vm1304_vm4, %v1305_v4, %v1306_v7 }
 0x120   : > { %v1309_v19 = vsel %vm1304_vm4, %v1306_v7, %v1308_v8 }
 0x125   : > { %4249 = vmatmul.mubr.msk.bf16.gmra.mrb[32].mxu0 %vm354_vm0, %v4817_v9 }
 0x126   : > { %4252 = vmatprep.mubr.msk.bf16.mxu0 %vm354_vm0, %v4824_v11  ;;  %v1064_v11 = vsel %vm1059_vm3, %v1061_v59, %v1063_v60 }
 0x127   : > { %v1173_v17 = vadd.f32 %v1064_v11, %v896_v3 }
 0x129   : > { %v1418_v37 = vadd.f32 %v1309_v19, %v1173_v17 }
 0x12d   : > { %4253 = vmatmul.mubr.msk.bf16.gmra.mrb[36].mxu0 %vm354_vm0, %v4829_v12 }
 0x12e   : > { %4256 = vmatprep.mubr.msk.bf16.mxu0 %vm354_vm0, %v4834_v13  ;;  %v802_v13 = vld [vmem:[#allocation8 + $0x8] sm:$0x7] }
 0x12f   : > { %v5023_v22 = vrot.slane %v802_v13, %v893_v45  ;;  %v5025_v23 = vrot.slane %v802_v13, %v961_v38  ;;  %v5027_v24 = vrot.slane %v802_v13, %v1206_v40 }
 0x135   : > { %4257 = vmatmul.mubr.msk.bf16.gmra.mrb[40].mxu0 %vm354_vm0, %v4839_v14  ;;  %v801_v14 = vld [vmem:[#allocation8 + $0x4] sm:$0x7] }
 0x136   : > { %4260 = vmatprep.mubr.msk.bf16.mxu0 %vm354_vm0, %v4844_v15  ;;  %v5030_v27 = vrot.slane %v801_v14, %v893_v45  ;;  %v5032_v28 = vrot.slane %v801_v14, %v961_v38  ;;  %v5034_v29 = vrot.slane %v801_v14, %v1206_v40 }
 0x13d   : > { %4261 = vmatmul.mubr.msk.bf16.gmra.mrb[44].mxu0 %vm354_vm0, %v4849_v16  ;;  %v1172_v16 = vadd.f32 %v1062_v10, %v895_v63 }
 0x13f   : > { %v1417_v36 = vadd.f32 %v1307_v18, %v1172_v16 }
 0x1b8   : > { %v4166_v53 = vpop.f32.mrb[0].mxu0 }
 0x1b9   : > { %v650_v56 = vadd.f32 %v4166_v53, %v5001_v50  ;;  %v641_v57 = vpop.f32.mrb[1].mxu0 }
 0x1ba   : > { %v642_v61 = vadd.f32 %v5001_v50, %v641_v57  ;;  %v4167_v62 = vpop.f32.mrb[2].mxu0 }
 0x1bb   : > { %v770_v0 = vmax.f32 %v650_v56, 0.0  ;;  %v653_v1 = vadd.f32 %v4167_v62, %v5001_v50  ;;  %v644_v2 = vpop.f32.mrb[3].mxu0 }
 0x1bc   : > { %v768_v5 = vmax.f32 %v642_v61, 0.0  ;;  %v645_v6 = vadd.f32 %v5001_v50, %v644_v2 }
 0x1bd   : > { %807 = vst.msk [vmem:[#allocation2 + $0x31] sm:$0xff] %vm354_vm0, %v770_v0  ;;  %v771_v9 = vmax.f32 %v653_v1, 0.0 }
 0x1be   : > { %805 = vst.msk [vmem:[#allocation2 + $0x19] sm:$0xff] %vm354_vm0, %v768_v5  ;;  %v769_v12 = vmax.f32 %v645_v6, 0.0 }
 0x1bf   : > { %808 = vst.msk [vmem:[#allocation2 + $0x39] sm:$0xff] %vm354_vm0, %v771_v9 }
 0x1c0   : > { %806 = vst.msk [vmem:[#allocation2 + $0x21] sm:$0xff] %vm354_vm0, %v769_v12  ;;  %v4170_v15 = vpop.f32.mrb[4].mxu0 }
 0x1c1   : > { %v666_v20 = vadd.f32 %v4170_v15, %v5001_v50  ;;  %v657_v21 = vpop.f32.mrb[5].mxu0 }
 0x1c2   : > { %v658_v25 = vadd.f32 %v5001_v50, %v657_v21  ;;  %v4171_v26 = vpop.f32.mrb[6].mxu0 }
 0x1c3   : > { %v774_v30 = vmax.f32 %v666_v20, 0.0  ;;  %v669_v31 = vadd.f32 %v4171_v26, %v5001_v50  ;;  %v660_v32 = vpop.f32.mrb[7].mxu0 }
 0x1c4   : > { %v5037_v33 = vld [vmem:[#allocation2 + $0x30] sm:$0xff]  ;;  %v772_v34 = vmax.f32 %v658_v25, 0.0  ;;  %v661_v35 = vadd.f32 %v5001_v50, %v660_v32 }
 0x1c5   : > { %811 = vst.msk [vmem:[#allocation2 + $0x61] sm:$0xff] %vm354_vm0, %v774_v30  ;;  %v775_v39 = vmax.f32 %v669_v31, 0.0  ;;  %v5041_v42 = vld [vmem:[#allocation2 + $0x18] sm:$0xff]  ;;  %v5045_v38 = vmul.f32 %v5023_v22, %v5037_v33  ;;  %v5049_v40 = vmul.f32 %v5025_v23, %v5037_v33  ;;  %v5053_v43 = vmul.f32 %v5027_v24, %v5037_v33  ;;  %v4182_v47 = vpop.f32.mrb[0].mxu1 }
 0x1c6   : > { %v5055_v44 = vld [vmem:[#allocation2 + $0x38] sm:$0xff]  ;;  %809 = vst.msk [vmem:[#allocation2 + $0x49] sm:$0xff] %vm354_vm0, %v772_v34  ;;  %v773_v45 = vmax.f32 %v661_v35, 0.0  ;;  %v5058_v48 = vld [vmem:[#allocation2 + $0x40] sm:$0x3]  ;;  %v1453_v49 = vmul.f32 %v5030_v27, %v5041_v42  ;;  %v5064_v52 = vmul.f32 %v5032_v28, %v5041_v42  ;;  %v5068_v53 = vmul.f32 %v5034_v29, %v5041_v42  ;;  %v705_v55 = vpop.f32.mrb[1].mxu1 }
 0x1c7   : > { %812 = vst.msk [vmem:[#allocation2 + $0x69] sm:$0xff] %vm354_vm0, %v775_v39  ;;  %v714_v54 = vadd.f32 %v4182_v47, %v5001_v50  ;;  %v5072_v56 = vld [vmem:[#allocation2 + $0x20] sm:$0xff]  ;;  %v842_v57 = vld [vmem:[#allocation2 + $0x28] sm:$0x3]  ;;  %v5076_v58 = vmul.f32 %v5023_v22, %v5055_v44  ;;  %v5080_v59 = vmul.f32 %v5025_v23, %v5055_v44  ;;  %v5084_v60 = vmul.f32 %v5025_v23, %v5058_v48  ;;  %v4183_v63 = vpop.f32.mrb[2].mxu1 }
 0x1c8   : > { %810 = vst.msk [vmem:[#allocation2 + $0x51] sm:$0xff] %vm354_vm0, %v773_v45  ;;  %v4174_v61 = vpop.f32.mrb[8].mxu0  ;;  %v706_v62 = vadd.f32 %v5001_v50, %v705_v55  ;;  %v5089_v0 = vmul.f32 %v4991_v41, %v842_v57  ;;  %v5092_v1 = vmul.f32 %v4993_v46, %v842_v57  ;;  %v1454_v2 = vmul.f32 %v5030_v27, %v5072_v56  ;;  %v708_v7 = vpop.f32.mrb[3].mxu1 }
 0x1c9   : > { %v682_v3 = vadd.f32 %v4174_v61, %v5001_v50  ;;  %v673_v4 = vpop.f32.mrb[9].mxu0  ;;  %v786_v5 = vmax.f32 %v714_v54, 0.0  ;;  %v717_v6 = vadd.f32 %v4183_v63, %v5001_v50  ;;  %v1485_v8 = vadd.f32 %v1453_v49, %v1417_v36 }
 0x1ca   : > { %v674_v9 = vadd.f32 %v5001_v50, %v673_v4  ;;  %v4175_v10 = vpop.f32.mrb[10].mxu0  ;;  %v784_v11 = vmax.f32 %v706_v62, 0.0  ;;  %v709_v12 = vadd.f32 %v5001_v50, %v708_v7  ;;  %v1068_v13 = vrot.slane %v5089_v0, 1 }
 0x1cb   : > { %v778_v14 = vmax.f32 %v682_v3, 0.0  ;;  %v685_v15 = vadd.f32 %v4175_v10, %v5001_v50  ;;  %v676_v16 = vpop.f32.mrb[11].mxu0  ;;  %823 = vst.msk [vmem:[#allocation2 + $0xf1] sm:$0xff] %vm354_vm0, %v786_v5  ;;  %v787_v17 = vmax.f32 %v717_v6, 0.0  ;;  %v1313_v18 = vrot.slane %v5092_v1, 2 }
 0x1cc   : > { %v776_v19 = vmax.f32 %v674_v9, 0.0  ;;  %v677_v20 = vadd.f32 %v5001_v50, %v676_v16  ;;  %821 = vst.msk [vmem:[#allocation2 + $0xd9] sm:$0xff] %vm354_vm0, %v784_v11  ;;  %v785_v21 = vmax.f32 %v709_v12, 0.0  ;;  %v1486_v25 = vadd.f32 %v1454_v2, %v1418_v37 }
 0x1cd   : > { %815 = vst.msk [vmem:[#allocation2 + $0x91] sm:$0xff] %vm354_vm0, %v778_v14  ;;  %v779_v26 = vmax.f32 %v685_v15, 0.0  ;;  %824 = vst.msk [vmem:[#allocation2 + $0xf9] sm:$0xff] %vm354_vm0, %v787_v17  ;;  %v1522_v30 = vmul.f32 %v5032_v28, %v5072_v56  ;;  %v1523_v31 = vmul.f32 %v5032_v28, %v842_v57  ;;  %v1617_v32 = vrot.slane %v5064_v52, 1  ;;  %v4186_v35 = vpop.f32.mrb[4].mxu1 }
 0x1ce   : > { %813 = vst.msk [vmem:[#allocation2 + $0x79] sm:$0xff] %vm354_vm0, %v776_v19  ;;  %v777_v34 = vmax.f32 %v677_v20, 0.0  ;;  %822 = vst.msk [vmem:[#allocation2 + $0xe1] sm:$0xff] %vm354_vm0, %v785_v21  ;;  %v1766_v36 = vmul.f32 %v5034_v29, %v5072_v56  ;;  %v1767_v37 = vmul.f32 %v5034_v29, %v842_v57  ;;  %v1861_v39 = vrot.slane %v5068_v53, 2  ;;  %v721_v47 = vpop.f32.mrb[5].mxu1 }
 0x1cf   : > { %816 = vst.msk [vmem:[#allocation2 + $0x99] sm:$0xff] %vm354_vm0, %v779_v26  ;;  %v730_v45 = vadd.f32 %v4186_v35, %v5001_v50  ;;  %v1618_v49 = vrot.slane %v1522_v30, 1  ;;  %v1620_v52 = vrot.slane %v1523_v31, 1  ;;  %v2173_v54 = vrot.slane %v5049_v40, 1  ;;  %v4187_v62 = vpop.f32.mrb[6].mxu1 }
 0x1d0   : > { %814 = vst.msk [vmem:[#allocation2 + $0x81] sm:$0xff] %vm354_vm0, %v777_v34  ;;  %v4178_v55 = vpop.f32.mrb[12].mxu0  ;;  %v722_v61 = vadd.f32 %v5001_v50, %v721_v47  ;;  %v1862_v63 = vrot.slane %v1766_v36, 2  ;;  %v1864_v2 = vrot.slane %v1767_v37, 2  ;;  %v2174_v57 = vrot.slane %v5080_v59, 1  ;;  %v724_v6 = vpop.f32.mrb[7].mxu1 }
 0x1d1   : > { %v698_v53 = vadd.f32 %v4178_v55, %v5001_v50  ;;  %v689_v3 = vpop.f32.mrb[13].mxu0  ;;  %v790_v4 = vmax.f32 %v730_v45, 0.0  ;;  %v733_v5 = vadd.f32 %v4187_v62, %v5001_v50  ;;  %v1619_v7 = vsel %vm1059_vm3, %v1617_v32, %v1618_v49 }
 0x1d2   : > { %v690_v40 = vadd.f32 %v5001_v50, %v689_v3  ;;  %v4179_v9 = vpop.f32.mrb[14].mxu0  ;;  %v788_v10 = vmax.f32 %v722_v61, 0.0  ;;  %v725_v11 = vadd.f32 %v5001_v50, %v724_v6  ;;  %v1621_v12 = vsel %vm1059_vm3, %v1618_v49, %v1620_v52 }
 0x1d3   : > { %v782_v14 = vmax.f32 %v698_v53, 0.0  ;;  %v701_v59 = vadd.f32 %v4179_v9, %v5001_v50  ;;  %v692_v15 = vpop.f32.mrb[15].mxu0  ;;  %827 = vst.msk [vmem:[#allocation2 + $0x121] sm:$0xff] %vm354_vm0, %v790_v4  ;;  %v791_v16 = vmax.f32 %v733_v5, 0.0  ;;  %v1729_v17 = vadd.f32 %v1619_v7, %v1485_v8 }
 0x1d4   : > { %v780_v19 = vmax.f32 %v690_v40, 0.0  ;;  %v693_v20 = vadd.f32 %v5001_v50, %v692_v15  ;;  %825 = vst.msk [vmem:[#allocation2 + $0x109] sm:$0xff] %vm354_vm0, %v788_v10  ;;  %v789_v21 = vmax.f32 %v725_v11, 0.0  ;;  %v1730_v26 = vadd.f32 %v1621_v12, %v1486_v25 }
 0x1d5   : > { %819 = vst.msk [vmem:[#allocation2 + $0xc1] sm:$0xff] %vm354_vm0, %v782_v14  ;;  %v783_v30 = vmax.f32 %v701_v59, 0.0  ;;  %828 = vst.msk [vmem:[#allocation2 + $0x129] sm:$0xff] %vm354_vm0, %v791_v16  ;;  %v1863_v31 = vsel %vm1304_vm4, %v1861_v39, %v1862_v63  ;;  %v1865_v32 = vsel %vm1304_vm4, %v1862_v63, %v1864_v2  ;;  %v2175_v34 = vsel %vm1059_vm3, %v2173_v54, %v2174_v57  ;;  %v4190_v37 = vpop.f32.mrb[8].mxu1 }
 0x1d6   : > { %817 = vst.msk [vmem:[#allocation2 + $0xa9] sm:$0xff] %vm354_vm0, %v780_v19  ;;  %v781_v8 = vmax.f32 %v693_v20, 0.0  ;;  %826 = vst.msk [vmem:[#allocation2 + $0x111] sm:$0xff] %vm354_vm0, %v789_v21  ;;  %v1973_v35 = vadd.f32 %v1863_v31, %v1729_v17  ;;  %v1974_v36 = vadd.f32 %v1865_v32, %v1730_v26  ;;  %v2176_v25 = vrot.slane %v5084_v60, 1  ;;  %v737_v52 = vpop.f32.mrb[9].mxu1 }
 0x1d7   : > { %820 = vst.msk [vmem:[#allocation2 + $0xc9] sm:$0xff] %vm354_vm0, %v783_v30  ;;  %v2322_v45 = vmul.f32 %v5027_v24, %v5055_v44  ;;  %v2323_v39 = vmul.f32 %v5027_v24, %v5058_v48  ;;  %v2417_v47 = vrot.slane %v5053_v43, 2  ;;  %v746_v49 = vadd.f32 %v4190_v37, %v5001_v50  ;;  %v4191_v62 = vpop.f32.mrb[10].mxu1 }
 0x1d8   : > { %818 = vst.msk [vmem:[#allocation2 + $0xb1] sm:$0xff] %vm354_vm0, %v781_v8  ;;  %v2041_v54 = vadd.f32 %v5045_v38, %v1973_v35  ;;  %v2042_v60 = vadd.f32 %v5076_v58, %v1974_v36  ;;  %v2177_v55 = vsel %vm1059_vm3, %v2174_v57, %v2176_v25  ;;  %v738_v61 = vadd.f32 %v5001_v50, %v737_v52  ;;  %v740_v43 = vpop.f32.mrb[11].mxu1  ;;  %v5159_v38 = vld [vmem:[%s7205_s4] ss:$0 sm:$0xff] }
 0x1d9   : > { %v2418_v63 = vrot.slane %v2322_v45, 2  ;;  %v2420_v2 = vrot.slane %v2323_v39, 2  ;;  %v794_v53 = vmax.f32 %v746_v49, 0.0  ;;  %v749_v3 = vadd.f32 %v4191_v62, %v5001_v50  ;;  %v5197_v45 = vld [vmem:[#allocation2 + $0x48] sm:$0xff] }
 0x1da   : > { %v2285_v4 = vadd.f32 %v2175_v34, %v2041_v54  ;;  %v2286_v5 = vadd.f32 %v2177_v55, %v2042_v60  ;;  %v792_v6 = vmax.f32 %v738_v61, 0.0  ;;  %v741_v7 = vadd.f32 %v5001_v50, %v740_v43 }
 0x1db   : > { %v2419_v58 = vsel %vm1304_vm4, %v2417_v47, %v2418_v63  ;;  %v2421_v57 = vsel %vm1304_vm4, %v2418_v63, %v2420_v2  ;;  %831 = vst.msk [vmem:[#allocation2 + $0x151] sm:$0xff] %vm354_vm0, %v794_v53  ;;  %v795_v40 = vmax.f32 %v749_v3, 0.0  ;;  %v897_v9 = vmul.f32 %v5003_v51, %v5041_v42  ;;  %v5210_v63 = vld [vmem:[#allocation2 + $0x50] sm:$0xff] }
 0x1dc   : > { %v2529_v10 = vadd.f32 %v2419_v58, %v2285_v4  ;;  %v2530_v11 = vadd.f32 %v2421_v57, %v2286_v5  ;;  %829 = vst.msk [vmem:[#allocation2 + $0x139] sm:$0xff] %vm354_vm0, %v792_v6  ;;  %v793_v12 = vmax.f32 %v741_v7, 0.0  ;;  %v898_v14 = vmul.f32 %v5003_v51, %v5072_v56 }
 0x1dd   : > { %832 = vst.msk [vmem:[#allocation2 + $0x159] sm:$0xff] %vm354_vm0, %v795_v40  ;;  %v966_v59 = vmul.f32 %v4991_v41, %v5041_v42  ;;  %v967_v15 = vmul.f32 %v4991_v41, %v5072_v56  ;;  %v1211_v16 = vmul.f32 %v4993_v46, %v5041_v42  ;;  %v1212_v17 = vmul.f32 %v4993_v46, %v5072_v56  ;;  %v5185_v30 = vpop.f32.mrb[12].mxu1 }
 0x1de   : > { %v2567_v19 = vadd.f32 %v5159_v38, %v2529_v10  ;;  %v2568_v20 = vadd.f32 %v5159_v38, %v2530_v11  ;;  %830 = vst.msk [vmem:[#allocation2 + $0x141] sm:$0xff] %vm354_vm0, %v793_v12  ;;  %v1455_v21 = vmul.f32 %v5030_v27, %v5037_v33  ;;  %v1456_v26 = vmul.f32 %v5030_v27, %v5055_v44  ;;  %v5187_v8 = vpop.f32.mrb[13].mxu1 }
 0x1df   : > { %v1065_v31 = vrot.slane %v966_v59, 1  ;;  %v1066_v32 = vrot.slane %v967_v15, 1  ;;  %v1310_v42 = vrot.slane %v1211_v16, 2  ;;  %v1311_v34 = vrot.slane %v1212_v17, 2  ;;  %v5195_v37 = vpop.f32.mrb[14].mxu1 }
 0x1e0   : > { %v2599_v56 = vpack.c.bf16 %v2568_v20, %v2567_v19  ;;  %v1524_v35 = vmul.f32 %v5032_v28, %v5037_v33  ;;  %v1525_v36 = vmul.f32 %v5032_v28, %v5055_v44  ;;  %v1526_v25 = vmul.f32 %v5032_v28, %v5058_v48  ;;  %v5207_v54 = vpop.f32.mrb[15].mxu1 }
 0x1e1   : > { %v1067_v39 = vsel %vm1059_vm3, %v1065_v31, %v1066_v32  ;;  %v1069_v47 = vsel %vm1059_vm3, %v1066_v32, %v1068_v13  ;;  %v1312_v49 = vsel %vm1304_vm4, %v1310_v42, %v1311_v34  ;;  %v1314_v52 = vsel %vm1304_vm4, %v1311_v34, %v1313_v18  ;;  %v5218_v18 = vld [vmem:[#allocation2 + $0x58] sm:$0x3] }
 0x1e2   : > { %4198 = vmatprep.mubr.msk.bf16.mxu1 %vm354_vm0, %v2599_v56  ;;  %v1174_v60 = vadd.f32 %v1067_v39, %v897_v9  ;;  %v1175_v55 = vadd.f32 %v1069_v47, %v898_v14  ;;  %v1622_v61 = vrot.slane %v1524_v35, 1  ;;  %v1623_v62 = vrot.slane %v1525_v36, 1 }
 0x1e3   : > { %v1625_v2 = vrot.slane %v1526_v25, 1  ;;  %v1768_v0 = vmul.f32 %v5034_v29, %v5037_v33  ;;  %v1769_v13 = vmul.f32 %v5034_v29, %v5055_v44  ;;  %v1770_v1 = vmul.f32 %v5034_v29, %v5058_v48 }
 0x1e4   : > { %v1419_v53 = vadd.f32 %v1312_v49, %v1174_v60  ;;  %v1420_v3 = vadd.f32 %v1314_v52, %v1175_v55  ;;  %v1624_v43 = vsel %vm1059_vm3, %v1622_v61, %v1623_v62  ;;  %v2011_v4 = vmul.f32 %v5023_v22, %v5197_v45 }
 0x1e5   : > { %v1626_v5 = vsel %vm1059_vm3, %v1623_v62, %v1625_v2  ;;  %v1866_v6 = vrot.slane %v1768_v0, 2  ;;  %v1867_v7 = vrot.slane %v1769_v13, 2  ;;  %v1869_v58 = vrot.slane %v1770_v1, 2 }
 0x1e6   : > { %v1487_v57 = vadd.f32 %v1455_v21, %v1419_v53  ;;  %v1488_v40 = vadd.f32 %v1456_v26, %v1420_v3  ;;  %v2012_v9 = vmul.f32 %v5023_v22, %v5210_v63  ;;  %v2080_v10 = vmul.f32 %v5025_v23, %v5197_v45 }
 0x1e7   : > { %v1868_v11 = vsel %vm1304_vm4, %v1866_v6, %v1867_v7  ;;  %v1870_v12 = vsel %vm1304_vm4, %v1867_v7, %v1869_v58  ;;  %v2081_v14 = vmul.f32 %v5025_v23, %v5210_v63  ;;  %v2082_v59 = vmul.f32 %v5025_v23, %v5218_v18 }
 0x1e8   : > { %v1731_v15 = vadd.f32 %v1624_v43, %v1487_v57  ;;  %v1732_v16 = vadd.f32 %v1626_v5, %v1488_v40  ;;  %v2178_v17 = vrot.slane %v2080_v10, 1  ;;  %v2324_v19 = vmul.f32 %v5027_v24, %v5197_v45 }
 0x1e9   : > { %v2179_v20 = vrot.slane %v2081_v14, 1  ;;  %v2181_v21 = vrot.slane %v2082_v59, 1  ;;  %v2325_v26 = vmul.f32 %v5027_v24, %v5210_v63  ;;  %v2326_v31 = vmul.f32 %v5027_v24, %v5218_v18 }
 0x1ea   : > { %v1975_v32 = vadd.f32 %v1868_v11, %v1731_v15  ;;  %v1976_v42 = vadd.f32 %v1870_v12, %v1732_v16  ;;  %v2422_v34 = vrot.slane %v2324_v19, 2  ;;  %v899_v56 = vmul.f32 %v5003_v51, %v5037_v33 }
 0x1eb   : > { %v2180_v35 = vsel %vm1059_vm3, %v2178_v17, %v2179_v20  ;;  %v2182_v36 = vsel %vm1059_vm3, %v2179_v20, %v2181_v21  ;;  %v2423_v25 = vrot.slane %v2325_v26, 2  ;;  %v2425_v39 = vrot.slane %v2326_v31, 2  ;;  %v5272_v17 = vld [vmem:[#allocation2 + $0x60] sm:$0xff]  ;;  %v5276_v31 = vld [vmem:[#allocation2 + $0x68] sm:$0xff] }
 0x1ec   : > { %v2043_v47 = vadd.f32 %v2011_v4, %v1975_v32  ;;  %v2044_v49 = vadd.f32 %v2012_v9, %v1976_v42  ;;  %v900_v52 = vmul.f32 %v5003_v51, %v5055_v44  ;;  %v969_v60 = vmul.f32 %v4991_v41, %v5037_v33 }
 0x1ed   : > { %v2424_v55 = vsel %vm1304_vm4, %v2422_v34, %v2423_v25  ;;  %v2426_v61 = vsel %vm1304_vm4, %v2423_v25, %v2425_v39  ;;  %v970_v62 = vmul.f32 %v4991_v41, %v5055_v44  ;;  %v971_v2 = vmul.f32 %v4991_v41, %v5058_v48 }
 0x1ee   : > { %v2287_v0 = vadd.f32 %v2180_v35, %v2043_v47  ;;  %v2288_v13 = vadd.f32 %v2182_v36, %v2044_v49  ;;  %v1070_v1 = vrot.slane %v969_v60, 1  ;;  %v1214_v53 = vmul.f32 %v4993_v46, %v5037_v33  ;;  %v5287_v47 = vld [vmem:[#allocation2 + $0x70] sm:$0x3] }
 0x1ef   : > { %v1071_v3 = vrot.slane %v970_v62, 1  ;;  %v1073_v43 = vrot.slane %v971_v2, 1  ;;  %v1215_v4 = vmul.f32 %v4993_v46, %v5055_v44  ;;  %v1216_v5 = vmul.f32 %v4993_v46, %v5058_v48 }
 0x1f0   : > { %v2531_v6 = vadd.f32 %v2424_v55, %v2287_v0  ;;  %v2532_v7 = vadd.f32 %v2426_v61, %v2288_v13  ;;  %v1315_v58 = vrot.slane %v1214_v53, 2  ;;  %v1457_v57 = vmul.f32 %v5030_v27, %v5197_v45 }
 0x1f1   : > { %v1072_v40 = vsel %vm1059_vm3, %v1070_v1, %v1071_v3  ;;  %v1074_v9 = vsel %vm1059_vm3, %v1071_v3, %v1073_v43  ;;  %v1316_v10 = vrot.slane %v1215_v4, 2  ;;  %v1318_v33 = vrot.slane %v1216_v5, 2 }
 0x1f2   : > { %v2569_v11 = vadd.f32 %v5159_v38, %v2531_v6  ;;  %v2570_v12 = vadd.f32 %v5159_v38, %v2532_v7  ;;  %v1176_v44 = vadd.f32 %v1072_v40, %v899_v56  ;;  %v1177_v14 = vadd.f32 %v1074_v9, %v900_v52 }
 0x1f3   : > { %v1317_v48 = vsel %vm1304_vm4, %v1315_v58, %v1316_v10  ;;  %v1319_v59 = vsel %vm1304_vm4, %v1316_v10, %v1318_v33  ;;  %v1458_v15 = vmul.f32 %v5030_v27, %v5210_v63  ;;  %v1527_v16 = vmul.f32 %v5032_v28, %v5197_v45 }
 0x1f4   : > { %v2600_v19 = vpack.c.bf16 %v2570_v12, %v2569_v11  ;;  %v1421_v20 = vadd.f32 %v1317_v48, %v1176_v44  ;;  %v1422_v21 = vadd.f32 %v1319_v59, %v1177_v14  ;;  %v1528_v26 = vmul.f32 %v5032_v28, %v5210_v63 }
 0x1f5   : > { %v1529_v32 = vmul.f32 %v5032_v28, %v5218_v18  ;;  %v1627_v42 = vrot.slane %v1527_v16, 1  ;;  %v1771_v34 = vmul.f32 %v5034_v29, %v5197_v45  ;;  %v1772_v56 = vmul.f32 %v5034_v29, %v5210_v63 }
 0x1f6   : > { %4199 = vmatmul.mubr.msk.bf16.vlgmr.msra.gmra.mrb[16].mxu1 %vm354_vm0, %v2600_v19  ;;  %v1489_v35 = vadd.f32 %v1457_v57, %v1421_v20  ;;  %v1490_v36 = vadd.f32 %v1458_v15, %v1422_v21  ;;  %v1628_v25 = vrot.slane %v1528_v26, 1  ;;  %v1773_v39 = vmul.f32 %v5034_v29, %v5218_v18 }
 0x1f7   : > { %v1630_v49 = vrot.slane %v1529_v32, 1  ;;  %v1871_v52 = vrot.slane %v1771_v34, 2  ;;  %v1872_v60 = vrot.slane %v1772_v56, 2  ;;  %v2013_v55 = vmul.f32 %v5023_v22, %v5272_v17 }
 0x1f8   : > { %v1629_v61 = vsel %vm1059_vm3, %v1627_v42, %v1628_v25  ;;  %v1874_v62 = vrot.slane %v1773_v39, 2  ;;  %v2014_v2 = vmul.f32 %v5023_v22, %v5276_v31  ;;  %v2083_v0 = vmul.f32 %v5025_v23, %v5272_v17 }
 0x1f9   : > { %v1631_v13 = vsel %vm1059_vm3, %v1628_v25, %v1630_v49  ;;  %v1733_v1 = vadd.f32 %v1629_v61, %v1489_v35  ;;  %v1873_v53 = vsel %vm1304_vm4, %v1871_v52, %v1872_v60  ;;  %v2084_v3 = vmul.f32 %v5025_v23, %v5276_v31 }
 0x1fa   : > { %v1734_v43 = vadd.f32 %v1631_v13, %v1490_v36  ;;  %v1875_v4 = vsel %vm1304_vm4, %v1872_v60, %v1874_v62  ;;  %v2085_v5 = vmul.f32 %v5025_v23, %v5287_v47  ;;  %v2183_v6 = vrot.slane %v2083_v0, 1 }
 0x1fb   : > { %v1977_v7 = vadd.f32 %v1873_v53, %v1733_v1  ;;  %v2184_v58 = vrot.slane %v2084_v3, 1  ;;  %v2327_v57 = vmul.f32 %v5027_v24, %v5272_v17  ;;  %v2328_v40 = vmul.f32 %v5027_v24, %v5276_v31 }
 0x1fc   : > { %v1978_v9 = vadd.f32 %v1875_v4, %v1734_v43  ;;  %v2186_v10 = vrot.slane %v2085_v5, 1  ;;  %v2329_v33 = vmul.f32 %v5027_v24, %v5287_v47  ;;  %v762_v11 = vadd.f32 %v5185_v30, %v5001_v50 }
 0x1fd   : > { %v2045_v12 = vadd.f32 %v2013_v55, %v1977_v7  ;;  %v2185_v44 = vsel %vm1059_vm3, %v2183_v6, %v2184_v58  ;;  %v2427_v14 = vrot.slane %v2327_v57, 2  ;;  %v2428_v48 = vrot.slane %v2328_v40, 2 }
 0x1fe   : > { %v2046_v59 = vadd.f32 %v2014_v2, %v1978_v9  ;;  %v2187_v15 = vsel %vm1059_vm3, %v2184_v58, %v2186_v10  ;;  %v2430_v16 = vrot.slane %v2329_v33, 2  ;;  %v798_v19 = vmax.f32 %v762_v11, 0.0  ;;  %v5352_v58 = vld [vmem:[#allocation2 + $0x78] sm:$0xff] }
 0x1ff   : > { %v2289_v20 = vadd.f32 %v2185_v44, %v2045_v12  ;;  %v2429_v21 = vsel %vm1304_vm4, %v2427_v14, %v2428_v48  ;;  %v754_v26 = vadd.f32 %v5001_v50, %v5187_v8  ;;  %v765_v32 = vadd.f32 %v5195_v37, %v5001_v50  ;;  %v5364_v14 = vld [vmem:[#allocation2 + $0x80] sm:$0xff] }
 0x200   : > { %v2290_v30 = vadd.f32 %v2187_v15, %v2046_v59  ;;  %v2431_v42 = vsel %vm1304_vm4, %v2428_v48, %v2430_v16  ;;  %835 = vst.msk [vmem:[#allocation2 + $0x181] sm:$0xff] %vm354_vm0, %v798_v19  ;;  %v757_v34 = vadd.f32 %v5001_v50, %v5207_v54  ;;  %v901_v56 = vmul.f32 %v5003_v51, %v5197_v45  ;;  %v5368_v19 = vld [vmem:[#allocation2 + $0x88] sm:$0x3] }
 0x201   : > { %v2533_v35 = vadd.f32 %v2429_v21, %v2289_v20  ;;  %v796_v36 = vmax.f32 %v754_v26, 0.0  ;;  %v799_v25 = vmax.f32 %v765_v32, 0.0  ;;  %v902_v8 = vmul.f32 %v5003_v51, %v5210_v63 }
 0x202   : > { %v2534_v39 = vadd.f32 %v2431_v42, %v2290_v30  ;;  %v797_v49 = vmax.f32 %v757_v34, 0.0  ;;  %v972_v37 = vmul.f32 %v4991_v41, %v5197_v45  ;;  %v973_v52 = vmul.f32 %v4991_v41, %v5210_v63 }
 0x203   : > { %v2571_v60 = vadd.f32 %v5159_v38, %v2533_v35  ;;  %833 = vst.msk [vmem:[#allocation2 + $0x169] sm:$0xff] %vm354_vm0, %v796_v36  ;;  %836 = vst.msk [vmem:[#allocation2 + $0x189] sm:$0xff] %vm354_vm0, %v799_v25  ;;  %v974_v50 = vmul.f32 %v4991_v41, %v5218_v18  ;;  %v1217_v54 = vmul.f32 %v4993_v46, %v5197_v45 }
 0x204   : > { %v1218_v55 = vmul.f32 %v4993_v46, %v5210_v63  ;;  %v2572_v61 = vadd.f32 %v5159_v38, %v2534_v39  ;;  %834 = vst.msk [vmem:[#allocation2 + $0x171] sm:$0xff] %vm354_vm0, %v797_v49  ;;  %v1075_v62 = vrot.slane %v972_v37, 1  ;;  %v1076_v2 = vrot.slane %v973_v52, 1 }
 0x205   : > { %v1219_v0 = vmul.f32 %v4993_v46, %v5218_v18  ;;  %v1078_v13 = vrot.slane %v974_v50, 1  ;;  %v1320_v1 = vrot.slane %v1217_v54, 2  ;;  %v1459_v3 = vmul.f32 %v5030_v27, %v5272_v17 }
 0x206   : > { %v1321_v53 = vrot.slane %v1218_v55, 2  ;;  %v2601_v43 = vpack.c.bf16 %v2572_v61, %v2571_v60  ;;  %v1077_v45 = vsel %vm1059_vm3, %v1075_v62, %v1076_v2  ;;  %v1460_v63 = vmul.f32 %v5030_v27, %v5276_v31 }
 0x207   : > { %v1323_v4 = vrot.slane %v1219_v0, 2  ;;  %v1079_v5 = vsel %vm1059_vm3, %v1076_v2, %v1078_v13  ;;  %v1178_v6 = vadd.f32 %v1077_v45, %v901_v56  ;;  %v1530_v18 = vmul.f32 %v5032_v28, %v5272_v17 }
 0x208   : > { %v1322_v7 = vsel %vm1304_vm4, %v1320_v1, %v1321_v53  ;;  %4202 = vmatprep.mubr.msk.bf16.mxu1 %vm354_vm0, %v2601_v43  ;;  %v1179_v57 = vadd.f32 %v1079_v5, %v902_v8  ;;  %v1531_v9 = vmul.f32 %v5032_v28, %v5276_v31  ;;  %v1532_v10 = vmul.f32 %v5032_v28, %v5287_v47 }
 0x209   : > { %v1324_v40 = vsel %vm1304_vm4, %v1321_v53, %v1323_v4  ;;  %v1423_v33 = vadd.f32 %v1322_v7, %v1178_v6  ;;  %v1632_v11 = vrot.slane %v1530_v18, 1  ;;  %v1774_v12 = vmul.f32 %v5034_v29, %v5272_v17 }
 0x20a   : > { %v1775_v44 = vmul.f32 %v5034_v29, %v5276_v31  ;;  %v1424_v48 = vadd.f32 %v1324_v40, %v1179_v57  ;;  %v1633_v59 = vrot.slane %v1531_v9, 1  ;;  %v1635_v15 = vrot.slane %v1532_v10, 1 }
 0x20b   : > { %v1776_v16 = vmul.f32 %v5034_v29, %v5287_v47  ;;  %v1491_v20 = vadd.f32 %v1459_v3, %v1423_v33  ;;  %v1876_v21 = vrot.slane %v1774_v12, 2  ;;  %v2015_v32 = vmul.f32 %v5023_v22, %v5352_v58 }
 0x20c   : > { %v1877_v26 = vrot.slane %v1775_v44, 2  ;;  %v1492_v30 = vadd.f32 %v1460_v63, %v1424_v48  ;;  %v1634_v42 = vsel %vm1059_vm3, %v1632_v11, %v1633_v59  ;;  %v1636_v34 = vsel %vm1059_vm3, %v1633_v59, %v1635_v15 }
 0x20d   : > { %v1879_v56 = vrot.slane %v1776_v16, 2  ;;  %v1735_v35 = vadd.f32 %v1634_v42, %v1491_v20  ;;  %v2016_v25 = vmul.f32 %v5023_v22, %v5364_v14  ;;  %v2086_v8 = vmul.f32 %v5025_v23, %v5352_v58 }
 0x20e   : > { %v1878_v36 = vsel %vm1304_vm4, %v1876_v21, %v1877_v26  ;;  %v1736_v39 = vadd.f32 %v1636_v34, %v1492_v30  ;;  %v2087_v37 = vmul.f32 %v5025_v23, %v5364_v14  ;;  %v2088_v52 = vmul.f32 %v5025_v23, %v5368_v19 }
 0x20f   : > { %v1880_v49 = vsel %vm1304_vm4, %v1877_v26, %v1879_v56  ;;  %v1979_v60 = vadd.f32 %v1878_v36, %v1735_v35  ;;  %v2188_v50 = vrot.slane %v2086_v8, 1  ;;  %v2330_v54 = vmul.f32 %v5027_v24, %v5352_v58 }
 0x210   : > { %v2331_v55 = vmul.f32 %v5027_v24, %v5364_v14  ;;  %v1980_v61 = vadd.f32 %v1880_v49, %v1736_v39  ;;  %v2189_v62 = vrot.slane %v2087_v37, 1  ;;  %v2191_v2 = vrot.slane %v2088_v52, 1  ;;  %v5424_v49 = vld [vmem:[#allocation2 + $0x90] sm:$0xff] }
 0x211   : > { %v2332_v0 = vmul.f32 %v5027_v24, %v5368_v19  ;;  %v2047_v13 = vadd.f32 %v2015_v32, %v1979_v60  ;;  %v2432_v1 = vrot.slane %v2330_v54, 2  ;;  %v903_v3 = vmul.f32 %v5003_v51, %v5272_v17  ;;  %v5430_v54 = vld [vmem:[#allocation2 + $0x98] sm:$0xff] }
 0x212   : > { %v2433_v53 = vrot.slane %v2331_v55, 2  ;;  %v2048_v43 = vadd.f32 %v2016_v25, %v1980_v61  ;;  %v2190_v45 = vsel %vm1059_vm3, %v2188_v50, %v2189_v62  ;;  %v2192_v4 = vsel %vm1059_vm3, %v2189_v62, %v2191_v2 }
 0x213   : > { %v2435_v63 = vrot.slane %v2332_v0, 2  ;;  %v2291_v5 = vadd.f32 %v2190_v45, %v2047_v13  ;;  %v904_v7 = vmul.f32 %v5003_v51, %v5276_v31  ;;  %v975_v18 = vmul.f32 %v4991_v41, %v5272_v17 }
 0x214   : > { %v2434_v6 = vsel %vm1304_vm4, %v2432_v1, %v2433_v53  ;;  %v2292_v57 = vadd.f32 %v2192_v4, %v2048_v43  ;;  %v976_v9 = vmul.f32 %v4991_v41, %v5276_v31  ;;  %v977_v10 = vmul.f32 %v4991_v41, %v5287_v47 }
 0x215   : > { %v2436_v40 = vsel %vm1304_vm4, %v2433_v53, %v2435_v63  ;;  %v2535_v33 = vadd.f32 %v2434_v6, %v2291_v5  ;;  %v1080_v11 = vrot.slane %v975_v18, 1  ;;  %v1220_v12 = vmul.f32 %v4993_v46, %v5272_v17 }
 0x216   : > { %v1221_v44 = vmul.f32 %v4993_v46, %v5276_v31  ;;  %v2536_v48 = vadd.f32 %v2436_v40, %v2292_v57  ;;  %v1081_v59 = vrot.slane %v976_v9, 1  ;;  %v1083_v15 = vrot.slane %v977_v10, 1 }
 0x217   : > { %v1222_v16 = vmul.f32 %v4993_v46, %v5287_v47  ;;  %v2573_v20 = vadd.f32 %v5159_v38, %v2535_v33  ;;  %v1325_v21 = vrot.slane %v1220_v12, 2  ;;  %v1461_v32 = vmul.f32 %v5030_v27, %v5352_v58 }
 0x218   : > { %v1326_v26 = vrot.slane %v1221_v44, 2  ;;  %v2574_v30 = vadd.f32 %v5159_v38, %v2536_v48  ;;  %v1082_v17 = vsel %vm1059_vm3, %v1080_v11, %v1081_v59  ;;  %v1084_v42 = vsel %vm1059_vm3, %v1081_v59, %v1083_v15 }
 0x219   : > { %v1328_v31 = vrot.slane %v1222_v16, 2  ;;  %v1180_v34 = vadd.f32 %v1082_v17, %v903_v3  ;;  %v1181_v56 = vadd.f32 %v1084_v42, %v904_v7  ;;  %v1462_v47 = vmul.f32 %v5030_v27, %v5364_v14  ;;  %v5437_v3 = vld [vmem:[#allocation2 + $0xa0] sm:$0x3] }
 0x21a   : > { %v1327_v35 = vsel %vm1304_vm4, %v1325_v21, %v1326_v26  ;;  %v2602_v36 = vpack.c.bf16 %v2574_v30, %v2573_v20  ;;  %v1533_v8 = vmul.f32 %v5032_v28, %v5352_v58  ;;  %v1534_v39 = vmul.f32 %v5032_v28, %v5364_v14 }
 0x21b   : > { %v1329_v25 = vsel %vm1304_vm4, %v1326_v26, %v1328_v31  ;;  %v1425_v37 = vadd.f32 %v1327_v35, %v1180_v34  ;;  %v1535_v60 = vmul.f32 %v5032_v28, %v5368_v19  ;;  %v1777_v50 = vmul.f32 %v5034_v29, %v5352_v58 }
 0x21c   : > { %v1426_v52 = vadd.f32 %v1329_v25, %v1181_v56  ;;  %4203 = vmatmul.mubr.msk.bf16.gmra.mrb[20].mxu1 %vm354_vm0, %v2602_v36  ;;  %v1637_v55 = vrot.slane %v1533_v8, 1  ;;  %v1638_v61 = vrot.slane %v1534_v39, 1  ;;  %v1778_v62 = vmul.f32 %v5034_v29, %v5364_v14 }
 0x21d   : > { %v1779_v2 = vmul.f32 %v5034_v29, %v5368_v19  ;;  %v1493_v0 = vadd.f32 %v1461_v32, %v1425_v37  ;;  %v1640_v1 = vrot.slane %v1535_v60, 1  ;;  %v1881_v53 = vrot.slane %v1777_v50, 2 }
 0x21e   : > { %v1494_v13 = vadd.f32 %v1462_v47, %v1426_v52  ;;  %v1639_v43 = vsel %vm1059_vm3, %v1637_v55, %v1638_v61  ;;  %v1882_v45 = vrot.slane %v1778_v62, 2  ;;  %v2017_v63 = vmul.f32 %v5023_v22, %v5424_v49 }
 0x21f   : > { %v1884_v4 = vrot.slane %v1779_v2, 2  ;;  %v1641_v5 = vsel %vm1059_vm3, %v1638_v61, %v1640_v1  ;;  %v1737_v6 = vadd.f32 %v1639_v43, %v1493_v0  ;;  %v2018_v7 = vmul.f32 %v5023_v22, %v5430_v54 }
 0x220   : > { %v2089_v18 = vmul.f32 %v5025_v23, %v5424_v49  ;;  %v1738_v57 = vadd.f32 %v1641_v5, %v1494_v13  ;;  %v1883_v40 = vsel %vm1304_vm4, %v1881_v53, %v1882_v45  ;;  %v2090_v10 = vmul.f32 %v5025_v23, %v5430_v54 }
 0x221   : > { %v1885_v9 = vsel %vm1304_vm4, %v1882_v45, %v1884_v4  ;;  %v1981_v33 = vadd.f32 %v1883_v40, %v1737_v6  ;;  %v2091_v11 = vmul.f32 %v5025_v23, %v5437_v3  ;;  %v2333_v44 = vmul.f32 %v5027_v24, %v5424_v49  ;;  %v5489_v6 = vld [vmem:[#allocation2 + $0xa8] sm:$0xff] }
 0x222   : > { %v2193_v12 = vrot.slane %v2089_v18, 1  ;;  %v1982_v48 = vadd.f32 %v1885_v9, %v1738_v57  ;;  %v2194_v59 = vrot.slane %v2090_v10, 1  ;;  %v2334_v15 = vmul.f32 %v5027_v24, %v5430_v54 }
 0x223   : > { %v2335_v16 = vmul.f32 %v5027_v24, %v5437_v3  ;;  %v2049_v20 = vadd.f32 %v2017_v63, %v1981_v33  ;;  %v2196_v21 = vrot.slane %v2091_v11, 1  ;;  %v2437_v26 = vrot.slane %v2333_v44, 2 }
 0x224   : > { %v905_v32 = vmul.f32 %v5003_v51, %v5352_v58  ;;  %v2050_v30 = vadd.f32 %v2018_v7, %v1982_v48  ;;  %v2195_v17 = vsel %vm1059_vm3, %v2193_v12, %v2194_v59  ;;  %v2438_v42 = vrot.slane %v2334_v15, 2  ;;  %v5497_v12 = vld [vmem:[#allocation2 + $0xb0] sm:$0xff] }
 0x225   : > { %v2440_v31 = vrot.slane %v2335_v16, 2  ;;  %v2197_v34 = vsel %vm1059_vm3, %v2194_v59, %v2196_v21  ;;  %v2293_v56 = vadd.f32 %v2195_v17, %v2049_v20  ;;  %v906_v35 = vmul.f32 %v5003_v51, %v5364_v14 }
 0x226   : > { %v978_v47 = vmul.f32 %v4991_v41, %v5352_v58  ;;  %v2294_v36 = vadd.f32 %v2197_v34, %v2050_v30  ;;  %v2439_v25 = vsel %vm1304_vm4, %v2437_v26, %v2438_v42  ;;  %v979_v39 = vmul.f32 %v4991_v41, %v5364_v14 }
 0x227   : > { %v2441_v8 = vsel %vm1304_vm4, %v2438_v42, %v2440_v31  ;;  %v2537_v37 = vadd.f32 %v2439_v25, %v2293_v56  ;;  %v980_v52 = vmul.f32 %v4991_v41, %v5368_v19  ;;  %v1223_v50 = vmul.f32 %v4993_v46, %v5352_v58 }
 0x228   : > { %v1085_v60 = vrot.slane %v978_v47, 1  ;;  %v2538_v55 = vadd.f32 %v2441_v8, %v2294_v36  ;;  %v1086_v61 = vrot.slane %v979_v39, 1  ;;  %v1224_v62 = vmul.f32 %v4993_v46, %v5364_v14 }
 0x229   : > { %v1225_v2 = vmul.f32 %v4993_v46, %v5368_v19  ;;  %v2575_v0 = vadd.f32 %v5159_v38, %v2537_v37  ;;  %v1088_v13 = vrot.slane %v980_v52, 1  ;;  %v1330_v1 = vrot.slane %v1223_v50, 2 }
 0x22a   : > { %v1463_v53 = vmul.f32 %v5030_v27, %v5424_v49  ;;  %v2576_v43 = vadd.f32 %v5159_v38, %v2538_v55  ;;  %v1087_v45 = vsel %vm1059_vm3, %v1085_v60, %v1086_v61  ;;  %v1331_v58 = vrot.slane %v1224_v62, 2 }
 0x22b   : > { %v1333_v4 = vrot.slane %v1225_v2, 2  ;;  %v1089_v63 = vsel %vm1059_vm3, %v1086_v61, %v1088_v13  ;;  %v1182_v5 = vadd.f32 %v1087_v45, %v905_v32  ;;  %v1464_v14 = vmul.f32 %v5030_v27, %v5430_v54  ;;  %v5508_v32 = vld [vmem:[#allocation2 + $0xb8] sm:$0x3] }
 0x22c   : > { %v1536_v19 = vmul.f32 %v5032_v28, %v5424_v49  ;;  %v2603_v7 = vpack.c.bf16 %v2576_v43, %v2575_v0  ;;  %v1183_v18 = vadd.f32 %v1089_v63, %v906_v35  ;;  %v1332_v57 = vsel %vm1304_vm4, %v1330_v1, %v1331_v58 }
 0x22d   : > { %v1334_v40 = vsel %vm1304_vm4, %v1331_v58, %v1333_v4  ;;  %v1427_v9 = vadd.f32 %v1332_v57, %v1182_v5  ;;  %v1537_v10 = vmul.f32 %v5032_v28, %v5430_v54  ;;  %v1538_v33 = vmul.f32 %v5032_v28, %v5437_v3 }
 0x22e   : > { %v1642_v11 = vrot.slane %v1536_v19, 1  ;;  %4206 = vmatprep.mubr.msk.bf16.mxu1 %vm354_vm0, %v2603_v7  ;;  %v1428_v44 = vadd.f32 %v1334_v40, %v1183_v18  ;;  %v1780_v48 = vmul.f32 %v5034_v29, %v5424_v49  ;;  %v1781_v59 = vmul.f32 %v5034_v29, %v5430_v54 }
 0x22f   : > { %v1782_v15 = vmul.f32 %v5034_v29, %v5437_v3  ;;  %v1495_v16 = vadd.f32 %v1463_v53, %v1427_v9  ;;  %v1643_v20 = vrot.slane %v1537_v10, 1  ;;  %v1645_v21 = vrot.slane %v1538_v33, 1 }
 0x230   : > { %v2019_v26 = vmul.f32 %v5023_v22, %v5489_v6  ;;  %v1496_v30 = vadd.f32 %v1464_v14, %v1428_v44  ;;  %v1886_v17 = vrot.slane %v1780_v48, 2  ;;  %v1887_v42 = vrot.slane %v1781_v59, 2 }
 0x231   : > { %v1889_v31 = vrot.slane %v1782_v15, 2  ;;  %v1644_v34 = vsel %vm1059_vm3, %v1642_v11, %v1643_v20  ;;  %v1646_v56 = vsel %vm1059_vm3, %v1643_v20, %v1645_v21  ;;  %v2020_v35 = vmul.f32 %v5023_v22, %v5497_v12 }
 0x232   : > { %v2092_v47 = vmul.f32 %v5025_v23, %v5489_v6  ;;  %v1739_v36 = vadd.f32 %v1644_v34, %v1495_v16  ;;  %v1740_v25 = vadd.f32 %v1646_v56, %v1496_v30  ;;  %v1888_v8 = vsel %vm1304_vm4, %v1886_v17, %v1887_v42  ;;  %v5558_v56 = vld [vmem:[#allocation2 + $0xc0] sm:$0xff] }
 0x233   : > { %v1890_v39 = vsel %vm1304_vm4, %v1887_v42, %v1889_v31  ;;  %v2093_v37 = vmul.f32 %v5025_v23, %v5497_v12  ;;  %v2094_v52 = vmul.f32 %v5025_v23, %v5508_v32  ;;  %v2336_v50 = vmul.f32 %v5027_v24, %v5489_v6 }
 0x234   : > { %v2198_v60 = vrot.slane %v2092_v47, 1  ;;  %v1983_v55 = vadd.f32 %v1888_v8, %v1739_v36  ;;  %v1984_v61 = vadd.f32 %v1890_v39, %v1740_v25  ;;  %v2337_v62 = vmul.f32 %v5027_v24, %v5497_v12 }
 0x235   : > { %v2338_v2 = vmul.f32 %v5027_v24, %v5508_v32  ;;  %v2199_v0 = vrot.slane %v2093_v37, 1  ;;  %v2201_v13 = vrot.slane %v2094_v52, 1  ;;  %v2442_v1 = vrot.slane %v2336_v50, 2 }
 0x236   : > { %v907_v53 = vmul.f32 %v5003_v51, %v5424_v49  ;;  %v2051_v43 = vadd.f32 %v2019_v26, %v1983_v55  ;;  %v2052_v45 = vadd.f32 %v2020_v35, %v1984_v61  ;;  %v2443_v58 = vrot.slane %v2337_v62, 2 }
 0x237   : > { %v2445_v4 = vrot.slane %v2338_v2, 2  ;;  %v2200_v63 = vsel %vm1059_vm3, %v2198_v60, %v2199_v0  ;;  %v2202_v5 = vsel %vm1059_vm3, %v2199_v0, %v2201_v13  ;;  %v908_v14 = vmul.f32 %v5003_v51, %v5430_v54  ;;  %v5566_v60 = vld [vmem:[#allocation2 + $0xc8] sm:$0xff] }
 0x238   : > { %v981_v19 = vmul.f32 %v4991_v41, %v5424_v49  ;;  %v2295_v7 = vadd.f32 %v2200_v63, %v2051_v43  ;;  %v2296_v18 = vadd.f32 %v2202_v5, %v2052_v45  ;;  %v2444_v57 = vsel %vm1304_vm4, %v2442_v1, %v2443_v58 }
 0x239   : > { %v2446_v40 = vsel %vm1304_vm4, %v2443_v58, %v2445_v4  ;;  %v982_v9 = vmul.f32 %v4991_v41, %v5430_v54  ;;  %v983_v10 = vmul.f32 %v4991_v41, %v5437_v3  ;;  %v1226_v11 = vmul.f32 %v4993_v46, %v5424_v49 }
 0x23a   : > { %v1090_v33 = vrot.slane %v981_v19, 1  ;;  %v2539_v44 = vadd.f32 %v2444_v57, %v2295_v7  ;;  %v2540_v48 = vadd.f32 %v2446_v40, %v2296_v18  ;;  %v1227_v59 = vmul.f32 %v4993_v46, %v5430_v54 }
 0x23b   : > { %v1228_v15 = vmul.f32 %v4993_v46, %v5437_v3  ;;  %v1091_v16 = vrot.slane %v982_v9, 1  ;;  %v1093_v20 = vrot.slane %v983_v10, 1  ;;  %v1335_v21 = vrot.slane %v1226_v11, 2 }
 0x23c   : > { %v1465_v26 = vmul.f32 %v5030_v27, %v5489_v6  ;;  %v2577_v30 = vadd.f32 %v5159_v38, %v2539_v44  ;;  %v2578_v17 = vadd.f32 %v5159_v38, %v2540_v48  ;;  %v1336_v42 = vrot.slane %v1227_v59, 2 }
 0x23d   : > { %v1338_v49 = vrot.slane %v1228_v15, 2  ;;  %v1092_v31 = vsel %vm1059_vm3, %v1090_v33, %v1091_v16  ;;  %v1094_v34 = vsel %vm1059_vm3, %v1091_v16, %v1093_v20  ;;  %v1466_v54 = vmul.f32 %v5030_v27, %v5497_v12 }
 0x23e   : > { %v1539_v3 = vmul.f32 %v5032_v28, %v5489_v6  ;;  %v2604_v35 = vpack.c.bf16 %v2578_v17, %v2577_v30  ;;  %v1184_v47 = vadd.f32 %v1092_v31, %v907_v53  ;;  %v1185_v36 = vadd.f32 %v1094_v34, %v908_v14  ;;  %v5577_v53 = vld [vmem:[#allocation2 + $0xd0] sm:$0x3] }
 0x23f   : > { %v1337_v25 = vsel %vm1304_vm4, %v1335_v21, %v1336_v42  ;;  %v1339_v8 = vsel %vm1304_vm4, %v1336_v42, %v1338_v49  ;;  %v1540_v39 = vmul.f32 %v5032_v28, %v5497_v12  ;;  %v1541_v37 = vmul.f32 %v5032_v28, %v5508_v32 }
 0x240   : > { %v1647_v52 = vrot.slane %v1539_v3, 1  ;;  %4207 = vmatmul.mubr.msk.bf16.gmra.mrb[24].mxu1 %vm354_vm0, %v2604_v35  ;;  %v1429_v50 = vadd.f32 %v1337_v25, %v1184_v47  ;;  %v1430_v55 = vadd.f32 %v1339_v8, %v1185_v36  ;;  %v1783_v61 = vmul.f32 %v5034_v29, %v5489_v6 }
 0x241   : > { %v1784_v62 = vmul.f32 %v5034_v29, %v5497_v12  ;;  %v1648_v2 = vrot.slane %v1540_v39, 1  ;;  %v1650_v0 = vrot.slane %v1541_v37, 1  ;;  %v1785_v13 = vmul.f32 %v5034_v29, %v5508_v32 }
 0x242   : > { %v2021_v1 = vmul.f32 %v5023_v22, %v5558_v56  ;;  %v1497_v43 = vadd.f32 %v1465_v26, %v1429_v50  ;;  %v1498_v45 = vadd.f32 %v1466_v54, %v1430_v55  ;;  %v1891_v58 = vrot.slane %v1783_v61, 2 }
 0x243   : > { %v1892_v4 = vrot.slane %v1784_v62, 2  ;;  %v1649_v63 = vsel %vm1059_vm3, %v1647_v52, %v1648_v2  ;;  %v1651_v5 = vsel %vm1059_vm3, %v1648_v2, %v1650_v0  ;;  %v1894_v14 = vrot.slane %v1785_v13, 2 }
 0x244   : > { %v2022_v19 = vmul.f32 %v5023_v22, %v5566_v60  ;;  %v1741_v7 = vadd.f32 %v1649_v63, %v1497_v43  ;;  %v1742_v18 = vadd.f32 %v1651_v5, %v1498_v45  ;;  %v2095_v40 = vmul.f32 %v5025_v23, %v5558_v56 }
 0x245   : > { %v1893_v57 = vsel %vm1304_vm4, %v1891_v58, %v1892_v4  ;;  %v1895_v9 = vsel %vm1304_vm4, %v1892_v4, %v1894_v14  ;;  %v2096_v10 = vmul.f32 %v5025_v23, %v5566_v60  ;;  %v2097_v33 = vmul.f32 %v5025_v23, %v5577_v53 }
 0x246   : > { %v2339_v11 = vmul.f32 %v5027_v24, %v5558_v56  ;;  %v1985_v44 = vadd.f32 %v1893_v57, %v1741_v7  ;;  %v1986_v48 = vadd.f32 %v1895_v9, %v1742_v18  ;;  %v2203_v59 = vrot.slane %v2095_v40, 1 }
 0x247   : > { %v2340_v15 = vmul.f32 %v5027_v24, %v5566_v60  ;;  %v2204_v16 = vrot.slane %v2096_v10, 1  ;;  %v2206_v20 = vrot.slane %v2097_v33, 1  ;;  %v2341_v21 = vmul.f32 %v5027_v24, %v5577_v53 }
 0x248   : > { %v2447_v26 = vrot.slane %v2339_v11, 2  ;;  %v2053_v30 = vadd.f32 %v2021_v1, %v1985_v44  ;;  %v2054_v17 = vadd.f32 %v2022_v19, %v1986_v48  ;;  %v909_v49 = vmul.f32 %v5003_v51, %v5489_v6 }
 0x249   : > { %v2448_v42 = vrot.slane %v2340_v15, 2  ;;  %v2205_v31 = vsel %vm1059_vm3, %v2203_v59, %v2204_v16  ;;  %v2207_v34 = vsel %vm1059_vm3, %v2204_v16, %v2206_v20  ;;  %v2450_v54 = vrot.slane %v2341_v21, 2  ;;  %v5640_v16 = vld [vmem:[#allocation2 + $0xd8] sm:$0xff] }
 0x24a   : > { %v910_v3 = vmul.f32 %v5003_v51, %v5497_v12  ;;  %v2297_v35 = vadd.f32 %v2205_v31, %v2053_v30  ;;  %v2298_v47 = vadd.f32 %v2207_v34, %v2054_v17  ;;  %v984_v25 = vmul.f32 %v4991_v41, %v5489_v6  ;;  %v5642_v17 = vld [vmem:[#allocation2 + $0xe0] sm:$0xff] }
 0x24b   : > { %v2449_v36 = vsel %vm1304_vm4, %v2447_v26, %v2448_v42  ;;  %v2451_v8 = vsel %vm1304_vm4, %v2448_v42, %v2450_v54  ;;  %v985_v39 = vmul.f32 %v4991_v41, %v5497_v12  ;;  %v986_v37 = vmul.f32 %v4991_v41, %v5508_v32  ;;  %v5648_v54 = vld [vmem:[#allocation2 + $0xe8] sm:$0x3] }
 0x24c   : > { %v1229_v52 = vmul.f32 %v4993_v46, %v5489_v6  ;;  %v2541_v50 = vadd.f32 %v2449_v36, %v2297_v35  ;;  %v2542_v55 = vadd.f32 %v2451_v8, %v2298_v47  ;;  %v1095_v61 = vrot.slane %v984_v25, 1 }
 0x24d   : > { %v1230_v62 = vmul.f32 %v4993_v46, %v5497_v12  ;;  %v1096_v2 = vrot.slane %v985_v39, 1  ;;  %v1098_v0 = vrot.slane %v986_v37, 1  ;;  %v1231_v13 = vmul.f32 %v4993_v46, %v5508_v32 }
 0x24e   : > { %v1340_v1 = vrot.slane %v1229_v52, 2  ;;  %v2579_v43 = vadd.f32 %v5159_v38, %v2541_v50  ;;  %v2580_v45 = vadd.f32 %v5159_v38, %v2542_v55  ;;  %v1467_v6 = vmul.f32 %v5030_v27, %v5558_v56 }
 0x24f   : > { %v1341_v58 = vrot.slane %v1230_v62, 2  ;;  %v1097_v4 = vsel %vm1059_vm3, %v1095_v61, %v1096_v2  ;;  %v1099_v63 = vsel %vm1059_vm3, %v1096_v2, %v1098_v0  ;;  %v1343_v5 = vrot.slane %v1231_v13, 2 }
 0x250   : > { %v1468_v12 = vmul.f32 %v5030_v27, %v5566_v60  ;;  %v2605_v14 = vpack.c.bf16 %v2580_v45, %v2579_v43  ;;  %v1186_v19 = vadd.f32 %v1097_v4, %v909_v49  ;;  %v1187_v32 = vadd.f32 %v1099_v63, %v910_v3 }
 0x251   : > { %v1342_v7 = vsel %vm1304_vm4, %v1340_v1, %v1341_v58  ;;  %v1344_v18 = vsel %vm1304_vm4, %v1341_v58, %v1343_v5  ;;  %v1542_v38 = vmul.f32 %v5032_v28, %v5558_v56  ;;  %v1543_v57 = vmul.f32 %v5032_v28, %v5566_v60 }
 0x252   : > { %v1544_v40 = vmul.f32 %v5032_v28, %v5577_v53  ;;  %4210 = vmatprep.mubr.msk.bf16.mxu1 %vm354_vm0, %v2605_v14  ;;  %v1431_v9 = vadd.f32 %v1342_v7, %v1186_v19  ;;  %v1432_v10 = vadd.f32 %v1344_v18, %v1187_v32  ;;  %v1786_v33 = vmul.f32 %v5034_v29, %v5558_v56 }
 0x253   : > { %v1787_v11 = vmul.f32 %v5034_v29, %v5566_v60  ;;  %v1652_v44 = vrot.slane %v1542_v38, 1  ;;  %v1653_v48 = vrot.slane %v1543_v57, 1  ;;  %v1788_v15 = vmul.f32 %v5034_v29, %v5577_v53 }
 0x254   : > { %v1655_v59 = vrot.slane %v1544_v40, 1  ;;  %v1499_v20 = vadd.f32 %v1467_v6, %v1431_v9  ;;  %v1500_v21 = vadd.f32 %v1468_v12, %v1432_v10  ;;  %v1896_v26 = vrot.slane %v1786_v33, 2 }
 0x255   : > { %v1897_v30 = vrot.slane %v1787_v11, 2  ;;  %v1654_v42 = vsel %vm1059_vm3, %v1652_v44, %v1653_v48  ;;  %v1899_v31 = vrot.slane %v1788_v15, 2  ;;  %v2023_v34 = vmul.f32 %v5023_v22, %v5640_v16  ;;  %v5689_v15 = vld [vmem:[%s7205_s4] ss:$0 sm:$0xff] }
 0x256   : > { %v1656_v49 = vsel %vm1059_vm3, %v1653_v48, %v1655_v59  ;;  %v1743_v3 = vadd.f32 %v1654_v42, %v1499_v20  ;;  %v2024_v36 = vmul.f32 %v5023_v22, %v5642_v17  ;;  %v2098_v8 = vmul.f32 %v5025_v23, %v5640_v16 }
 0x257   : > { %v1744_v35 = vadd.f32 %v1656_v49, %v1500_v21  ;;  %v1898_v47 = vsel %vm1304_vm4, %v1896_v26, %v1897_v30  ;;  %v1900_v25 = vsel %vm1304_vm4, %v1897_v30, %v1899_v31  ;;  %v2099_v39 = vmul.f32 %v5025_v23, %v5642_v17 }
 0x258   : > { %v2100_v37 = vmul.f32 %v5025_v23, %v5648_v54  ;;  %v1987_v52 = vadd.f32 %v1898_v47, %v1743_v3  ;;  %v2342_v55 = vmul.f32 %v5027_v24, %v5640_v16  ;;  %v2343_v61 = vmul.f32 %v5027_v24, %v5642_v17 }
 0x259   : > { %v1988_v50 = vadd.f32 %v1900_v25, %v1744_v35  ;;  %v2208_v62 = vrot.slane %v2098_v8, 1  ;;  %v2209_v2 = vrot.slane %v2099_v39, 1  ;;  %v2344_v13 = vmul.f32 %v5027_v24, %v5648_v54 }
 0x25a   : > { %v2211_v0 = vrot.slane %v2100_v37, 1  ;;  %v2055_v1 = vadd.f32 %v2023_v34, %v1987_v52  ;;  %v2452_v45 = vrot.slane %v2342_v55, 2  ;;  %v2453_v58 = vrot.slane %v2343_v61, 2 }
 0x25b   : > { %v2056_v43 = vadd.f32 %v2024_v36, %v1988_v50  ;;  %v2210_v6 = vsel %vm1059_vm3, %v2208_v62, %v2209_v2  ;;  %v2455_v63 = vrot.slane %v2344_v13, 2  ;;  %v911_v5 = vmul.f32 %v5003_v51, %v5558_v56 }
 0x25c   : > { %v2212_v4 = vsel %vm1059_vm3, %v2209_v2, %v2211_v0  ;;  %v2299_v12 = vadd.f32 %v2210_v6, %v2055_v1  ;;  %v2454_v19 = vsel %vm1304_vm4, %v2452_v45, %v2453_v58  ;;  %v912_v32 = vmul.f32 %v5003_v51, %v5566_v60  ;;  %v5714_v2 = vld [vmem:[#allocation2 + $0xf0] sm:$0xff]  ;;  %v5716_v45 = vld [vmem:[#allocation2 + $0xf8] sm:$0xff] }
 0x25d   : > { %v2300_v14 = vadd.f32 %v2212_v4, %v2056_v43  ;;  %v2456_v7 = vsel %vm1304_vm4, %v2453_v58, %v2455_v63  ;;  %v987_v18 = vmul.f32 %v4991_v41, %v5558_v56  ;;  %v988_v38 = vmul.f32 %v4991_v41, %v5566_v60 }
 0x25e   : > { %v989_v57 = vmul.f32 %v4991_v41, %v5577_v53  ;;  %v2543_v40 = vadd.f32 %v2454_v19, %v2299_v12  ;;  %v1232_v10 = vmul.f32 %v4993_v46, %v5558_v56  ;;  %v1233_v33 = vmul.f32 %v4993_v46, %v5566_v60 }
 0x25f   : > { %v2544_v9 = vadd.f32 %v2456_v7, %v2300_v14  ;;  %v1100_v11 = vrot.slane %v987_v18, 1  ;;  %v1101_v44 = vrot.slane %v988_v38, 1  ;;  %v1234_v59 = vmul.f32 %v4993_v46, %v5577_v53 }
 0x260   : > { %v1103_v48 = vrot.slane %v989_v57, 1  ;;  %v2581_v20 = vadd.f32 %v5689_v15, %v2543_v40  ;;  %v1345_v26 = vrot.slane %v1232_v10, 2  ;;  %v1346_v56 = vrot.slane %v1233_v33, 2 }
 0x261   : > { %v2582_v21 = vadd.f32 %v5689_v15, %v2544_v9  ;;  %v1102_v30 = vsel %vm1059_vm3, %v1100_v11, %v1101_v44  ;;  %v1348_v42 = vrot.slane %v1234_v59, 2  ;;  %v1469_v49 = vmul.f32 %v5030_v27, %v5640_v16 }
 0x262   : > { %v1104_v60 = vsel %vm1059_vm3, %v1101_v44, %v1103_v48  ;;  %v1188_v31 = vadd.f32 %v1102_v30, %v911_v5  ;;  %v1347_v3 = vsel %vm1304_vm4, %v1345_v26, %v1346_v56  ;;  %v1470_v47 = vmul.f32 %v5030_v27, %v5642_v17 }
 0x263   : > { %v2606_v53 = vpack.c.bf16 %v2582_v21, %v2581_v20  ;;  %v1189_v34 = vadd.f32 %v1104_v60, %v912_v32  ;;  %v1349_v35 = vsel %vm1304_vm4, %v1346_v56, %v1348_v42  ;;  %v1545_v36 = vmul.f32 %v5032_v28, %v5640_v16  ;;  %v5726_v32 = vld [vmem:[#allocation2 + $0x100] sm:$0x3] }
 0x264   : > { %v1546_v25 = vmul.f32 %v5032_v28, %v5642_v17  ;;  %v1433_v8 = vadd.f32 %v1347_v3, %v1188_v31  ;;  %v1547_v37 = vmul.f32 %v5032_v28, %v5648_v54  ;;  %v1789_v52 = vmul.f32 %v5034_v29, %v5640_v16 }
 0x265   : > { %4211 = vmatmul.mubr.msk.bf16.gmra.mrb[28].mxu1 %vm354_vm0, %v2606_v53  ;;  %v1434_v39 = vadd.f32 %v1349_v35, %v1189_v34  ;;  %v1657_v50 = vrot.slane %v1545_v36, 1  ;;  %v1790_v61 = vmul.f32 %v5034_v29, %v5642_v17  ;;  %v1791_v62 = vmul.f32 %v5034_v29, %v5648_v54 }
 0x266   : > { %v1658_v55 = vrot.slane %v1546_v25, 1  ;;  %v1501_v0 = vadd.f32 %v1469_v49, %v1433_v8  ;;  %v1660_v1 = vrot.slane %v1547_v37, 1  ;;  %v1901_v43 = vrot.slane %v1789_v52, 2 }
 0x267   : > { %v1502_v13 = vadd.f32 %v1470_v47, %v1434_v39  ;;  %v1902_v6 = vrot.slane %v1790_v61, 2  ;;  %v1904_v4 = vrot.slane %v1791_v62, 2  ;;  %v2025_v63 = vmul.f32 %v5023_v22, %v5714_v2 }
 0x268   : > { %v1659_v58 = vsel %vm1059_vm3, %v1657_v50, %v1658_v55  ;;  %v1661_v5 = vsel %vm1059_vm3, %v1658_v55, %v1660_v1  ;;  %v2026_v14 = vmul.f32 %v5023_v22, %v5716_v45  ;;  %v2101_v19 = vmul.f32 %v5025_v23, %v5714_v2 }
 0x269   : > { %v1745_v12 = vadd.f32 %v1659_v58, %v1501_v0  ;;  %v1746_v7 = vadd.f32 %v1661_v5, %v1502_v13  ;;  %v1903_v18 = vsel %vm1304_vm4, %v1901_v43, %v1902_v6  ;;  %v1905_v38 = vsel %vm1304_vm4, %v1902_v6, %v1904_v4 }
 0x26a   : > { %v2102_v57 = vmul.f32 %v5025_v23, %v5716_v45  ;;  %v2103_v9 = vmul.f32 %v5025_v23, %v5726_v32  ;;  %v2213_v10 = vrot.slane %v2101_v19, 1  ;;  %v2345_v33 = vmul.f32 %v5027_v24, %v5714_v2 }
 0x26b   : > { %v1989_v40 = vadd.f32 %v1903_v18, %v1745_v12  ;;  %v1990_v11 = vadd.f32 %v1905_v38, %v1746_v7  ;;  %v2346_v48 = vmul.f32 %v5027_v24, %v5716_v45  ;;  %v2347_v59 = vmul.f32 %v5027_v24, %v5726_v32 }
 0x26c   : > { %v2214_v44 = vrot.slane %v2102_v57, 1  ;;  %v2216_v21 = vrot.slane %v2103_v9, 1  ;;  %v2457_v26 = vrot.slane %v2345_v33, 2  ;;  %v913_v56 = vmul.f32 %v5003_v51, %v5640_v16  ;;  %v5776_v9 = vpop.f32.mrb[16].mxu0 }
 0x26d   : > { %v2057_v20 = vadd.f32 %v2025_v63, %v1989_v40  ;;  %v2058_v30 = vadd.f32 %v2026_v14, %v1990_v11  ;;  %v2458_v42 = vrot.slane %v2346_v48, 2  ;;  %v2460_v49 = vrot.slane %v2347_v59, 2  ;;  %v5787_v59 = vpop.f32.mrb[17].mxu0 }
 0x26e   : > { %v2215_v60 = vsel %vm1059_vm3, %v2213_v10, %v2214_v44  ;;  %v2217_v53 = vsel %vm1059_vm3, %v2214_v44, %v2216_v21  ;;  %v914_v34 = vmul.f32 %v5003_v51, %v5642_v17  ;;  %v990_v3 = vmul.f32 %v4991_v41, %v5640_v16  ;;  %v5778_v10 = vld [vmem:[#allocation2 + $0x108] sm:$0xff] }
 0x26f   : > { %v2301_v31 = vadd.f32 %v2215_v60, %v2057_v20  ;;  %v2302_v35 = vadd.f32 %v2217_v53, %v2058_v30  ;;  %v2459_v47 = vsel %vm1304_vm4, %v2457_v26, %v2458_v42  ;;  %v2461_v36 = vsel %vm1304_vm4, %v2458_v42, %v2460_v49  ;;  %v5791_v30 = vld [vmem:[#allocation2 + $0x110] sm:$0xff] }
 0x270   : > { %v991_v25 = vmul.f32 %v4991_v41, %v5642_v17  ;;  %v992_v39 = vmul.f32 %v4991_v41, %v5648_v54  ;;  %v1105_v37 = vrot.slane %v990_v3, 1  ;;  %v1235_v52 = vmul.f32 %v4993_v46, %v5640_v16 }
 0x271   : > { %v2545_v8 = vadd.f32 %v2459_v47, %v2301_v31  ;;  %v2546_v50 = vadd.f32 %v2461_v36, %v2302_v35  ;;  %v1236_v61 = vmul.f32 %v4993_v46, %v5642_v17  ;;  %v1237_v62 = vmul.f32 %v4993_v46, %v5648_v54  ;;  %v5793_v31 = vpop.f32.mrb[18].mxu0 }
 0x272   : > { %v1106_v55 = vrot.slane %v991_v25, 1  ;;  %v1108_v13 = vrot.slane %v992_v39, 1  ;;  %v1350_v1 = vrot.slane %v1235_v52, 2  ;;  %v1471_v43 = vmul.f32 %v5030_v27, %v5714_v2  ;;  %v5801_v36 = vpop.f32.mrb[19].mxu0  ;;  %v5803_v25 = vld [vmem:[#allocation2 + $0x118] sm:$0x3] }
 0x273   : > { %v2583_v0 = vadd.f32 %v5689_v15, %v2545_v8  ;;  %v2584_v58 = vadd.f32 %v5689_v15, %v2546_v50  ;;  %v1351_v16 = vrot.slane %v1236_v61, 2  ;;  %v1353_v4 = vrot.slane %v1237_v62, 2  ;;  %v5807_v50 = vpop.f32.mrb[20].mxu0 }
 0x274   : > { %v1107_v6 = vsel %vm1059_vm3, %v1105_v37, %v1106_v55  ;;  %v1109_v63 = vsel %vm1059_vm3, %v1106_v55, %v1108_v13  ;;  %v1472_v17 = vmul.f32 %v5030_v27, %v5716_v45  ;;  %v1548_v54 = vmul.f32 %v5032_v28, %v5714_v2  ;;  %v5815_v13 = vpop.f32.mrb[21].mxu0 }
 0x275   : > { %v1190_v5 = vadd.f32 %v1107_v6, %v913_v56  ;;  %v2607_v12 = vpack.c.bf16 %v2584_v58, %v2583_v0  ;;  %v1191_v14 = vadd.f32 %v1109_v63, %v914_v34  ;;  %v1352_v19 = vsel %vm1304_vm4, %v1350_v1, %v1351_v16 }
 0x276   : > { %v1354_v7 = vsel %vm1304_vm4, %v1351_v16, %v1353_v4  ;;  %v1549_v38 = vmul.f32 %v5032_v28, %v5716_v45  ;;  %v1550_v57 = vmul.f32 %v5032_v28, %v5726_v32  ;;  %v1662_v40 = vrot.slane %v1548_v54, 1  ;;  %v5821_v16 = vpop.f32.mrb[22].mxu0 }
 0x277   : > { %v1435_v18 = vadd.f32 %v1352_v19, %v1190_v5  ;;  %4214 = vmatprep.mubr.msk.bf16.mxu1 %vm354_vm0, %v2607_v12  ;;  %v1436_v33 = vadd.f32 %v1354_v7, %v1191_v14  ;;  %v1792_v11 = vmul.f32 %v5034_v29, %v5714_v2  ;;  %v1793_v44 = vmul.f32 %v5034_v29, %v5716_v45 }
 0x278   : > { %v1794_v48 = vmul.f32 %v5034_v29, %v5726_v32  ;;  %v1663_v21 = vrot.slane %v1549_v38, 1  ;;  %v1665_v26 = vrot.slane %v1550_v57, 1  ;;  %v2027_v56 = vmul.f32 %v5023_v22, %v5778_v10 }
 0x279   : > { %v1503_v20 = vadd.f32 %v1471_v43, %v1435_v18  ;;  %v1504_v60 = vadd.f32 %v1472_v17, %v1436_v33  ;;  %v1906_v42 = vrot.slane %v1792_v11, 2  ;;  %v1907_v49 = vrot.slane %v1793_v44, 2 }
 0x27a   : > { %v1909_v53 = vrot.slane %v1794_v48, 2  ;;  %v1664_v34 = vsel %vm1059_vm3, %v1662_v40, %v1663_v21  ;;  %v1666_v3 = vsel %vm1059_vm3, %v1663_v21, %v1665_v26  ;;  %v2028_v35 = vmul.f32 %v5023_v22, %v5791_v30  ;;  %v5831_v40 = vpop.f32.mrb[23].mxu0 }
 0x27b   : > { %v2104_v47 = vmul.f32 %v5025_v23, %v5778_v10  ;;  %v1747_v8 = vadd.f32 %v1664_v34, %v1503_v20  ;;  %v1748_v39 = vadd.f32 %v1666_v3, %v1504_v60  ;;  %v1908_v37 = vsel %vm1304_vm4, %v1906_v42, %v1907_v49 }
 0x27c   : > { %v1910_v52 = vsel %vm1304_vm4, %v1907_v49, %v1909_v53  ;;  %v2105_v55 = vmul.f32 %v5025_v23, %v5791_v30  ;;  %v2106_v61 = vmul.f32 %v5025_v23, %v5803_v25  ;;  %v2348_v0 = vmul.f32 %v5027_v24, %v5778_v10 }
 0x27d   : > { %v2218_v62 = vrot.slane %v2104_v47, 1  ;;  %v1991_v1 = vadd.f32 %v1908_v37, %v1747_v8  ;;  %v1992_v43 = vadd.f32 %v1910_v52, %v1748_v39  ;;  %v2349_v58 = vmul.f32 %v5027_v24, %v5791_v30 }
 0x27e   : > { %v2350_v6 = vmul.f32 %v5027_v24, %v5803_v25  ;;  %v2219_v4 = vrot.slane %v2105_v55, 1  ;;  %v2221_v63 = vrot.slane %v2106_v61, 1  ;;  %v2462_v5 = vrot.slane %v2348_v0, 2 }
 0x27f   : > { %v915_v17 = vmul.f32 %v5003_v51, %v5714_v2  ;;  %v2059_v54 = vadd.f32 %v2027_v56, %v1991_v1  ;;  %v2060_v12 = vadd.f32 %v2028_v35, %v1992_v43  ;;  %v2463_v14 = vrot.slane %v2349_v58, 2 }
 0x280   : > { %v2465_v19 = vrot.slane %v2350_v6, 2  ;;  %v2220_v7 = vsel %vm1059_vm3, %v2218_v62, %v2219_v4  ;;  %v2222_v18 = vsel %vm1059_vm3, %v2219_v4, %v2221_v63  ;;  %v916_v38 = vmul.f32 %v5003_v51, %v5716_v45  ;;  %v5861_v63 = vld [vmem:[#allocation2 + $0x120] sm:$0xff] }
 0x281   : > { %v993_v57 = vmul.f32 %v4991_v41, %v5714_v2  ;;  %v2303_v33 = vadd.f32 %v2220_v7, %v2059_v54  ;;  %v2304_v11 = vadd.f32 %v2222_v18, %v2060_v12  ;;  %v2464_v44 = vsel %vm1304_vm4, %v2462_v5, %v2463_v14 }
 0x282   : > { %v2466_v48 = vsel %vm1304_vm4, %v2463_v14, %v2465_v19  ;;  %v994_v20 = vmul.f32 %v4991_v41, %v5716_v45  ;;  %v995_v21 = vmul.f32 %v4991_v41, %v5726_v32  ;;  %v1238_v56 = vmul.f32 %v4993_v46, %v5714_v2 }
 0x283   : > { %v1110_v26 = vrot.slane %v993_v57, 1  ;;  %v2547_v60 = vadd.f32 %v2464_v44, %v2303_v33  ;;  %v2548_v42 = vadd.f32 %v2466_v48, %v2304_v11  ;;  %v1239_v49 = vmul.f32 %v4993_v46, %v5716_v45 }
 0x284   : > { %v1240_v53 = vmul.f32 %v4993_v46, %v5726_v32  ;;  %v1111_v34 = vrot.slane %v994_v20, 1  ;;  %v1113_v3 = vrot.slane %v995_v21, 1  ;;  %v1355_v35 = vrot.slane %v1238_v56, 2  ;;  %v5878_v56 = vld [vmem:[#allocation2 + $0x130] sm:$0x3] }
 0x285   : > { %v1473_v47 = vmul.f32 %v5030_v27, %v5778_v10  ;;  %v2585_v8 = vadd.f32 %v5689_v15, %v2547_v60  ;;  %v2586_v39 = vadd.f32 %v5689_v15, %v2548_v42  ;;  %v1356_v37 = vrot.slane %v1239_v49, 2 }
 0x286   : > { %v1358_v2 = vrot.slane %v1240_v53, 2  ;;  %v1112_v52 = vsel %vm1059_vm3, %v1110_v26, %v1111_v34  ;;  %v1114_v55 = vsel %vm1059_vm3, %v1111_v34, %v1113_v3  ;;  %v1474_v45 = vmul.f32 %v5030_v27, %v5791_v30 }
 0x287   : > { %v1551_v32 = vmul.f32 %v5032_v28, %v5778_v10  ;;  %v2608_v61 = vpack.c.bf16 %v2586_v39, %v2585_v8  ;;  %v1192_v62 = vadd.f32 %v1112_v52, %v915_v17  ;;  %v1193_v0 = vadd.f32 %v1114_v55, %v916_v38  ;;  %v5872_v38 = vld [vmem:[#allocation2 + $0x128] sm:$0xff] }
 0x288   : > { %v1357_v1 = vsel %vm1304_vm4, %v1355_v35, %v1356_v37  ;;  %v1359_v43 = vsel %vm1304_vm4, %v1356_v37, %v1358_v2  ;;  %v1552_v58 = vmul.f32 %v5032_v28, %v5791_v30  ;;  %v1553_v6 = vmul.f32 %v5032_v28, %v5803_v25 }
 0x289   : > { %v1667_v4 = vrot.slane %v1551_v32, 1  ;;  %4215 = vmatmul.mubr.msk.bf16.gmra.mrb[32].mxu1 %vm354_vm0, %v2608_v61  ;;  %v1437_v5 = vadd.f32 %v1357_v1, %v1192_v62  ;;  %v1438_v54 = vadd.f32 %v1359_v43, %v1193_v0  ;;  %v1795_v17 = vmul.f32 %v5034_v29, %v5778_v10 }
 0x28a   : > { %v1796_v12 = vmul.f32 %v5034_v29, %v5791_v30  ;;  %v1668_v14 = vrot.slane %v1552_v58, 1  ;;  %v1670_v19 = vrot.slane %v1553_v6, 1  ;;  %v1797_v7 = vmul.f32 %v5034_v29, %v5803_v25 }
 0x28b   : > { %v2029_v18 = vmul.f32 %v5023_v22, %v5861_v63  ;;  %v1505_v57 = vadd.f32 %v1473_v47, %v1437_v5  ;;  %v1506_v33 = vadd.f32 %v1474_v45, %v1438_v54  ;;  %v1911_v11 = vrot.slane %v1795_v17, 2 }
 0x28c   : > { %v1912_v44 = vrot.slane %v1796_v12, 2  ;;  %v1669_v48 = vsel %vm1059_vm3, %v1667_v4, %v1668_v14  ;;  %v1671_v20 = vsel %vm1059_vm3, %v1668_v14, %v1670_v19  ;;  %v1914_v21 = vrot.slane %v1797_v7, 2 }
 0x28d   : > { %v2030_v26 = vmul.f32 %v5023_v22, %v5872_v38  ;;  %v1749_v60 = vadd.f32 %v1669_v48, %v1505_v57  ;;  %v1750_v42 = vadd.f32 %v1671_v20, %v1506_v33  ;;  %v2107_v53 = vmul.f32 %v5025_v23, %v5861_v63 }
 0x28e   : > { %v1913_v49 = vsel %vm1304_vm4, %v1911_v11, %v1912_v44  ;;  %v1915_v34 = vsel %vm1304_vm4, %v1912_v44, %v1914_v21  ;;  %v2108_v3 = vmul.f32 %v5025_v23, %v5872_v38  ;;  %v2109_v35 = vmul.f32 %v5025_v23, %v5878_v56 }
 0x28f   : > { %v2351_v47 = vmul.f32 %v5027_v24, %v5861_v63  ;;  %v1993_v8 = vadd.f32 %v1913_v49, %v1749_v60  ;;  %v1994_v39 = vadd.f32 %v1915_v34, %v1750_v42  ;;  %v2223_v37 = vrot.slane %v2107_v53, 1  ;;  %v5918_v53 = vpop.f32.mrb[24].mxu0 }
 0x290   : > { %v2352_v2 = vmul.f32 %v5027_v24, %v5872_v38  ;;  %v2224_v52 = vrot.slane %v2108_v3, 1  ;;  %v2226_v55 = vrot.slane %v2109_v35, 1  ;;  %v2353_v45 = vmul.f32 %v5027_v24, %v5878_v56 }
 0x291   : > { %v2467_v32 = vrot.slane %v2351_v47, 2  ;;  %v2061_v61 = vadd.f32 %v2029_v18, %v1993_v8  ;;  %v2062_v62 = vadd.f32 %v2030_v26, %v1994_v39  ;;  %v917_v1 = vmul.f32 %v5003_v51, %v5778_v10 }
 0x292   : > { %v2468_v0 = vrot.slane %v2352_v2, 2  ;;  %v2225_v43 = vsel %vm1059_vm3, %v2223_v37, %v2224_v52  ;;  %v2227_v58 = vsel %vm1059_vm3, %v2224_v52, %v2226_v55  ;;  %v2470_v6 = vrot.slane %v2353_v45, 2 }
 0x293   : > { %v918_v4 = vmul.f32 %v5003_v51, %v5791_v30  ;;  %v2305_v5 = vadd.f32 %v2225_v43, %v2061_v61  ;;  %v2306_v54 = vadd.f32 %v2227_v58, %v2062_v62  ;;  %v996_v12 = vmul.f32 %v4991_v41, %v5778_v10 }
 0x294   : > { %v2469_v17 = vsel %vm1304_vm4, %v2467_v32, %v2468_v0  ;;  %v2471_v14 = vsel %vm1304_vm4, %v2468_v0, %v2470_v6  ;;  %v997_v19 = vmul.f32 %v4991_v41, %v5791_v30  ;;  %v998_v7 = vmul.f32 %v4991_v41, %v5803_v25  ;;  %v5939_v6 = vpop.f32.mrb[25].mxu0 }
 0x295   : > { %v1241_v18 = vmul.f32 %v4993_v46, %v5778_v10  ;;  %v2549_v57 = vadd.f32 %v2469_v17, %v2305_v5  ;;  %v2550_v33 = vadd.f32 %v2471_v14, %v2306_v54  ;;  %v1115_v11 = vrot.slane %v996_v12, 1  ;;  %v5943_v14 = vpop.f32.mrb[26].mxu0 }
 0x296   : > { %v1242_v44 = vmul.f32 %v4993_v46, %v5791_v30  ;;  %v1116_v48 = vrot.slane %v997_v19, 1  ;;  %v1118_v20 = vrot.slane %v998_v7, 1  ;;  %v1243_v21 = vmul.f32 %v4993_v46, %v5803_v25  ;;  %v5945_v19 = vld [vmem:[#allocation2 + $0x140] sm:$0xff] }
 0x297   : > { %v1360_v26 = vrot.slane %v1241_v18, 2  ;;  %v2587_v60 = vadd.f32 %v5689_v15, %v2549_v57  ;;  %v2588_v42 = vadd.f32 %v5689_v15, %v2550_v33  ;;  %v1475_v10 = vmul.f32 %v5030_v27, %v5861_v63 }
 0x298   : > { %v1361_v49 = vrot.slane %v1242_v44, 2  ;;  %v1117_v34 = vsel %vm1059_vm3, %v1115_v11, %v1116_v48  ;;  %v1119_v30 = vsel %vm1059_vm3, %v1116_v48, %v1118_v20  ;;  %v1363_v3 = vrot.slane %v1243_v21, 2  ;;  %v5951_v11 = vpop.f32.mrb[27].mxu0  ;;  %v5953_v44 = vld [vmem:[#allocation2 + $0x148] sm:$0x3] }
 0x299   : > { %v1476_v35 = vmul.f32 %v5030_v27, %v5872_v38  ;;  %v2609_v25 = vpack.c.bf16 %v2588_v42, %v2587_v60  ;;  %v1194_v47 = vadd.f32 %v1117_v34, %v917_v1  ;;  %v1195_v8 = vadd.f32 %v1119_v30, %v918_v4  ;;  %v5941_v4 = vld [vmem:[#allocation2 + $0x138] sm:$0xff] }
 0x29a   : > { %v1362_v39 = vsel %vm1304_vm4, %v1360_v26, %v1361_v49  ;;  %v1364_v37 = vsel %vm1304_vm4, %v1361_v49, %v1363_v3  ;;  %v1554_v2 = vmul.f32 %v5032_v28, %v5861_v63  ;;  %v1555_v52 = vmul.f32 %v5032_v28, %v5872_v38 }
 0x29b   : > { %v1556_v55 = vmul.f32 %v5032_v28, %v5878_v56  ;;  %4218 = vmatprep.mubr.msk.bf16.mxu1 %vm354_vm0, %v2609_v25  ;;  %v1439_v45 = vadd.f32 %v1362_v39, %v1194_v47  ;;  %v1440_v32 = vadd.f32 %v1364_v37, %v1195_v8  ;;  %v1798_v61 = vmul.f32 %v5034_v29, %v5861_v63 }
 0x29c   : > { %v1799_v62 = vmul.f32 %v5034_v29, %v5872_v38  ;;  %v1672_v0 = vrot.slane %v1554_v2, 1  ;;  %v1673_v1 = vrot.slane %v1555_v52, 1  ;;  %v1800_v58 = vmul.f32 %v5034_v29, %v5878_v56 }
 0x29d   : > { %v1675_v43 = vrot.slane %v1556_v55, 1  ;;  %v1507_v5 = vadd.f32 %v1475_v10, %v1439_v45  ;;  %v1508_v54 = vadd.f32 %v1476_v35, %v1440_v32  ;;  %v1916_v17 = vrot.slane %v1798_v61, 2 }
 0x29e   : > { %v1917_v12 = vrot.slane %v1799_v62, 2  ;;  %v1674_v7 = vsel %vm1059_vm3, %v1672_v0, %v1673_v1  ;;  %v1919_v57 = vrot.slane %v1800_v58, 2  ;;  %v2031_v33 = vmul.f32 %v5023_v22, %v5941_v4 }
 0x29f   : > { %v1676_v18 = vsel %vm1059_vm3, %v1673_v1, %v1675_v43  ;;  %v1751_v48 = vadd.f32 %v1674_v7, %v1507_v5  ;;  %v2032_v26 = vmul.f32 %v5023_v22, %v5945_v19  ;;  %v2110_v42 = vmul.f32 %v5025_v23, %v5941_v4 }
 0x2a0   : > { %v1752_v20 = vadd.f32 %v1676_v18, %v1508_v54  ;;  %v1918_v21 = vsel %vm1304_vm4, %v1916_v17, %v1917_v12  ;;  %v1920_v60 = vsel %vm1304_vm4, %v1917_v12, %v1919_v57  ;;  %v2111_v49 = vmul.f32 %v5025_v23, %v5945_v19 }
 0x2a1   : > { %v2112_v10 = vmul.f32 %v5025_v23, %v5953_v44  ;;  %v1995_v34 = vadd.f32 %v1918_v21, %v1751_v48  ;;  %v2354_v3 = vmul.f32 %v5027_v24, %v5941_v4  ;;  %v2355_v35 = vmul.f32 %v5027_v24, %v5945_v19 }
 0x2a2   : > { %v1996_v30 = vadd.f32 %v1920_v60, %v1752_v20  ;;  %v2228_v25 = vrot.slane %v2110_v42, 1  ;;  %v2229_v47 = vrot.slane %v2111_v49, 1  ;;  %v2356_v39 = vmul.f32 %v5027_v24, %v5953_v44 }
 0x2a3   : > { %v2231_v8 = vrot.slane %v2112_v10, 1  ;;  %v2063_v37 = vadd.f32 %v2031_v33, %v1995_v34  ;;  %v2472_v52 = vrot.slane %v2354_v3, 2  ;;  %v2473_v55 = vrot.slane %v2355_v35, 2 }
 0x2a4   : > { %v2064_v2 = vadd.f32 %v2032_v26, %v1996_v30  ;;  %v2230_v45 = vsel %vm1059_vm3, %v2228_v25, %v2229_v47  ;;  %v2475_v61 = vrot.slane %v2356_v39, 2  ;;  %v919_v62 = vmul.f32 %v5003_v51, %v5861_v63 }
 0x2a5   : > { %v2232_v32 = vsel %vm1059_vm3, %v2229_v47, %v2231_v8  ;;  %v2307_v0 = vadd.f32 %v2230_v45, %v2063_v37  ;;  %v2474_v43 = vsel %vm1304_vm4, %v2472_v52, %v2473_v55  ;;  %v920_v58 = vmul.f32 %v5003_v51, %v5872_v38 }
 0x2a6   : > { %v2308_v1 = vadd.f32 %v2232_v32, %v2064_v2  ;;  %v2476_v5 = vsel %vm1304_vm4, %v2473_v55, %v2475_v61  ;;  %v999_v54 = vmul.f32 %v4991_v41, %v5861_v63  ;;  %v1000_v17 = vmul.f32 %v4991_v41, %v5872_v38 }
 0x2a7   : > { %v1001_v12 = vmul.f32 %v4991_v41, %v5878_v56  ;;  %v2551_v7 = vadd.f32 %v2474_v43, %v2307_v0  ;;  %v1244_v57 = vmul.f32 %v4993_v46, %v5861_v63  ;;  %v1245_v33 = vmul.f32 %v4993_v46, %v5872_v38 }
 0x2a8   : > { %v2552_v18 = vadd.f32 %v2476_v5, %v2308_v1  ;;  %v1120_v48 = vrot.slane %v999_v54, 1  ;;  %v1121_v20 = vrot.slane %v1000_v17, 1  ;;  %v1246_v26 = vmul.f32 %v4993_v46, %v5878_v56  ;;  %v6014_v1 = vld [vmem:[#allocation2 + $0x150] sm:$0xff]  ;;  %v6016_v17 = vld [vmem:[#allocation2 + $0x158] sm:$0xff] }
 0x2a9   : > { %v1123_v21 = vrot.slane %v1001_v12, 1  ;;  %v2589_v60 = vadd.f32 %v5689_v15, %v2551_v7  ;;  %v1365_v49 = vrot.slane %v1244_v57, 2  ;;  %v1366_v10 = vrot.slane %v1245_v33, 2 }
 0x2aa   : > { %v2590_v42 = vadd.f32 %v5689_v15, %v2552_v18  ;;  %v1122_v34 = vsel %vm1059_vm3, %v1120_v48, %v1121_v20  ;;  %v1368_v63 = vrot.slane %v1246_v26, 2  ;;  %v1477_v38 = vmul.f32 %v5030_v27, %v5941_v4  ;;  %v6026_v26 = vld [vmem:[#allocation2 + $0x160] sm:$0x3] }
 0x2ab   : > { %v1124_v30 = vsel %vm1059_vm3, %v1121_v20, %v1123_v21  ;;  %v1196_v35 = vadd.f32 %v1122_v34, %v919_v62  ;;  %v1367_v47 = vsel %vm1304_vm4, %v1365_v49, %v1366_v10  ;;  %v1478_v8 = vmul.f32 %v5030_v27, %v5945_v19 }
 0x2ac   : > { %v2610_v3 = vpack.c.bf16 %v2590_v42, %v2589_v60  ;;  %v1197_v25 = vadd.f32 %v1124_v30, %v920_v58  ;;  %v1369_v56 = vsel %vm1304_vm4, %v1366_v10, %v1368_v63  ;;  %v1557_v39 = vmul.f32 %v5032_v28, %v5941_v4 }
 0x2ad   : > { %v1558_v37 = vmul.f32 %v5032_v28, %v5945_v19  ;;  %v1441_v2 = vadd.f32 %v1367_v47, %v1196_v35  ;;  %v1559_v55 = vmul.f32 %v5032_v28, %v5953_v44  ;;  %v1801_v45 = vmul.f32 %v5034_v29, %v5941_v4 }
 0x2ae   : > { %4219 = vmatmul.mubr.msk.bf16.gmra.mrb[36].mxu1 %vm354_vm0, %v2610_v3  ;;  %v1442_v52 = vadd.f32 %v1369_v56, %v1197_v25  ;;  %v1677_v32 = vrot.slane %v1557_v39, 1  ;;  %v1802_v62 = vmul.f32 %v5034_v29, %v5945_v19  ;;  %v1803_v0 = vmul.f32 %v5034_v29, %v5953_v44 }
 0x2af   : > { %v1678_v61 = vrot.slane %v1558_v37, 1  ;;  %v1509_v43 = vadd.f32 %v1477_v38, %v1441_v2  ;;  %v1680_v5 = vrot.slane %v1559_v55, 1  ;;  %v1921_v54 = vrot.slane %v1801_v45, 2 }
 0x2b0   : > { %v1510_v58 = vadd.f32 %v1478_v8, %v1442_v52  ;;  %v1922_v7 = vrot.slane %v1802_v62, 2  ;;  %v1924_v18 = vrot.slane %v1803_v0, 2  ;;  %v2033_v57 = vmul.f32 %v5023_v22, %v6014_v1 }
 0x2b1   : > { %v1679_v12 = vsel %vm1059_vm3, %v1677_v32, %v1678_v61  ;;  %v1681_v33 = vsel %vm1059_vm3, %v1678_v61, %v1680_v5  ;;  %v2034_v20 = vmul.f32 %v5023_v22, %v6016_v17  ;;  %v2113_v21 = vmul.f32 %v5025_v23, %v6014_v1 }
 0x2b2   : > { %v1753_v48 = vadd.f32 %v1679_v12, %v1509_v43  ;;  %v1754_v60 = vadd.f32 %v1681_v33, %v1510_v58  ;;  %v1923_v42 = vsel %vm1304_vm4, %v1921_v54, %v1922_v7  ;;  %v1925_v49 = vsel %vm1304_vm4, %v1922_v7, %v1924_v18 }
 0x2b3   : > { %v2114_v10 = vmul.f32 %v5025_v23, %v6016_v17  ;;  %v2115_v30 = vmul.f32 %v5025_v23, %v6026_v26  ;;  %v2233_v63 = vrot.slane %v2113_v21, 1  ;;  %v2357_v38 = vmul.f32 %v5027_v24, %v6014_v1 }
 0x2b4   : > { %v1997_v34 = vadd.f32 %v1923_v42, %v1753_v48  ;;  %v1998_v3 = vadd.f32 %v1925_v49, %v1754_v60  ;;  %v2358_v25 = vmul.f32 %v5027_v24, %v6016_v17  ;;  %v2359_v47 = vmul.f32 %v5027_v24, %v6026_v26 }
 0x2b5   : > { %v2234_v35 = vrot.slane %v2114_v10, 1  ;;  %v2236_v8 = vrot.slane %v2115_v30, 1  ;;  %v2477_v39 = vrot.slane %v2357_v38, 2  ;;  %v921_v37 = vmul.f32 %v5003_v51, %v5941_v4 }
 0x2b6   : > { %v2065_v56 = vadd.f32 %v2033_v57, %v1997_v34  ;;  %v2066_v2 = vadd.f32 %v2034_v20, %v1998_v3  ;;  %v2478_v55 = vrot.slane %v2358_v25, 2  ;;  %v2480_v45 = vrot.slane %v2359_v47, 2  ;;  %v6063_v34 = vpop.f32.mrb[28].mxu0 }
 0x2b7   : > { %v2235_v52 = vsel %vm1059_vm3, %v2233_v63, %v2234_v35  ;;  %v2237_v32 = vsel %vm1059_vm3, %v2234_v35, %v2236_v8  ;;  %v922_v62 = vmul.f32 %v5003_v51, %v5945_v19  ;;  %v1002_v0 = vmul.f32 %v4991_v41, %v5941_v4 }
 0x2b8   : > { %v2309_v61 = vadd.f32 %v2235_v52, %v2065_v56  ;;  %v2310_v43 = vadd.f32 %v2237_v32, %v2066_v2  ;;  %v2479_v58 = vsel %vm1304_vm4, %v2477_v39, %v2478_v55  ;;  %v2481_v5 = vsel %vm1304_vm4, %v2478_v55, %v2480_v45  ;;  %v6078_v55 = vld [vmem:[#allocation2 + $0x168] sm:$0xff] }
 0x2b9   : > { %v1003_v54 = vmul.f32 %v4991_v41, %v5945_v19  ;;  %v1004_v7 = vmul.f32 %v4991_v41, %v5953_v44  ;;  %v1125_v18 = vrot.slane %v1002_v0, 1  ;;  %v1247_v57 = vmul.f32 %v4993_v46, %v5941_v4  ;;  %v6087_v0 = vpop.f32.mrb[29].mxu0 }
 0x2ba   : > { %v2553_v12 = vadd.f32 %v2479_v58, %v2309_v61  ;;  %v2554_v33 = vadd.f32 %v2481_v5, %v2310_v43  ;;  %v1248_v20 = vmul.f32 %v4993_v46, %v5945_v19  ;;  %v1249_v21 = vmul.f32 %v4993_v46, %v5953_v44 }
 0x2bb   : > { %v1126_v48 = vrot.slane %v1003_v54, 1  ;;  %v1128_v42 = vrot.slane %v1004_v7, 1  ;;  %v1370_v49 = vrot.slane %v1247_v57, 2  ;;  %v1479_v10 = vmul.f32 %v5030_v27, %v6014_v1  ;;  %v6093_v7 = vld [vmem:[#allocation2 + $0x170] sm:$0xff] }
 0x2bc   : > { %v2591_v60 = vadd.f32 %v5689_v15, %v2553_v12  ;;  %v2592_v30 = vadd.f32 %v5689_v15, %v2554_v33  ;;  %v1371_v63 = vrot.slane %v1248_v20, 2  ;;  %v1373_v38 = vrot.slane %v1249_v21, 2  ;;  %v6091_v12 = vpop.f32.mrb[30].mxu0 }
 0x2bd   : > { %v1127_v4 = vsel %vm1059_vm3, %v1125_v18, %v1126_v48  ;;  %v1129_v19 = vsel %vm1059_vm3, %v1126_v48, %v1128_v42  ;;  %v1480_v44 = vmul.f32 %v5030_v27, %v6016_v17  ;;  %v1560_v35 = vmul.f32 %v5032_v28, %v6014_v1  ;;  %v6095_v20 = vpop.f32.mrb[31].mxu0 }
 0x2be   : > { %v1198_v3 = vadd.f32 %v1127_v4, %v921_v37  ;;  %v2611_v25 = vpack.c.bf16 %v2592_v30, %v2591_v60  ;;  %v1199_v47 = vadd.f32 %v1129_v19, %v922_v62  ;;  %v1372_v56 = vsel %vm1304_vm4, %v1370_v49, %v1371_v63 }
 0x2bf   : > { %v1374_v8 = vsel %vm1304_vm4, %v1371_v63, %v1373_v38  ;;  %v1561_v2 = vmul.f32 %v5032_v28, %v6016_v17  ;;  %v1562_v52 = vmul.f32 %v5032_v28, %v6026_v26  ;;  %v1682_v37 = vrot.slane %v1560_v35, 1 }
 0x2c0   : > { %v1443_v39 = vadd.f32 %v1372_v56, %v1198_v3  ;;  %4222 = vmatprep.mubr.msk.bf16.mxu1 %vm354_vm0, %v2611_v25  ;;  %v1444_v45 = vadd.f32 %v1374_v8, %v1199_v47  ;;  %v1804_v32 = vmul.f32 %v5034_v29, %v6014_v1  ;;  %v1805_v61 = vmul.f32 %v5034_v29, %v6016_v17 }
 0x2c1   : > { %v1806_v62 = vmul.f32 %v5034_v29, %v6026_v26  ;;  %v1683_v58 = vrot.slane %v1561_v2, 1  ;;  %v1685_v5 = vrot.slane %v1562_v52, 1  ;;  %v2035_v54 = vmul.f32 %v5023_v22, %v6078_v55 }
 0x2c2   : > { %v1511_v43 = vadd.f32 %v1479_v10, %v1443_v39  ;;  %v1512_v18 = vadd.f32 %v1480_v44, %v1444_v45  ;;  %v1926_v57 = vrot.slane %v1804_v32, 2  ;;  %v1927_v33 = vrot.slane %v1805_v61, 2  ;;  %v6103_v10 = vld [vmem:[#allocation2 + $0x178] sm:$0x3] }
 0x2c3   : > { %v1929_v48 = vrot.slane %v1806_v62, 2  ;;  %v1684_v21 = vsel %vm1059_vm3, %v1682_v37, %v1683_v58  ;;  %v1686_v60 = vsel %vm1059_vm3, %v1683_v58, %v1685_v5  ;;  %v2036_v42 = vmul.f32 %v5023_v22, %v6093_v7 }
 0x2c4   : > { %v2116_v49 = vmul.f32 %v5025_v23, %v6078_v55  ;;  %v1755_v30 = vadd.f32 %v1684_v21, %v1511_v43  ;;  %v1756_v4 = vadd.f32 %v1686_v60, %v1512_v18  ;;  %v1928_v63 = vsel %vm1304_vm4, %v1926_v57, %v1927_v33 }
 0x2c5   : > { %v1930_v38 = vsel %vm1304_vm4, %v1927_v33, %v1929_v48  ;;  %v2117_v19 = vmul.f32 %v5025_v23, %v6093_v7  ;;  %v2118_v3 = vmul.f32 %v5025_v23, %v6103_v10  ;;  %v2360_v35 = vmul.f32 %v5027_v24, %v6078_v55 }
 0x2c6   : > { %v2238_v44 = vrot.slane %v2116_v49, 1  ;;  %v1999_v25 = vadd.f32 %v1928_v63, %v1755_v30  ;;  %v2000_v47 = vadd.f32 %v1930_v38, %v1756_v4  ;;  %v2361_v56 = vmul.f32 %v5027_v24, %v6093_v7 }
 0x2c7   : > { %v2362_v8 = vmul.f32 %v5027_v24, %v6103_v10  ;;  %v2239_v39 = vrot.slane %v2117_v19, 1  ;;  %v2241_v2 = vrot.slane %v2118_v3, 1  ;;  %v2482_v52 = vrot.slane %v2360_v35, 2 }
 0x2c8   : > { %v923_v37 = vmul.f32 %v5003_v51, %v6014_v1  ;;  %v2067_v45 = vadd.f32 %v2035_v54, %v1999_v25  ;;  %v2068_v32 = vadd.f32 %v2036_v42, %v2000_v47  ;;  %v2483_v61 = vrot.slane %v2361_v56, 2 }
 0x2c9   : > { %v2485_v62 = vrot.slane %v2362_v8, 2  ;;  %v2240_v43 = vsel %vm1059_vm3, %v2238_v44, %v2239_v39  ;;  %v2242_v58 = vsel %vm1059_vm3, %v2239_v39, %v2241_v2  ;;  %v924_v5 = vmul.f32 %v5003_v51, %v6016_v17  ;;  %v6125_v57 = vpop.f32.mrb[16].mxu1 }
 0x2ca   : > { %v1005_v18 = vmul.f32 %v4991_v41, %v6014_v1  ;;  %v2311_v33 = vadd.f32 %v2240_v43, %v2067_v45  ;;  %v2312_v48 = vadd.f32 %v2242_v58, %v2068_v32  ;;  %v2484_v21 = vsel %vm1304_vm4, %v2482_v52, %v2483_v61  ;;  %v6129_v60 = vpop.f32.mrb[17].mxu1 }
 0x2cb   : > { %v2486_v54 = vsel %vm1304_vm4, %v2483_v61, %v2485_v62  ;;  %v1006_v42 = vmul.f32 %v4991_v41, %v6016_v17  ;;  %v1007_v49 = vmul.f32 %v4991_v41, %v6026_v26  ;;  %v1250_v4 = vmul.f32 %v4993_v46, %v6014_v1  ;;  %v6137_v63 = vpop.f32.mrb[18].mxu1  ;;  %v6155_v62 = vld [vmem:[#allocation2 + $0x180] sm:$0xff] }
 0x2cc   : > { %v1130_v30 = vrot.slane %v1005_v18, 1  ;;  %v2555_v38 = vadd.f32 %v2484_v21, %v2311_v33  ;;  %v2556_v19 = vadd.f32 %v2486_v54, %v2312_v48  ;;  %v1251_v3 = vmul.f32 %v4993_v46, %v6016_v17  ;;  %v6143_v35 = vpop.f32.mrb[19].mxu1  ;;  %v6164_v54 = vld [vmem:[#allocation2 + $0x188] sm:$0xff] }
 0x2cd   : > { %v1252_v44 = vmul.f32 %v4993_v46, %v6026_v26  ;;  %v1131_v25 = vrot.slane %v1006_v42, 1  ;;  %v1133_v47 = vrot.slane %v1007_v49, 1  ;;  %v1375_v56 = vrot.slane %v1250_v4, 2 }
 0x2ce   : > { %v1481_v8 = vmul.f32 %v5030_v27, %v6078_v55  ;;  %v2593_v1 = vadd.f32 %v5689_v15, %v2555_v38  ;;  %v2594_v39 = vadd.f32 %v5689_v15, %v2556_v19  ;;  %v1376_v2 = vrot.slane %v1251_v3, 2  ;;  %v6174_v3 = vld [vmem:[#allocation2 + $0x190] sm:$0x3] }
 0x2cf   : > { %v1378_v52 = vrot.slane %v1252_v44, 2  ;;  %v1132_v45 = vsel %vm1059_vm3, %v1130_v30, %v1131_v25  ;;  %v1134_v17 = vsel %vm1059_vm3, %v1131_v25, %v1133_v47  ;;  %v1482_v26 = vmul.f32 %v5030_v27, %v6093_v7 }
 0x2d0   : > { %v1563_v32 = vmul.f32 %v5032_v28, %v6078_v55  ;;  %v2612_v61 = vpack.c.bf16 %v2594_v39, %v2593_v1  ;;  %v1200_v43 = vadd.f32 %v1132_v45, %v923_v37  ;;  %v1201_v58 = vadd.f32 %v1134_v17, %v924_v5 }
 0x2d1   : > { %v1377_v18 = vsel %vm1304_vm4, %v1375_v56, %v1376_v2  ;;  %v1379_v15 = vsel %vm1304_vm4, %v1376_v2, %v1378_v52  ;;  %v1564_v33 = vmul.f32 %v5032_v28, %v6093_v7  ;;  %v1565_v48 = vmul.f32 %v5032_v28, %v6103_v10 }
 0x2d2   : > { %v1687_v21 = vrot.slane %v1563_v32, 1  ;;  %4223 = vmatmul.mubr.msk.bf16.gmra.mrb[40].mxu1 %vm354_vm0, %v2612_v61  ;;  %v1445_v42 = vadd.f32 %v1377_v18, %v1200_v43  ;;  %v1446_v49 = vadd.f32 %v1379_v15, %v1201_v58  ;;  %v1807_v37 = vmul.f32 %v5034_v29, %v6078_v55 }
 0x2d3   : > { %v1808_v5 = vmul.f32 %v5034_v29, %v6093_v7  ;;  %v1688_v30 = vrot.slane %v1564_v33, 1  ;;  %v1690_v4 = vrot.slane %v1565_v48, 1  ;;  %v1809_v38 = vmul.f32 %v5034_v29, %v6103_v10 }
 0x2d4   : > { %v2037_v19 = vmul.f32 %v5023_v22, %v6155_v62  ;;  %v1513_v44 = vadd.f32 %v1481_v8, %v1445_v42  ;;  %v1514_v25 = vadd.f32 %v1482_v26, %v1446_v49  ;;  %v1931_v47 = vrot.slane %v1807_v37, 2 }
 0x2d5   : > { %v1932_v56 = vrot.slane %v1808_v5, 2  ;;  %v1689_v1 = vsel %vm1059_vm3, %v1687_v21, %v1688_v30  ;;  %v1691_v39 = vsel %vm1059_vm3, %v1688_v30, %v1690_v4  ;;  %v1934_v2 = vrot.slane %v1809_v38, 2 }
 0x2d6   : > { %v2038_v52 = vmul.f32 %v5023_v22, %v6164_v54  ;;  %v1757_v45 = vadd.f32 %v1689_v1, %v1513_v44  ;;  %v1758_v17 = vadd.f32 %v1691_v39, %v1514_v25  ;;  %v2119_v61 = vmul.f32 %v5025_v23, %v6155_v62 }
 0x2d7   : > { %v1933_v32 = vsel %vm1304_vm4, %v1931_v47, %v1932_v56  ;;  %v1935_v8 = vsel %vm1304_vm4, %v1932_v56, %v1934_v2  ;;  %v2120_v26 = vmul.f32 %v5025_v23, %v6164_v54  ;;  %v2121_v43 = vmul.f32 %v5025_v23, %v6174_v3 }
 0x2d8   : > { %v2363_v58 = vmul.f32 %v5027_v24, %v6155_v62  ;;  %v2001_v18 = vadd.f32 %v1933_v32, %v1757_v45  ;;  %v2002_v15 = vadd.f32 %v1935_v8, %v1758_v17  ;;  %v2243_v33 = vrot.slane %v2119_v61, 1 }
 0x2d9   : > { %v2364_v48 = vmul.f32 %v5027_v24, %v6164_v54  ;;  %v2244_v21 = vrot.slane %v2120_v26, 1  ;;  %v2246_v42 = vrot.slane %v2121_v43, 1  ;;  %v2365_v49 = vmul.f32 %v5027_v24, %v6174_v3 }
 0x2da   : > { %v2487_v37 = vrot.slane %v2363_v58, 2  ;;  %v2069_v5 = vadd.f32 %v2037_v19, %v2001_v18  ;;  %v2070_v30 = vadd.f32 %v2038_v52, %v2002_v15  ;;  %v925_v38 = vmul.f32 %v5003_v51, %v6078_v55 }
 0x2db   : > { %v2488_v4 = vrot.slane %v2364_v48, 2  ;;  %v2245_v44 = vsel %vm1059_vm3, %v2243_v33, %v2244_v21  ;;  %v2247_v25 = vsel %vm1059_vm3, %v2244_v21, %v2246_v42  ;;  %v2490_v47 = vrot.slane %v2365_v49, 2  ;;  %v6217_v33 = vld [vmem:[%s7205_s4] ss:$0 sm:$0xff] }
 0x2dc   : > { %v926_v56 = vmul.f32 %v5003_v51, %v6093_v7  ;;  %v2313_v1 = vadd.f32 %v2245_v44, %v2069_v5  ;;  %v2314_v39 = vadd.f32 %v2247_v25, %v2070_v30  ;;  %v1008_v19 = vmul.f32 %v4991_v41, %v6078_v55 }
 0x2dd   : > { %v2489_v2 = vsel %vm1304_vm4, %v2487_v37, %v2488_v4  ;;  %v2491_v52 = vsel %vm1304_vm4, %v2488_v4, %v2490_v47  ;;  %v1009_v45 = vmul.f32 %v4991_v41, %v6093_v7  ;;  %v1010_v17 = vmul.f32 %v4991_v41, %v6103_v10 }
 0x2de   : > { %v1253_v32 = vmul.f32 %v4993_v46, %v6078_v55  ;;  %v2557_v61 = vadd.f32 %v2489_v2, %v2313_v1  ;;  %v2558_v51 = vadd.f32 %v2491_v52, %v2314_v39  ;;  %v1135_v8 = vrot.slane %v1008_v19, 1  ;;  %v888_v39 = vld [vmem:[#allocation2 + $0x198] sm:$0xff]  ;;  %v889_v19 = vld [vmem:[#allocation2 + $0x1a0] sm:$0xff] }
 0x2df   : > { %v1254_v26 = vmul.f32 %v4993_v46, %v6093_v7  ;;  %v1136_v43 = vrot.slane %v1009_v45, 1  ;;  %v1138_v58 = vrot.slane %v1010_v17, 1  ;;  %v1255_v18 = vmul.f32 %v4993_v46, %v6103_v10  ;;  %v6223_v7 = vpop.f32.mrb[32].mxu0 }
 0x2e0   : > { %v1380_v15 = vrot.slane %v1253_v32, 2  ;;  %v2595_v41 = vadd.f32 %v6217_v33, %v2557_v61  ;;  %v2596_v55 = vadd.f32 %v6217_v33, %v2558_v51  ;;  %v1483_v21 = vmul.f32 %v5030_v27, %v6155_v62  ;;  %v890_v61 = vld [vmem:[#allocation2 + $0x1a8] sm:$0x3] }
 0x2e1   : > { %v1381_v48 = vrot.slane %v1254_v26, 2  ;;  %v1137_v42 = vsel %vm1059_vm3, %v1135_v8, %v1136_v43  ;;  %v1139_v46 = vsel %vm1059_vm3, %v1136_v43, %v1138_v58  ;;  %v1383_v10 = vrot.slane %v1255_v18, 2 }
 0x2e2   : > { %v1484_v49 = vmul.f32 %v5030_v27, %v6164_v54  ;;  %v2613_v37 = vpack.c.bf16 %v2596_v55, %v2595_v41  ;;  %v1202_v5 = vadd.f32 %v1137_v42, %v925_v38  ;;  %v1203_v30 = vadd.f32 %v1139_v46, %v926_v56 }
 0x2e3   : > { %v1382_v4 = vsel %vm1304_vm4, %v1380_v15, %v1381_v48  ;;  %v1384_v44 = vsel %vm1304_vm4, %v1381_v48, %v1383_v10  ;;  %v1566_v25 = vmul.f32 %v5032_v28, %v6155_v62  ;;  %v1567_v47 = vmul.f32 %v5032_v28, %v6164_v54 }
 0x2e4   : > { %v1568_v1 = vmul.f32 %v5032_v28, %v6174_v3  ;;  %4226 = vmatprep.mubr.msk.bf16.mxu1 %vm354_vm0, %v2613_v37  ;;  %v1447_v27 = vadd.f32 %v1382_v4, %v1202_v5  ;;  %v1448_v2 = vadd.f32 %v1384_v44, %v1203_v30  ;;  %v1810_v38 = vmul.f32 %v5034_v29, %v6155_v62 }
 0x2e5   : > { %v1811_v56 = vmul.f32 %v5034_v29, %v6164_v54  ;;  %v1692_v52 = vrot.slane %v1566_v25, 1  ;;  %v1693_v45 = vrot.slane %v1567_v47, 1  ;;  %v1812_v32 = vmul.f32 %v5034_v29, %v6174_v3  ;;  %v6247_v54 = vpop.f32.mrb[33].mxu0 }
 0x2e6   : > { %v1695_v17 = vrot.slane %v1568_v1, 1  ;;  %v1515_v28 = vadd.f32 %v1483_v21, %v1447_v27  ;;  %v1516_v51 = vadd.f32 %v1484_v49, %v1448_v2  ;;  %v1936_v8 = vrot.slane %v1810_v38, 2  ;;  %v6255_v46 = vpop.f32.mrb[34].mxu0 }
 0x2e7   : > { %v1937_v26 = vrot.slane %v1811_v56, 2  ;;  %v1694_v43 = vsel %vm1059_vm3, %v1692_v52, %v1693_v45  ;;  %v1939_v62 = vrot.slane %v1812_v32, 2  ;;  %v2039_v18 = vmul.f32 %v5023_v22, %v888_v39  ;;  %v6264_v30 = vpop.f32.mrb[35].mxu0 }
 0x2e8   : > { %v1696_v58 = vsel %vm1059_vm3, %v1693_v45, %v1695_v17  ;;  %v1759_v15 = vadd.f32 %v1694_v43, %v1515_v28  ;;  %v2040_v29 = vmul.f32 %v5023_v22, %v889_v19  ;;  %v2122_v48 = vmul.f32 %v5025_v23, %v888_v39  ;;  %v6262_v22 = vld [vmem:[%s7207_s6] ss:$0 sm:$0xff] }
 0x2e9   : > { %v1760_v41 = vadd.f32 %v1696_v58, %v1516_v51  ;;  %v1938_v55 = vsel %vm1304_vm4, %v1936_v8, %v1937_v26  ;;  %v1940_v3 = vsel %vm1304_vm4, %v1937_v26, %v1939_v62  ;;  %v2123_v21 = vmul.f32 %v5025_v23, %v889_v19 }
 0x2ea   : > { %v2124_v42 = vmul.f32 %v5025_v23, %v890_v61  ;;  %v2003_v10 = vadd.f32 %v1938_v55, %v1759_v15  ;;  %v2366_v37 = vmul.f32 %v5027_v24, %v888_v39  ;;  %v2367_v5 = vmul.f32 %v5027_v24, %v889_v19 }
 0x2eb   : > { %v2004_v49 = vadd.f32 %v1940_v3, %v1760_v41  ;;  %v2248_v4 = vrot.slane %v2122_v48, 1  ;;  %v2249_v44 = vrot.slane %v2123_v21, 1  ;;  %v2368_v23 = vmul.f32 %v5027_v24, %v890_v61 }
 0x2ec   : > { %v2251_v25 = vrot.slane %v2124_v42, 1  ;;  %v2071_v47 = vadd.f32 %v2039_v18, %v2003_v10  ;;  %v2492_v27 = vrot.slane %v2366_v37, 2  ;;  %v2493_v2 = vrot.slane %v2367_v5, 2 }
 0x2ed   : > { %v2072_v1 = vadd.f32 %v2040_v29, %v2004_v49  ;;  %v2250_v39 = vsel %vm1059_vm3, %v2248_v4, %v2249_v44  ;;  %v2495_v56 = vrot.slane %v2368_v23, 2  ;;  %v2721_v19 = vadd.f32 %v6125_v57, %v6262_v22 }
 0x2ee   : > { %v2252_v38 = vsel %vm1059_vm3, %v2249_v44, %v2251_v25  ;;  %v2315_v52 = vadd.f32 %v2250_v39, %v2071_v47  ;;  %v2494_v17 = vsel %vm1304_vm4, %v2492_v27, %v2493_v2  ;;  %v2713_v32 = vadd.f32 %v6262_v22, %v6129_v60 }
 0x2ef   : > { %v2316_v45 = vadd.f32 %v2252_v38, %v2072_v1  ;;  %v2496_v24 = vsel %vm1304_vm4, %v2493_v2, %v2495_v56  ;;  %v2841_v61 = vmax.f32 %v2721_v19, 0.0  ;;  %v2724_v28 = vadd.f32 %v6137_v63, %v6262_v22  ;;  %v4204_v51 = vpop.f32.mrb[20].mxu1 }
 0x2f0   : > { %v2559_v8 = vadd.f32 %v2494_v17, %v2315_v52  ;;  %v2839_v43 = vmax.f32 %v2713_v32, 0.0  ;;  %v2716_v57 = vadd.f32 %v6262_v22, %v6143_v35  ;;  %v2728_v58 = vpop.f32.mrb[21].mxu1  ;;  %v2737_v60 = vadd.f32 %v4204_v51, %v6262_v22 }
 0x2f1   : > { %v2560_v26 = vadd.f32 %v2496_v24, %v2316_v45  ;;  %v2970_v62 = vadd.f32 %v5776_v9, %v2841_v61  ;;  %v2842_v18 = vmax.f32 %v2724_v28, 0.0  ;;  %v2729_v15 = vadd.f32 %v6262_v22, %v2728_v58  ;;  %v4205_v41 = vpop.f32.mrb[22].mxu1  ;;  %v6322_v61 = vpop.f32.mrb[36].mxu0 }
 0x2f2   : > { %v2597_v55 = vadd.f32 %v6217_v33, %v2559_v8  ;;  %v2962_v29 = vadd.f32 %v5787_v59, %v2839_v43  ;;  %v2840_v3 = vmax.f32 %v2716_v57, 0.0  ;;  %v2731_v48 = vpop.f32.mrb[23].mxu1  ;;  %v2845_v42 = vmax.f32 %v2737_v60, 0.0 }
 0x2f3   : > { %v2598_v63 = vadd.f32 %v6217_v33, %v2560_v26  ;;  %v4079_v21 = vpack.c.bf16 %v2970_v62, %v2970_v62  ;;  %v2973_v35 = vadd.f32 %v5793_v31, %v2842_v18  ;;  %v2843_v10 = vmax.f32 %v2729_v15, 0.0  ;;  %v6329_v26 = vpop.f32.mrb[37].mxu0 }
 0x2f4   : > { %v4078_v49 = vpack.c.bf16 %v2962_v29, %v2962_v29  ;;  %v2965_v37 = vadd.f32 %v5801_v36, %v2840_v3  ;;  %v2740_v5 = vadd.f32 %v4205_v41, %v6262_v22  ;;  %v2986_v33 = vadd.f32 %v5807_v50, %v2845_v42  ;;  %v6331_v43 = vpop.f32.mrb[38].mxu0 }
 0x2f5   : > { %v2614_v9 = vpack.c.bf16 %v2598_v63, %v2597_v55  ;;  %v6288_v4 = vunpack.c.l.b16 %v4079_v21  ;;  %v4095_v44 = vpack.c.bf16 %v2973_v35, %v2973_v35  ;;  %v2978_v59 = vadd.f32 %v5815_v13, %v2843_v10  ;;  %v6333_v57 = vpop.f32.mrb[39].mxu0 }
 0x2f6   : > { %v6293_v25 = vunpack.c.l.b16 %v4078_v49  ;;  %v4094_v31 = vpack.c.bf16 %v2965_v37, %v2965_v37  ;;  %v2846_v23 = vmax.f32 %v2740_v5, 0.0  ;;  %v2732_v47 = vadd.f32 %v6262_v22, %v2731_v48 }
 0x2f7   : > { %4227 = vmatmul.mubr.msk.bf16.gmra.mrb[44].mxu1 %vm354_vm0, %v2614_v9  ;;  %v3168_v1 = vrot.slane %v6288_v4, 7  ;;  %v6297_v36 = vunpack.c.l.b16 %v4095_v44  ;;  %v4080_v19 = vpack.c.bf16 %v2978_v59, %v2978_v59  ;;  %v4081_v52 = vpack.c.bf16 %v2986_v33, %v2986_v33 }
 0x2f8   : > { %v6299_v27 = vunpack.c.l.b16 %v4094_v31  ;;  %v2844_v2 = vmax.f32 %v2732_v47, 0.0  ;;  %v6307_v39 = vadd.f32 %v5821_v16, %v2846_v23  ;;  %v3399_v32 = vrot.slane %v6293_v25, 6 }
 0x2f9   : > { %v6303_v50 = vsel %vm3169_vm5, %v3168_v1, %v6293_v25  ;;  %v3555_v13 = vrot.slane %v6297_v36, 7  ;;  %v6316_v45 = vunpack.c.l.b16 %v4080_v19  ;;  %v6318_v17 = vunpack.c.l.b16 %v4081_v52 }
 0x2fa   : > { %v6310_v38 = vadd.f32 %v5831_v40, %v2844_v2  ;;  %v3400_v24 = vrot.slane %v6288_v4, 5  ;;  %v3210_v58 = vrot.slane %v6293_v25, 1 }
 0x2fb   : > { %v6314_v56 = vsel %vm3169_vm5, %v3555_v13, %v6299_v27  ;;  %v3402_v16 = vrot.slane %v6316_v45, 4  ;;  %v3404_v28 = vrot.slane %v6318_v17, 3  ;;  %v3212_v62 = vrot.slane %v6316_v45, 7 }
 0x2fc   : > { %v3401_v40 = vsel %vm3169_vm5, %v3400_v24, %v3399_v32  ;;  %v3211_v18 = vsel %vm3169_vm5, %v6288_v4, %v3210_v58  ;;  %v3214_v60 = vrot.slane %v6318_v17, 6  ;;  %v4096_v52 = vpack.c.bf16 %v6310_v38, %v6310_v38 }
 0x2fd   : > { %v3403_v51 = vsel %vm3172_vm6, %v3402_v16, %v3401_v40  ;;  %v3213_v15 = vsel %vm3172_vm6, %v3212_v62, %v3211_v18 }
 0x2fe   : > { %v3405_v8 = vsel %vm3175_vm7, %v3404_v28, %v3403_v51  ;;  %v3215_v41 = vsel %vm3175_vm7, %v3214_v60, %v3213_v15  ;;  %v6381_v18 = vunpack.c.l.b16 %v4096_v52 }
 0x300   : > { %v3591_v51 = vrot.slane %v6381_v18, 7 }
 0x313   : > { %v4208_v55 = vpop.f32.mrb[24].mxu1 }
 0x314   : > { %v2753_v63 = vadd.f32 %v4208_v55, %v6262_v22  ;;  %v2744_v29 = vpop.f32.mrb[25].mxu1  ;;  %v3250_v55 = vrot.slane %v6288_v4, 1 }
 0x315   : > { %v2745_v3 = vadd.f32 %v6262_v22, %v2744_v29  ;;  %v4209_v48 = vpop.f32.mrb[26].mxu1  ;;  %v3438_v29 = vrot.slane %v6288_v4, 6 }
 0x316   : > { %v2849_v21 = vmax.f32 %v2753_v63, 0.0  ;;  %v2756_v35 = vadd.f32 %v4209_v48, %v6262_v22  ;;  %v2747_v42 = vpop.f32.mrb[27].mxu1  ;;  %v3289_v63 = vrot.slane %v6288_v4, 2  ;;  %v3364_v48 = vrot.slane %v6316_v45, 3 }
 0x317   : > { %v2847_v10 = vmax.f32 %v2745_v3, 0.0  ;;  %v2748_v9 = vadd.f32 %v6262_v22, %v2747_v42  ;;  %v3361_v3 = vrot.slane %v6293_v25, 5  ;;  %v6395_v42 = vpop.f32.mrb[40].mxu0 }
 0x318   : > { %v3002_v49 = vadd.f32 %v5918_v53, %v2849_v21  ;;  %v2850_v37 = vmax.f32 %v2756_v35, 0.0  ;;  %v3366_v21 = vrot.slane %v6318_v17, 2 }
 0x319   : > { %v2994_v5 = vadd.f32 %v5939_v6, %v2847_v10  ;;  %v2848_v44 = vmax.f32 %v2748_v9, 0.0  ;;  %v3249_v10 = vrot.slane %v6293_v25, 2  ;;  %v3776_v9 = vrot.slane %v6297_v36, 5 }
 0x31a   : > { %v4083_v33 = vpack.c.bf16 %v3002_v49, %v3002_v49  ;;  %v3005_v59 = vadd.f32 %v5943_v14, %v2850_v37  ;;  %v4097_v14 = vpack.c.bf16 %v6307_v39, %v6307_v39  ;;  %v3288_v49 = vrot.slane %v6293_v25, 3 }
 0x31b   : > { %v4082_v31 = vpack.c.bf16 %v2994_v5, %v2994_v5  ;;  %v6350_v23 = vadd.f32 %v5951_v11, %v2848_v44  ;;  %v3437_v37 = vrot.slane %v6293_v25, 7  ;;  %v3775_v44 = vrot.slane %v6299_v27, 6 }
 0x31c   : > { %v6352_v47 = vunpack.c.l.b16 %v4083_v33  ;;  %v4099_v32 = vpack.c.bf16 %v3005_v59, %v3005_v59  ;;  %v6379_v62 = vunpack.c.l.b16 %v4097_v14  ;;  %v3589_v33 = vrot.slane %v6299_v27, 1 }
 0x31d   : > { %v6354_v1 = vunpack.c.l.b16 %v4082_v31  ;;  %v4098_v15 = vpack.c.bf16 %v6350_v23, %v6350_v23  ;;  %v3737_v59 = vrot.slane %v6299_v27, 5  ;;  %v3777_v14 = vsel %vm3169_vm5, %v3776_v9, %v3775_v44 }
 0x31e   : > { %v3408_v53 = vrot.slane %v6352_v47, 1  ;;  %v3218_v6 = vrot.slane %v6352_v47, 4  ;;  %v6383_v60 = vunpack.c.l.b16 %v4099_v32  ;;  %v3627_v32 = vrot.slane %v6299_v27, 2 }
 0x31f   : > { %v3406_v2 = vrot.slane %v6354_v1, 2  ;;  %v3216_v13 = vrot.slane %v6354_v1, 5  ;;  %v3368_v35 = vrot.slane %v6354_v1, 1  ;;  %v3442_v9 = vrot.slane %v6318_v17, 4 }
 0x321   : > { %v3407_v11 = vsel %vm3178_vm8, %v3406_v2, %v3405_v8  ;;  %v3217_v19 = vsel %vm3178_vm8, %v3216_v13, %v3215_v41  ;;  %v3362_v41 = vrot.slane %v6288_v4, 4  ;;  %v3251_v2 = vsel %vm3169_vm5, %v3250_v55, %v3249_v10 }
 0x322   : > { %v6367_v24 = vsel %vm3181_vm9, %v3408_v53, %v3407_v11  ;;  %v6370_v16 = vsel %vm3181_vm9, %v3218_v6, %v3217_v19  ;;  %v3290_v13 = vsel %vm3169_vm5, %v3289_v63, %v3288_v49  ;;  %v3439_v53 = vsel %vm3169_vm5, %v3438_v29, %v3437_v37  ;;  %v6422_v29 = vpop.f32.mrb[41].mxu0 }
 0x323   : > { %v3363_v5 = vsel %vm3169_vm5, %v3362_v41, %v3361_v3  ;;  %v3590_v11 = vsel %vm3169_vm5, %v6297_v36, %v3589_v33  ;;  %v3738_v19 = vrot.slane %v6297_v36, 4  ;;  %v3628_v41 = vrot.slane %v6297_v36, 1  ;;  %7227 = vst [vmem:[#allocation13_spill] sm:$0xff] %v6422_v29  ;;  %v6427_v10 = vpop.f32.mrb[42].mxu0 }
 0x324   : > { %v3365_v31 = vsel %vm3172_vm6, %v3364_v48, %v3363_v5  ;;  %v3665_v55 = vrot.slane %v6299_v27, 3  ;;  %v3666_v48 = vrot.slane %v6297_v36, 2  ;;  %7228 = vst [vmem:[#allocation14_spill] sm:$0xff] %v6427_v10  ;;  %v3814_v37 = vrot.slane %v6297_v36, 6  ;;  %v6433_v5 = vpop.f32.mrb[43].mxu0 }
 0x325   : > { %v3367_v6 = vsel %vm3175_vm7, %v3366_v21, %v3365_v31  ;;  %v3739_v3 = vsel %vm3169_vm5, %v3738_v19, %v3737_v59  ;;  %v3813_v21 = vrot.slane %v6299_v27, 7  ;;  %v3629_v49 = vsel %vm3169_vm5, %v3628_v41, %v3627_v32  ;;  %7229 = vst [vmem:[#allocation15_spill] sm:$0xff] %v6433_v5 }
 0x326   : > { %v3369_v52 = vsel %vm3178_vm8, %v3368_v35, %v3367_v6  ;;  %v3253_v35 = vrot.slane %v6318_v17, 7  ;;  %v3252_v44 = vsel %vm3172_vm6, %v6316_v45, %v3251_v2  ;;  %v3291_v33 = vrot.slane %v6316_v45, 1 }
 0x327   : > { %v6420_v63 = vsel %vm3181_vm9, %v6352_v47, %v3369_v52  ;;  %v3440_v59 = vrot.slane %v6316_v45, 5  ;;  %v6440_v31 = vsel %vm3169_vm5, %v3666_v48, %v3665_v55  ;;  %v3255_v19 = vrot.slane %v6354_v1, 6 }
 0x328   : > { %v3254_v6 = vsel %vm3175_vm7, %v3253_v35, %v3252_v44  ;;  %v3257_v52 = vrot.slane %v6352_v47, 5  ;;  %v3780_v32 = vrot.slane %v6379_v62, 3  ;;  %v3778_v41 = vrot.slane %v6381_v18, 4 }
 0x329   : > { %v3292_v39 = vsel %vm3172_vm6, %v3291_v33, %v3290_v13  ;;  %v3441_v2 = vsel %vm3172_vm6, %v3440_v59, %v3439_v53  ;;  %v3256_v58 = vsel %vm3178_vm8, %v3255_v19, %v3254_v6  ;;  %v3593_v35 = vrot.slane %v6379_v62, 6 }
 0x32a   : > { %v3293_v55 = vsel %vm3175_vm7, %v6318_v17, %v3292_v39  ;;  %v3443_v48 = vsel %vm3175_vm7, %v3442_v9, %v3441_v2  ;;  %v6456_v44 = vsel %vm3181_vm9, %v3257_v52, %v3256_v58  ;;  %v3779_v8 = vsel %vm3172_vm6, %v3778_v41, %v3777_v14 }
 0x32b   : > { %v3592_v13 = vsel %vm3172_vm6, %v3591_v51, %v3590_v11  ;;  %v3740_v53 = vrot.slane %v6381_v18, 3  ;;  %v3781_v33 = vsel %vm3175_vm7, %v3780_v32, %v3779_v8  ;;  %v3742_v6 = vrot.slane %v6379_v62, 2 }
 0x32c   : > { %v3594_v59 = vsel %vm3175_vm7, %v3593_v35, %v3592_v13  ;;  %v3630_v39 = vsel %vm3172_vm6, %v6381_v18, %v3629_v49  ;;  %v6469_v58 = vunpack.c.l.b16 %v4098_v15  ;;  %v3631_v51 = vrot.slane %v6379_v62, 7 }
 0x32d   : > { %v3741_v14 = vsel %vm3172_vm6, %v3740_v53, %v3739_v3  ;;  %v6474_v11 = vsel %vm3169_vm5, %v3814_v37, %v3813_v21  ;;  %v3296_v19 = vrot.slane %v6352_v47, 6  ;;  %v3668_v49 = vrot.slane %v6381_v18, 1 }
 0x32e   : > { %v3743_v52 = vsel %vm3175_vm7, %v3742_v6, %v3741_v14  ;;  %v3294_v3 = vrot.slane %v6354_v1, 7  ;;  %v3444_v32 = vrot.slane %v6354_v1, 3  ;;  %v3632_v21 = vsel %vm3175_vm7, %v3631_v51, %v3630_v39 }
 0x32f   : > { %v3784_v2 = vrot.slane %v6383_v60, 1  ;;  %v3446_v35 = vrot.slane %v6352_v47, 2  ;;  %v3597_v13 = vrot.slane %v6383_v60, 4 }
 0x330   : > { %v3295_v8 = vsel %vm3178_vm8, %v3294_v3, %v3293_v55  ;;  %v3595_v55 = vrot.slane %v6469_v58, 5 }
 0x331   : > { %v3297_v51 = vsel %vm3181_vm9, %v3296_v19, %v3295_v8  ;;  %v3744_v8 = vrot.slane %v6469_v58, 1 }
 0x338   : > { %v4212_v9 = vpop.f32.mrb[28].mxu1 }
 0x339   : > { %v2769_v23 = vadd.f32 %v4212_v9, %v6262_v22  ;;  %v2760_v15 = vpop.f32.mrb[29].mxu1  ;;  %v3782_v9 = vrot.slane %v6469_v58, 2 }
 0x33a   : > { %v2761_v37 = vadd.f32 %v6262_v22, %v2760_v15  ;;  %v4213_v41 = vpop.f32.mrb[30].mxu1  ;;  %v3445_v15 = vsel %vm3178_vm8, %v3444_v32, %v3443_v48  ;;  %v3633_v48 = vrot.slane %v6469_v58, 6 }
 0x33b   : > { %v2853_v53 = vmax.f32 %v2769_v23, 0.0  ;;  %v2772_v6 = vadd.f32 %v4213_v41, %v6262_v22  ;;  %v2763_v14 = vpop.f32.mrb[31].mxu1  ;;  %v3783_v5 = vsel %vm3178_vm8, %v3782_v9, %v3781_v33  ;;  %v3447_v23 = vsel %vm3181_vm9, %v3446_v35, %v3445_v15 }
 0x33c   : > { %v2851_v40 = vmax.f32 %v2761_v37, 0.0  ;;  %v2764_v39 = vadd.f32 %v6262_v22, %v2763_v14  ;;  %v3785_v29 = vsel %vm3181_vm9, %v3784_v2, %v3783_v5  ;;  %v3596_v33 = vsel %vm3178_vm8, %v3595_v55, %v3594_v59 }
 0x33d   : > { %v3018_v28 = vadd.f32 %v6063_v34, %v2853_v53  ;;  %v2854_v38 = vmax.f32 %v2772_v6, 0.0 }
 0x33e   : > { %v3010_v41 = vadd.f32 %v6087_v0, %v2851_v40  ;;  %v2852_v10 = vmax.f32 %v2764_v39, 0.0  ;;  %v6507_v0 = vsel %vm3172_vm6, %v3668_v49, %v6440_v31 }
 0x33f   : > { %v4085_v3 = vpack.c.bf16 %v3018_v28, %v3018_v28  ;;  %v3021_v37 = vadd.f32 %v6091_v12, %v2854_v38  ;;  %v3598_v28 = vsel %vm3181_vm9, %v3597_v13, %v3596_v33  ;;  %v3745_v12 = vsel %vm3178_vm8, %v3744_v8, %v3743_v52 }
 0x340   : > { %v4084_v34 = vpack.c.bf16 %v3010_v41, %v3010_v41  ;;  %v3013_v19 = vadd.f32 %v6095_v20, %v2852_v10  ;;  %v3746_v2 = vsel %vm3181_vm9, %v6383_v60, %v3745_v12  ;;  %v3634_v20 = vsel %vm3178_vm8, %v3633_v48, %v3632_v21 }
 0x341   : > { %v6509_v40 = vunpack.c.l.b16 %v4085_v3  ;;  %v4101_v5 = vpack.c.bf16 %v3021_v37, %v3021_v37  ;;  %v3559_v48 = vrot.slane %v6379_v62, 5 }
 0x342   : > { %v6513_v38 = vunpack.c.l.b16 %v4084_v34  ;;  %v4100_v32 = vpack.c.bf16 %v3013_v19, %v3013_v19 }
 0x343   : > { %v6518_v10 = vunpack.c.l.b16 %v4101_v5  ;;  %v3411_v31 = vrot.slane %v6509_v40, 7  ;;  %v3222_v59 = vrot.slane %v6509_v40, 2  ;;  %v3373_v49 = vrot.slane %v6509_v40, 6 }
 0x344   : > { %v6523_v35 = vunpack.c.l.b16 %v4100_v32  ;;  %v3410_v52 = vsel %vm3184_vm10, %v6513_v38, %v6367_v24  ;;  %v3220_v13 = vrot.slane %v6513_v38, 3  ;;  %v3371_v53 = vrot.slane %v6513_v38, 7 }
 0x345   : > { %v3412_v21 = vsel %vm3187_vm11, %v3411_v31, %v3410_v52  ;;  %v3259_v6 = vrot.slane %v6513_v38, 4  ;;  %v3261_v14 = vrot.slane %v6509_v40, 3  ;;  %v3787_v9 = vrot.slane %v6518_v10, 7 }
 0x346   : > { %v3427_v39 = vpack.c.b16 %v3412_v21, %v3412_v21  ;;  %v3221_v15 = vsel %vm3184_vm10, %v3220_v13, %v6370_v16  ;;  %v3372_v41 = vsel %vm3184_vm10, %v3371_v53, %v6420_v63  ;;  %v3786_v24 = vsel %vm3184_vm10, %v6523_v35, %v3785_v29 }
 0x347   : > { %v3223_v55 = vsel %vm3187_vm11, %v3222_v59, %v3221_v15  ;;  %v3374_v3 = vsel %vm3187_vm11, %v3373_v49, %v3372_v41  ;;  %v3260_v37 = vsel %vm3184_vm10, %v3259_v6, %v6456_v44  ;;  %v6545_v8 = vsel %vm3187_vm11, %v3787_v9, %v3786_v24  ;;  %v6582_v41 = vpop.f32.mrb[44].mxu0 }
 0x348   : > { %3429 = vrot.lane.b32.xlu0 %v3427_v39, %s4529_s17  ;;  %v3262_v16 = vsel %vm3187_vm11, %v3261_v14, %v3260_v37  ;;  %v3635_v63 = vrot.slane %v6383_v60, 5  ;;  %v3816_v29 = vrot.slane %v6381_v18, 5  ;;  %v3238_v34 = vpack.c.b16 %v3223_v55, %v3223_v55 }
 0x349   : > { %v3298_v19 = vrot.slane %v6513_v38, 5  ;;  %v3300_v33 = vrot.slane %v6509_v40, 4  ;;  %v3448_v44 = vrot.slane %v6513_v38, 1  ;;  %v3599_v5 = vrot.slane %v6523_v35, 3 }
 0x34a   : > { %v3601_v12 = vrot.slane %v6518_v10, 2  ;;  %v3747_v32 = vrot.slane %v6523_v35, 7  ;;  %v3749_v31 = vrot.slane %v6518_v10, 6  ;;  %v3636_v52 = vsel %vm3181_vm9, %v3635_v63, %v3634_v20 }
 0x34b   : > { %v3299_v59 = vsel %vm3184_vm10, %v3298_v19, %v3297_v51  ;;  %v3449_v49 = vsel %vm3184_vm10, %v3448_v44, %v3447_v23  ;;  %v3637_v13 = vrot.slane %v6523_v35, 4  ;;  %v3600_v6 = vsel %vm3184_vm10, %v3599_v5, %v3598_v28 }
 0x34c   : > { %3240 = vrot.lane.b32.xlu0 %v3238_v34, %s4530_s21  ;;  %v6565_v53 = vsel %vm3187_vm11, %v3300_v33, %v3299_v59  ;;  %v6569_v21 = vsel %vm3187_vm11, %v6509_v40, %v3449_v49  ;;  %v3748_v51 = vsel %vm3184_vm10, %v3747_v32, %v3746_v2  ;;  %v3708_v23 = vrot.slane %v6379_v62, 1  ;;  %v6608_v49 = vpop.f32.mrb[45].mxu0 }
 0x34d   : > { %v3557_v20 = vrot.slane %v6381_v18, 6  ;;  %v6576_v14 = vsel %vm3187_vm11, %v3601_v12, %v3600_v6  ;;  %v6579_v9 = vsel %vm3187_vm11, %v3749_v31, %v3748_v51  ;;  %v3706_v39 = vrot.slane %v6381_v18, 2 }
 0x34e   : > { %v3389_v15 = vpack.c.b16 %v3374_v3, %v3374_v3  ;;  %v3638_v24 = vsel %vm3184_vm10, %v3637_v13, %v3636_v52  ;;  %v3639_v28 = vrot.slane %v6518_v10, 3  ;;  %v3803_v2 = vpack.c.b16 %v6545_v8, %v6545_v8  ;;  %v6616_v13 = vpop.f32.mrb[46].mxu0 }
 0x34f   : > { %v3670_v55 = vsel %vm3175_vm7, %v6379_v62, %v6507_v0  ;;  %v3671_v37 = vrot.slane %v6469_v58, 7  ;;  %v3675_v63 = vrot.slane %v6523_v35, 5  ;;  %v3673_v34 = vrot.slane %v6383_v60, 6 }
 0x350   : > { %3391 = vrot.lane.b32.xlu0 %v3389_v15, %s4530_s21  ;;  %v6595_v3 = vsel %vm3187_vm11, %v3639_v28, %v3638_v24  ;;  %v3817_v19 = vsel %vm3172_vm6, %v3816_v29, %v6474_v11  ;;  %v3818_v8 = vrot.slane %v6379_v62, 4  ;;  %v3277_v33 = vpack.c.b16 %v3262_v16, %v3262_v16  ;;  %v6624_v24 = vpop.f32.mrb[47].mxu0 }
 0x351   : > { %v3672_v44 = vsel %vm3178_vm8, %v3671_v37, %v3670_v55  ;;  %v3677_v0 = vrot.slane %v6518_v10, 4  ;;  %v3820_v5 = vrot.slane %v6469_v58, 3  ;;  %v3822_v31 = vrot.slane %v6383_v60, 2 }
 0x352   : > { %v3674_v12 = vsel %vm3181_vm9, %v3673_v34, %v3672_v44  ;;  %v3819_v32 = vsel %vm3175_vm7, %v3818_v8, %v3817_v19  ;;  %v3824_v59 = vrot.slane %v6523_v35, 1  ;;  %v3316_v11 = vpack.c.b16 %v6565_v53, %v6565_v53 }
 0x353   : > { %v3676_v16 = vsel %vm3184_vm10, %v3675_v63, %v3674_v12  ;;  %v3821_v29 = vsel %vm3178_vm8, %v3820_v5, %v3819_v32  ;;  %v3177_v52 = vrot.slane %v6354_v1, 4  ;;  %v3180_v15 = vrot.slane %v6352_v47, 3 }
 0x354   : > { %3279 = vrot.lane.b32.xlu0 %v3277_v33, %s4529_s17  ;;  %v6619_v6 = vsel %vm3187_vm11, %v3677_v0, %v3676_v16  ;;  %v3823_v51 = vsel %vm3181_vm9, %v3822_v31, %v3821_v29  ;;  %v3183_v53 = vrot.slane %v6513_v38, 2  ;;  %v3186_v55 = vrot.slane %v6509_v40, 1 }
 0x355   : > { %v3825_v28 = vsel %vm3184_vm10, %v3824_v59, %v3823_v51  ;;  %v7230_v37 = vrot.slane %v6316_v45, 6  ;;  %v7231_v34 = vrot.slane %v6293_v25, 4  ;;  %v7232_v19 = vrot.slane %v6288_v4, 3 }
 0x356   : > { %v6639_v33 = vsel %vm3187_vm11, %v6518_v10, %v3825_v28  ;;  %v7233_v44 = vrot.slane %v6318_v17, 5  ;;  %v7234_v5 = vrot.slane %v6316_v45, 2  ;;  %v7235_v25 = vrot.slane %v6318_v17, 1 }
 0x357   : > { %v3173_v63 = vsel %vm3172_vm6, %v7230_v37, %v6303_v50  ;;  %v3329_v8 = vsel %vm3169_vm5, %v7232_v19, %v7231_v34  ;;  %v3335_v50 = vrot.slane %v6352_v47, 7  ;;  %v3337_v31 = vrot.slane %v6513_v38, 6 }
 0x358   : > { %v3176_v0 = vsel %vm3175_vm7, %v7233_v44, %v3173_v63  ;;  %v3331_v12 = vsel %vm3172_vm6, %v7234_v5, %v3329_v8  ;;  %3805 = vrot.lane.b32.xlu0 %v3803_v2, %s4529_s17  ;;  %v3339_v16 = vrot.slane %v6509_v40, 5  ;;  %v3558_v47 = vsel %vm3172_vm6, %v3557_v20, %v6314_v56 }
 0x359   : > { %v3179_v4 = vsel %vm3178_vm8, %v3177_v52, %v3176_v0  ;;  %v3333_v32 = vsel %vm3175_vm7, %v7235_v25, %v3331_v12  ;;  %v3560_v38 = vsel %vm3175_vm7, %v3559_v48, %v3558_v47  ;;  %v3561_v2 = vrot.slane %v6469_v58, 4 }
 0x35a   : > { %v3182_v59 = vsel %vm3181_vm9, %v3180_v15, %v3179_v4  ;;  %v3334_v45 = vsel %vm3178_vm8, %v6354_v1, %v3333_v32  ;;  %v3563_v1 = vrot.slane %v6383_v60, 3  ;;  %v3565_v40 = vrot.slane %v6523_v35, 2 }
 0x35b   : > { %v3185_v29 = vsel %vm3184_vm10, %v3183_v53, %v3182_v59  ;;  %v3336_v17 = vsel %vm3181_vm9, %v3335_v50, %v3334_v45  ;;  %v3562_v20 = vsel %vm3178_vm8, %v3561_v2, %v3560_v38  ;;  %v3567_v53 = vrot.slane %v6518_v10, 1 }
 0x35c   : > { %v3188_v52 = vsel %vm3187_vm11, %v3186_v55, %v3185_v29  ;;  %v3338_v51 = vsel %vm3184_vm10, %v3337_v31, %v3336_v17  ;;  %3318 = vrot.lane.b32.xlu0 %v3316_v11, %s4531_s15  ;;  %v3564_v28 = vsel %vm3181_vm9, %v3563_v1, %v3562_v20  ;;  %v7236_v55 = vrot.slane %v6299_v27, 4  ;;  %v4216_v19 = vpop.f32.mrb[32].mxu1 }
 0x35d   : > { %v3203_v15 = vpack.c.b16 %v3188_v52, %v3188_v52  ;;  %v3340_v56 = vsel %vm3187_vm11, %v3339_v16, %v3338_v51  ;;  %v7237_v37 = vrot.slane %v6297_v36, 3  ;;  %v3711_v34 = vrot.slane %v6383_v60, 7  ;;  %v2776_v44 = vpop.f32.mrb[33].mxu1 }
 0x35e   : > { %v3355_v48 = vpack.c.b16 %v3340_v56, %v3340_v56  ;;  %v3566_v11 = vsel %vm3184_vm10, %v3565_v40, %v3564_v28  ;;  %v3713_v27 = vrot.slane %v6523_v35, 6  ;;  %v2785_v36 = vadd.f32 %v4216_v19, %v6262_v22 }
 0x35f   : > { %v3705_v63 = vsel %vm3169_vm5, %v7237_v37, %v7236_v55  ;;  %3208 = vst.msk [vmem:[%s6682_s14] sm:$0xf] %vm3207_vm12, %v3203_v15  ;;  %v3465_v60 = vpack.c.b16 %v6569_v21, %v6569_v21  ;;  %v3568_v0 = vsel %vm3187_vm11, %v3567_v53, %v3566_v11  ;;  %v2777_v18 = vadd.f32 %v6262_v22, %v2776_v44 }
 0x360   : > { %v3707_v8 = vsel %vm3172_vm6, %v3706_v39, %v3705_v63  ;;  %3359 = vst.msk [vmem:[%s6682_s14 + $0x4] sm:$0xf] %vm3207_vm12, %v3355_v48  ;;  %v4217_v39 = vpop.f32.mrb[34].mxu1  ;;  %v3583_v12 = vpack.c.b16 %v3568_v0, %v3568_v0  ;;  %v2857_v50 = vmax.f32 %v2785_v36, 0.0  ;;  %v3715_v32 = vrot.slane %v6518_v10, 5 }
 0x361   : > { %v3709_v5 = vsel %vm3175_vm7, %v3708_v23, %v3707_v8  ;;  %v2788_v4 = vadd.f32 %v4217_v39, %v6262_v22  ;;  %v2779_v21 = vpop.f32.mrb[35].mxu1  ;;  %3467 = vrot.lane.b32.xlu0 %v3465_v60, %s4531_s15  ;;  %v2855_v62 = vmax.f32 %v2777_v18, 0.0  ;;  %v3617_v45 = vpack.c.b16 %v6576_v14, %v6576_v14 }
 0x362   : > { %v3710_v35 = vsel %vm3178_vm8, %v6469_v58, %v3709_v5  ;;  %v2780_v23 = vadd.f32 %v6262_v22, %v2779_v21  ;;  %3587 = vst.msk [vmem:[%s6682_s14 + $0x8] sm:$0xf] %vm3207_vm12, %v3583_v12  ;;  %v3034_v58 = vadd.f32 %v6223_v7, %v2857_v50  ;;  %v3765_v14 = vpack.c.b16 %v6579_v9, %v6579_v9 }
 0x363   : > { %v3712_v25 = vsel %vm3181_vm9, %v3711_v34, %v3710_v35  ;;  %v2858_v59 = vmax.f32 %v2788_v4, 0.0  ;;  %v3026_v47 = vadd.f32 %v6247_v54, %v2855_v62  ;;  %v3655_v54 = vpack.c.b16 %v6595_v3, %v6595_v3 }
 0x364   : > { %v3714_v31 = vsel %vm3184_vm10, %v3713_v27, %v3712_v25  ;;  %v2856_v29 = vmax.f32 %v2780_v23, 0.0  ;;  %v4087_v17 = vpack.c.bf16 %v3034_v58, %v3034_v58  ;;  %v3841_v15 = vpack.c.b16 %v6639_v33, %v6639_v33 }
 0x365   : > { %v3716_v16 = vsel %vm3187_vm11, %v3715_v32, %v3714_v31  ;;  %v3037_v38 = vadd.f32 %v6255_v46, %v2858_v59  ;;  %3619 = vrot.lane.b32.xlu0 %v3617_v45, %s4530_s21  ;;  %v4086_v2 = vpack.c.bf16 %v3026_v47, %v3026_v47  ;;  %v3693_v46 = vpack.c.b16 %v6619_v6, %v6619_v6 }
 0x366   : > { %v3731_v10 = vpack.c.b16 %v3716_v16, %v3716_v16  ;;  %v3029_v52 = vadd.f32 %v6264_v30, %v2856_v29  ;;  %v3161_v7 = vunpack.c.l.b16 %v4087_v17 }
 0x367   : > { %v4103_v51 = vpack.c.bf16 %v3037_v38, %v3037_v38  ;;  %v3160_v1 = vunpack.c.l.b16 %v4086_v2 }
 0x368   : > { %3735 = vst.msk [vmem:[%s6682_s14 + $0xc] sm:$0xf] %vm3207_vm12, %v3731_v10  ;;  %v4102_v40 = vpack.c.bf16 %v3029_v52, %v3029_v52  ;;  %v3189_v56 = vrot.slane %v3161_v7, 7  ;;  %v3342_v30 = vrot.slane %v3161_v7, 3  ;;  %v3414_v53 = vrot.slane %v3161_v7, 5 }
 0x369   : > { %v3548_v20 = vunpack.c.l.b16 %v4103_v51  ;;  %3767 = vrot.lane.b32.xlu0 %v3765_v14, %s4530_s21  ;;  %v3341_v48 = vrot.slane %v3160_v1, 4  ;;  %v3413_v9 = vrot.slane %v3160_v1, 6  ;;  %v3224_v55 = vrot.slane %v3160_v1, 1 }
 0x36a   : > { %v3547_v28 = vunpack.c.l.b16 %v4102_v40  ;;  %v6731_v3 = vsel %vm3169_vm5, %v3189_v56, %v3160_v1  ;;  %v3375_v34 = vrot.slane %v3160_v1, 5  ;;  %v3376_v11 = vrot.slane %v3161_v7, 4 }
 0x36b   : > { %v3569_v37 = vrot.slane %v3548_v20, 7  ;;  %v3718_v63 = vrot.slane %v3548_v20, 3  ;;  %v6734_v19 = vsel %vm3169_vm5, %v3414_v53, %v3413_v9  ;;  %v6737_v33 = vsel %vm3169_vm5, %v3161_v7, %v3224_v55 }
 0x36c   : > { %v3717_v6 = vrot.slane %v3547_v28, 4  ;;  %v3263_v27 = vrot.slane %v3160_v1, 2  ;;  %v3264_v36 = vrot.slane %v3161_v7, 1  ;;  %v3789_v44 = vrot.slane %v3547_v28, 6 }
 0x36d   : > { %v6740_v8 = vsel %vm3169_vm5, %v3569_v37, %v3547_v28  ;;  %3657 = vrot.lane.b32.xlu0 %v3655_v54, %s4529_s17  ;;  %v6744_v60 = vsel %vm3169_vm5, %v3376_v11, %v3375_v34  ;;  %v3790_v0 = vrot.slane %v3548_v20, 5  ;;  %v3302_v5 = vrot.slane %v3160_v1, 3 }
 0x36e   : > { %v3303_v18 = vrot.slane %v3161_v7, 2  ;;  %v6747_v39 = vsel %vm3169_vm5, %v3264_v36, %v3263_v27  ;;  %v3451_v12 = vrot.slane %v3160_v1, 7  ;;  %v3452_v35 = vrot.slane %v3161_v7, 6 }
 0x36f   : > { %v3603_v50 = vrot.slane %v3547_v28, 1  ;;  %v6750_v4 = vsel %vm3169_vm5, %v3790_v0, %v3789_v44  ;;  %v3751_v25 = vrot.slane %v3547_v28, 5  ;;  %v3752_v32 = vrot.slane %v3548_v20, 4 }
 0x370   : > { %v6753_v21 = vsel %vm3169_vm5, %v3303_v18, %v3302_v5  ;;  %v6757_v62 = vsel %vm3169_vm5, %v3452_v35, %v3451_v12  ;;  %v3641_v31 = vrot.slane %v3547_v28, 2  ;;  %v3642_v58 = vrot.slane %v3548_v20, 1 }
 0x371   : > { %3695 = vrot.lane.b32.xlu0 %v3693_v46, %s4531_s15  ;;  %v6760_v23 = vsel %vm3169_vm5, %v3548_v20, %v3603_v50  ;;  %v6763_v59 = vsel %vm3169_vm5, %v3752_v32, %v3751_v25  ;;  %v3679_v45 = vrot.slane %v3547_v28, 3  ;;  %v3680_v16 = vrot.slane %v3548_v20, 2 }
 0x372   : > { %v3827_v47 = vrot.slane %v3547_v28, 7  ;;  %v6766_v29 = vsel %vm3169_vm5, %v3642_v58, %v3641_v31  ;;  %v3828_v10 = vrot.slane %v3548_v20, 6  ;;  %v6769_v17 = vsel %vm3169_vm5, %v3342_v30, %v3341_v48 }
 0x373   : > { %v6772_v38 = vsel %vm3169_vm5, %v3718_v63, %v3717_v6  ;;  %v6775_v2 = vsel %vm3169_vm5, %v3680_v16, %v3679_v45 }
 0x374   : > { %v6779_v52 = vsel %vm3169_vm5, %v3828_v10, %v3827_v47 }
 0x375   : > { %3843 = vrot.lane.b32.xlu0 %v3841_v15, %s4531_s15 }
 0x381   : > { %v4220_v7 = vpop.f32.mrb[36].mxu1 }
 0x382   : > { %v2801_v51 = vadd.f32 %v4220_v7, %v6262_v22  ;;  %v2792_v14 = vpop.f32.mrb[37].mxu1 }
 0x383   : > { %v2793_v54 = vadd.f32 %v6262_v22, %v2792_v14  ;;  %v4221_v1 = vpop.f32.mrb[38].mxu1 }
 0x384   : > { %v2861_v40 = vmax.f32 %v2801_v51, 0.0  ;;  %v2804_v46 = vadd.f32 %v4221_v1, %v6262_v22  ;;  %v2795_v56 = vpop.f32.mrb[39].mxu1 }
 0x385   : > { %v2859_v30 = vmax.f32 %v2793_v54, 0.0  ;;  %v2796_v20 = vadd.f32 %v6262_v22, %v2795_v56 }
 0x386   : > { %v3050_v53 = vadd.f32 %v6322_v61, %v2861_v40  ;;  %v2862_v15 = vmax.f32 %v2804_v46, 0.0 }
 0x387   : > { %v3042_v48 = vadd.f32 %v6329_v26, %v2859_v30  ;;  %v2860_v28 = vmax.f32 %v2796_v20, 0.0 }
 0x388   : > { %v4089_v9 = vpack.c.bf16 %v3050_v53, %v3050_v53  ;;  %v3053_v55 = vadd.f32 %v6331_v43, %v2862_v15 }
 0x389   : > { %v4088_v37 = vpack.c.bf16 %v3042_v48, %v3042_v48  ;;  %v3045_v63 = vadd.f32 %v6333_v57, %v2860_v28 }
 0x38a   : > { %v3163_v34 = vunpack.c.l.b16 %v4089_v9  ;;  %v4105_v6 = vpack.c.bf16 %v3053_v55, %v3053_v55 }
 0x38b   : > { %v3162_v11 = vunpack.c.l.b16 %v4088_v37  ;;  %v4104_v27 = vpack.c.bf16 %v3045_v63, %v3045_v63 }
 0x38c   : > { %v3193_v36 = vrot.slane %v3163_v34, 5  ;;  %v3346_v44 = vrot.slane %v3163_v34, 1  ;;  %v3550_v0 = vunpack.c.l.b16 %v4105_v6  ;;  %v3418_v22 = vrot.slane %v3163_v34, 3 }
 0x38d   : > { %v3191_v5 = vrot.slane %v3162_v11, 6  ;;  %v3344_v61 = vrot.slane %v3162_v11, 2  ;;  %v3549_v18 = vunpack.c.l.b16 %v4104_v27  ;;  %v3416_v12 = vrot.slane %v3162_v11, 4 }
 0x38e   : > { %v3573_v26 = vrot.slane %v3550_v0, 5  ;;  %v3722_v35 = vrot.slane %v3550_v0, 1  ;;  %v3226_v50 = vrot.slane %v3162_v11, 7  ;;  %v3228_v25 = vrot.slane %v3163_v34, 6 }
 0x38f   : > { %v3571_v43 = vrot.slane %v3549_v18, 6  ;;  %v3720_v32 = vrot.slane %v3549_v18, 2  ;;  %v3417_v57 = vsel %vm3172_vm6, %v3416_v12, %v6734_v19  ;;  %v3378_v31 = vrot.slane %v3162_v11, 3 }
 0x390   : > { %v6792_v58 = vsel %vm3175_vm7, %v3418_v22, %v3417_v57  ;;  %v3227_v45 = vsel %vm3172_vm6, %v3226_v50, %v6737_v33  ;;  %v3380_v16 = vrot.slane %v3163_v34, 2  ;;  %v3266_v47 = vsel %vm3172_vm6, %v3162_v11, %v6747_v39 }
 0x391   : > { %v6799_v10 = vsel %vm3175_vm7, %v3228_v25, %v3227_v45  ;;  %v3379_v7 = vsel %vm3172_vm6, %v3378_v31, %v6744_v60  ;;  %v3267_v51 = vrot.slane %v3163_v34, 7  ;;  %v3792_v14 = vrot.slane %v3549_v18, 4  ;;  %v7238_v45 = vld [vmem:[#allocation13_spill] sm:$0xff] }
 0x392   : > { %v6804_v19 = vsel %vm3175_vm7, %v3380_v16, %v3379_v7  ;;  %v3794_v54 = vrot.slane %v3550_v0, 3  ;;  %v3305_v1 = vrot.slane %v3162_v11, 1  ;;  %v3454_v40 = vrot.slane %v3162_v11, 5 }
 0x393   : > { %v6807_v33 = vsel %vm3175_vm7, %v3267_v51, %v3266_v47  ;;  %v3793_v39 = vsel %vm3172_vm6, %v3792_v14, %v6750_v4  ;;  %v3456_v46 = vrot.slane %v3163_v34, 4  ;;  %v3605_v56 = vrot.slane %v3549_v18, 7  ;;  %v7239_v51 = vld [vmem:[#allocation14_spill] sm:$0xff] }
 0x394   : > { %v6812_v30 = vsel %vm3175_vm7, %v3794_v54, %v3793_v39  ;;  %v3306_v60 = vsel %vm3172_vm6, %v3305_v1, %v6753_v21  ;;  %v3455_v20 = vsel %vm3172_vm6, %v3454_v40, %v6757_v62  ;;  %v3607_v53 = vrot.slane %v3550_v0, 6  ;;  %v7240_v1 = vld [vmem:[#allocation15_spill] sm:$0xff] }
 0x395   : > { %v6819_v15 = vsel %vm3175_vm7, %v3163_v34, %v3306_v60  ;;  %v6822_v48 = vsel %vm3175_vm7, %v3456_v46, %v3455_v20  ;;  %v3606_v4 = vsel %vm3172_vm6, %v3605_v56, %v6760_v23  ;;  %v3754_v28 = vrot.slane %v3549_v18, 3 }
 0x396   : > { %v6827_v9 = vsel %vm3175_vm7, %v3607_v53, %v3606_v4  ;;  %v3756_v55 = vrot.slane %v3550_v0, 2  ;;  %v3644_v21 = vsel %vm3172_vm6, %v3549_v18, %v6766_v29  ;;  %v3645_v37 = vrot.slane %v3550_v0, 7 }
 0x397   : > { %v3755_v62 = vsel %vm3172_vm6, %v3754_v28, %v6763_v59  ;;  %v3682_v63 = vrot.slane %v3549_v18, 1  ;;  %v3830_v34 = vrot.slane %v3549_v18, 5  ;;  %v3832_v6 = vrot.slane %v3550_v0, 4 }
 0x398   : > { %v6834_v11 = vsel %vm3175_vm7, %v3756_v55, %v3755_v62  ;;  %v6837_v23 = vsel %vm3175_vm7, %v3645_v37, %v3644_v21  ;;  %v3192_v27 = vsel %vm3172_vm6, %v3191_v5, %v6731_v3  ;;  %v3345_v22 = vsel %vm3172_vm6, %v3344_v61, %v6769_v17 }
 0x399   : > { %v3683_v29 = vsel %vm3172_vm6, %v3682_v63, %v6775_v2  ;;  %v3831_v59 = vsel %vm3172_vm6, %v3830_v34, %v6779_v52  ;;  %v6848_v18 = vsel %vm3175_vm7, %v3193_v36, %v3192_v27  ;;  %v6851_v12 = vsel %vm3175_vm7, %v3346_v44, %v3345_v22 }
 0x39a   : > { %v6854_v50 = vsel %vm3175_vm7, %v3550_v0, %v3683_v29  ;;  %v6857_v3 = vsel %vm3175_vm7, %v3832_v6, %v3831_v59  ;;  %v3572_v17 = vsel %vm3172_vm6, %v3571_v43, %v6740_v8  ;;  %v3721_v2 = vsel %vm3172_vm6, %v3720_v32, %v6772_v38  ;;  %v6872_v0 = vld [vmem:[%s7207_s6] ss:$0 sm:$0xff] }
 0x39b   : > { %v6864_v52 = vsel %vm3175_vm7, %v3573_v26, %v3572_v17  ;;  %v6867_v36 = vsel %vm3175_vm7, %v3722_v35, %v3721_v2 }
 0x3a5   : > { %v4224_v44 = vpop.f32.mrb[40].mxu1 }
 0x3a6   : > { %v2817_v5 = vadd.f32 %v6872_v0, %v4224_v44  ;;  %v2808_v61 = vpop.f32.mrb[41].mxu1 }
 0x3a7   : > { %v2809_v8 = vadd.f32 %v6872_v0, %v2808_v61  ;;  %v4225_v25 = vpop.f32.mrb[42].mxu1 }
 0x3a8   : > { %v2865_v43 = vmax.f32 %v2817_v5, 0.0  ;;  %v2820_v38 = vadd.f32 %v6872_v0, %v4225_v25  ;;  %v2811_v26 = vpop.f32.mrb[43].mxu1 }
 0x3a9   : > { %v2863_v32 = vmax.f32 %v2809_v8, 0.0  ;;  %v2812_v35 = vadd.f32 %v6872_v0, %v2811_v26 }
 0x3aa   : > { %v3066_v57 = vadd.f32 %v6395_v42, %v2865_v43  ;;  %v2866_v31 = vmax.f32 %v2820_v38, 0.0 }
 0x3ab   : > { %v3058_v16 = vadd.f32 %v7238_v45, %v2863_v32  ;;  %v2864_v47 = vmax.f32 %v2812_v35, 0.0 }
 0x3ac   : > { %v4091_v7 = vpack.c.bf16 %v3066_v57, %v3066_v57  ;;  %v3069_v14 = vadd.f32 %v7239_v51, %v2866_v31 }
 0x3ad   : > { %v4090_v54 = vpack.c.bf16 %v3058_v16, %v3058_v16  ;;  %v3061_v40 = vadd.f32 %v7240_v1, %v2864_v47 }
 0x3ae   : > { %v6882_v39 = vunpack.c.l.b16 %v4091_v7  ;;  %v4107_v46 = vpack.c.bf16 %v3069_v14, %v3069_v14 }
 0x3af   : > { %v3164_v56 = vunpack.c.l.b16 %v4090_v54  ;;  %v4106_v60 = vpack.c.bf16 %v3061_v40, %v3061_v40 }
 0x3b0   : > { %v6884_v20 = vunpack.c.l.b16 %v4107_v46  ;;  %v3422_v53 = vrot.slane %v6882_v39, 1  ;;  %v3232_v42 = vrot.slane %v6882_v39, 4  ;;  %v3271_v4 = vrot.slane %v6882_v39, 5 }
 0x3b1   : > { %v3551_v28 = vunpack.c.l.b16 %v4106_v60  ;;  %v3420_v55 = vrot.slane %v3164_v56, 2  ;;  %v3230_v21 = vrot.slane %v3164_v56, 5  ;;  %v3382_v37 = vrot.slane %v3164_v56, 1 }
 0x3b2   : > { %v3269_v62 = vrot.slane %v3164_v56, 6  ;;  %v3798_v63 = vrot.slane %v6884_v20, 1  ;;  %v3308_v34 = vrot.slane %v3164_v56, 7  ;;  %v3310_v6 = vrot.slane %v6882_v39, 6 }
 0x3b3   : > { %v3421_v27 = vsel %vm3178_vm8, %v3420_v55, %v6792_v58  ;;  %v3231_v22 = vsel %vm3178_vm8, %v3230_v21, %v6799_v10  ;;  %v3383_v29 = vsel %vm3178_vm8, %v3382_v37, %v6804_v19  ;;  %v3796_v59 = vrot.slane %v3551_v28, 2 }
 0x3b4   : > { %v6898_v17 = vsel %vm3181_vm9, %v3422_v53, %v3421_v27  ;;  %v6901_v2 = vsel %vm3181_vm9, %v3232_v42, %v3231_v22  ;;  %v6905_v44 = vsel %vm3181_vm9, %v6882_v39, %v3383_v29  ;;  %v3270_v58 = vsel %vm3178_vm8, %v3269_v62, %v6807_v33 }
 0x3b5   : > { %v6910_v10 = vsel %vm3181_vm9, %v3271_v4, %v3270_v58  ;;  %v3797_v19 = vsel %vm3178_vm8, %v3796_v59, %v6812_v30  ;;  %v3309_v5 = vsel %vm3178_vm8, %v3308_v34, %v6819_v15  ;;  %v3458_v61 = vrot.slane %v3164_v56, 3 }
 0x3b6   : > { %v6917_v8 = vsel %vm3181_vm9, %v3798_v63, %v3797_v19  ;;  %v6920_v25 = vsel %vm3181_vm9, %v3310_v6, %v3309_v5  ;;  %v3460_v43 = vrot.slane %v6882_v39, 2  ;;  %v3609_v38 = vrot.slane %v3551_v28, 5 }
 0x3b7   : > { %v3459_v33 = vsel %vm3178_vm8, %v3458_v61, %v6822_v48  ;;  %v3611_v26 = vrot.slane %v6884_v20, 4  ;;  %v3758_v32 = vrot.slane %v3551_v28, 1  ;;  %v3647_v30 = vrot.slane %v3551_v28, 6 }
 0x3b8   : > { %v6927_v35 = vsel %vm3181_vm9, %v3460_v43, %v3459_v33  ;;  %v3610_v15 = vsel %vm3178_vm8, %v3609_v38, %v6827_v9  ;;  %v3649_v57 = vrot.slane %v6884_v20, 5  ;;  %v3685_v31 = vrot.slane %v3551_v28, 7 }
 0x3b9   : > { %v6933_v45 = vsel %vm3181_vm9, %v3611_v26, %v3610_v15  ;;  %v3759_v16 = vsel %vm3178_vm8, %v3758_v32, %v6834_v11  ;;  %v3648_v48 = vsel %vm3178_vm8, %v3647_v30, %v6837_v23  ;;  %v3687_v47 = vrot.slane %v6884_v20, 6 }
 0x3ba   : > { %v3430_v7 = vpop.permute.xlu0 %3429  ;;  %v6942_v51 = vsel %vm3181_vm9, %v6884_v20, %v3759_v16  ;;  %v6945_v9 = vsel %vm3181_vm9, %v3649_v57, %v3648_v48  ;;  %v3686_v14 = vsel %vm3178_vm8, %v3685_v31, %v6854_v50  ;;  %v3834_v54 = vrot.slane %v3551_v28, 3 }
 0x3bb   : > { %v6950_v11 = vsel %vm3181_vm9, %v3687_v47, %v3686_v14  ;;  %v3836_v23 = vrot.slane %v6884_v20, 2  ;;  %v3195_v1 = vrot.slane %v3164_v56, 4  ;;  %v3197_v40 = vrot.slane %v6882_v39, 3 }
 0x3bc   : > { %v3835_v46 = vsel %vm3178_vm8, %v3834_v54, %v6857_v3  ;;  %v3348_v60 = vsel %vm3178_vm8, %v3164_v56, %v6851_v12  ;;  %v3349_v53 = vrot.slane %v6882_v39, 7  ;;  %v3575_v42 = vrot.slane %v3551_v28, 4 }
 0x3bd   : > { %v6960_v50 = vsel %vm3181_vm9, %v3836_v23, %v3835_v46  ;;  %v3196_v55 = vsel %vm3178_vm8, %v3195_v1, %v6848_v18  ;;  %v3577_v21 = vrot.slane %v6884_v20, 3  ;;  %v3724_v3 = vsel %vm3178_vm8, %v3551_v28, %v6867_v36 }
 0x3be   : > { %v3241_v4 = vpop.permute.xlu0 %3240  ;;  %v6970_v12 = vsel %vm3181_vm9, %v3197_v40, %v3196_v55  ;;  %v6973_v39 = vsel %vm3181_vm9, %v3349_v53, %v3348_v60  ;;  %v3576_v56 = vsel %vm3178_vm8, %v3575_v42, %v6864_v52  ;;  %v3725_v37 = vrot.slane %v6884_v20, 7 }
 0x3bf   : > { %3247 = vst.msk [vmem:[%s6682_s14] sm:$0xf] %vm3246_vm13, %v3241_v4  ;;  %v6979_v18 = vsel %vm3181_vm9, %v3577_v21, %v3576_v56 }
 0x3c0   : > { %v6982_v62 = vsel %vm3181_vm9, %v3725_v37, %v3724_v3 }
 0x3c2   : > { %v3392_v36 = vpop.permute.xlu0 %3391 }
 0x3c3   : > { %3397 = vst.msk [vmem:[%s6682_s14 + $0x4] sm:$0xf] %vm3246_vm13, %v3392_v36 }
 0x3c4   : > { %3435 = vst.msk [vmem:[%s6682_s14 + $0x4] sm:$0xf] %vm3285_vm14, %v3430_v7 }
 0x3c6   : > { %v3280_v28 = vpop.permute.xlu0 %3279 }
 0x3c7   : > { %3286 = vst.msk [vmem:[%s6682_s14] sm:$0xf] %vm3285_vm14, %v3280_v28 }
 0x3ca   : > { %v4228_v63 = vpop.f32.mrb[44].mxu1  ;;  %v3806_v52 = vpop.permute.xlu0 %3805 }
 0x3cb   : > { %v2833_v20 = vadd.f32 %v6872_v0, %v4228_v63  ;;  %v2824_v34 = vpop.f32.mrb[45].mxu1 }
 0x3cc   : > { %v2825_v6 = vadd.f32 %v6872_v0, %v2824_v34  ;;  %v4229_v27 = vpop.f32.mrb[46].mxu1 }
 0x3cd   : > { %v2869_v22 = vmax.f32 %v2833_v20, 0.0  ;;  %v2836_v29 = vadd.f32 %v6872_v0, %v4229_v27  ;;  %v2827_v59 = vpop.f32.mrb[47].mxu1 }
 0x3ce   : > { %v2867_v58 = vmax.f32 %v2825_v6, 0.0  ;;  %v2828_v19 = vadd.f32 %v6872_v0, %v2827_v59  ;;  %v3319_v5 = vpop.permute.xlu0 %3318 }
 0x3cf   : > { %v3082_v61 = vadd.f32 %v6582_v41, %v2869_v22  ;;  %v2870_v43 = vmax.f32 %v2836_v29, 0.0  ;;  %3325 = vst.msk [vmem:[%s6682_s14] sm:$0xf] %vm3324_vm15, %v3319_v5 }
 0x3d0   : > { %v3074_v38 = vadd.f32 %v6608_v49, %v2867_v58  ;;  %v2868_v33 = vmax.f32 %v2828_v19, 0.0 }
 0x3d1   : > { %v4093_v26 = vpack.c.bf16 %v3082_v61, %v3082_v61  ;;  %v3085_v32 = vadd.f32 %v6616_v13, %v2870_v43 }
 0x3d2   : > { %v4092_v30 = vpack.c.bf16 %v3074_v38, %v3074_v38  ;;  %v3077_v15 = vadd.f32 %v6624_v24, %v2868_v33 }
 0x3d3   : > { %v3468_v57 = vpop.permute.xlu0 %3467  ;;  %v7000_v31 = vunpack.c.l.b16 %v4093_v26  ;;  %v4109_v16 = vpack.c.bf16 %v3085_v32, %v3085_v32 }
 0x3d4   : > { %3473 = vst.msk [vmem:[%s6682_s14 + $0x4] sm:$0xf] %vm3324_vm15, %v3468_v57  ;;  %v7004_v41 = vunpack.c.l.b16 %v4092_v30  ;;  %v4108_v0 = vpack.c.bf16 %v3077_v15, %v3077_v15 }
 0x3d5   : > { %v7006_v48 = vunpack.c.l.b16 %v4109_v16  ;;  %v3425_v49 = vrot.slane %v7000_v31, 7  ;;  %v3236_v47 = vrot.slane %v7000_v31, 2  ;;  %v3387_v13 = vrot.slane %v7000_v31, 6 }
 0x3d6   : > { %v7011_v7 = vunpack.c.l.b16 %v4108_v0  ;;  %v3424_v24 = vsel %vm3184_vm10, %v7004_v41, %v6898_v17  ;;  %v3234_v14 = vrot.slane %v7004_v41, 3  ;;  %v3385_v54 = vrot.slane %v7004_v41, 7 }
 0x3d7   : > { %v3620_v23 = vpop.permute.xlu0 %3619  ;;  %v3426_v1 = vsel %vm3187_vm11, %v3425_v49, %v3424_v24  ;;  %v3273_v40 = vrot.slane %v7004_v41, 4  ;;  %v3275_v46 = vrot.slane %v7000_v31, 3  ;;  %v3801_v60 = vrot.slane %v7006_v48, 7 }
 0x3d8   : > { %3625 = vst.msk [vmem:[%s6682_s14 + $0x8] sm:$0xf] %vm3246_vm13, %v3620_v23  ;;  %v3428_v53 = vpack.c.b16 %v3426_v1, %v3426_v1  ;;  %v3235_v17 = vsel %vm3184_vm10, %v3234_v14, %v6901_v2  ;;  %v3386_v42 = vsel %vm3184_vm10, %v3385_v54, %v6905_v44  ;;  %v3800_v4 = vsel %vm3184_vm10, %v7011_v7, %v6917_v8 }
 0x3d9   : > { %v3237_v55 = vsel %vm3187_vm11, %v3236_v47, %v3235_v17  ;;  %v3388_v21 = vsel %vm3187_vm11, %v3387_v13, %v3386_v42  ;;  %v3274_v3 = vsel %vm3184_vm10, %v3273_v40, %v6910_v10  ;;  %v7036_v56 = vsel %vm3187_vm11, %v3801_v60, %v3800_v4 }
 0x3da   : > { %3431 = vrot.lane.b32.xlu1 %v3428_v53, %s4529_s17  ;;  %v3276_v2 = vsel %vm3187_vm11, %v3275_v46, %v3274_v3  ;;  %v3239_v37 = vpack.c.b16 %v3237_v55, %v3237_v55  ;;  %v3312_v36 = vrot.slane %v7004_v41, 5  ;;  %v3462_v8 = vrot.slane %v7004_v41, 1 }
 0x3db   : > { %v3768_v44 = vpop.permute.xlu0 %3767  ;;  %v3314_v28 = vrot.slane %v7000_v31, 4  ;;  %v3613_v63 = vrot.slane %v7011_v7, 3  ;;  %v3615_v10 = vrot.slane %v7006_v48, 2  ;;  %v3761_v20 = vrot.slane %v7011_v7, 7 }
 0x3dc   : > { %3773 = vst.msk [vmem:[%s6682_s14 + $0xc] sm:$0xf] %vm3246_vm13, %v3768_v44  ;;  %v3313_v34 = vsel %vm3184_vm10, %v3312_v36, %v6920_v25  ;;  %v3463_v6 = vsel %vm3184_vm10, %v3462_v8, %v6927_v35  ;;  %v3763_v27 = vrot.slane %v7006_v48, 6  ;;  %v3651_v22 = vrot.slane %v7011_v7, 4 }
 0x3dd   : > { %3811 = vst.msk [vmem:[%s6682_s14 + $0xc] sm:$0xf] %vm3285_vm14, %v3806_v52  ;;  %v3315_v29 = vsel %vm3187_vm11, %v3314_v28, %v3313_v34  ;;  %v3464_v59 = vsel %vm3187_vm11, %v7000_v31, %v3463_v6  ;;  %v3614_v52 = vsel %vm3184_vm10, %v3613_v63, %v6933_v45  ;;  %v3762_v25 = vsel %vm3184_vm10, %v3761_v20, %v6942_v51 }
 0x3de   : > { %3242 = vrot.lane.b32.xlu1 %v3239_v37, %s4530_s21  ;;  %v3616_v35 = vsel %vm3187_vm11, %v3615_v10, %v3614_v52  ;;  %v3764_v19 = vsel %vm3187_vm11, %v3763_v27, %v3762_v25  ;;  %v3653_v5 = vrot.slane %v7006_v48, 3  ;;  %v3390_v61 = vpack.c.b16 %v3388_v21, %v3388_v21 }
 0x3df   : > { %v3658_v58 = vpop.permute.xlu0 %3657  ;;  %v3652_v43 = vsel %vm3184_vm10, %v3651_v22, %v6945_v9  ;;  %v3689_v38 = vrot.slane %v7011_v7, 5  ;;  %v3691_v51 = vrot.slane %v7006_v48, 4  ;;  %v3838_v33 = vrot.slane %v7011_v7, 1 }
 0x3e0   : > { %3663 = vst.msk [vmem:[%s6682_s14 + $0x8] sm:$0xf] %vm3285_vm14, %v3658_v58  ;;  %v3654_v45 = vsel %vm3187_vm11, %v3653_v5, %v3652_v43  ;;  %v3199_v26 = vrot.slane %v7004_v41, 2  ;;  %v3201_v30 = vrot.slane %v7000_v31, 1  ;;  %v3351_v15 = vrot.slane %v7004_v41, 6 }
 0x3e1   : > { %v3690_v32 = vsel %vm3184_vm10, %v3689_v38, %v6950_v11  ;;  %v3839_v16 = vsel %vm3184_vm10, %v3838_v33, %v6960_v50  ;;  %v3353_v49 = vrot.slane %v7000_v31, 5  ;;  %v3278_v11 = vpack.c.b16 %v3276_v2, %v3276_v2 }
 0x3e2   : > { %3393 = vrot.lane.b32.xlu1 %v3390_v61, %s4530_s21  ;;  %v3692_v57 = vsel %vm3187_vm11, %v3691_v51, %v3690_v32  ;;  %v3200_v0 = vsel %vm3184_vm10, %v3199_v26, %v6970_v12  ;;  %v3840_v47 = vsel %vm3187_vm11, %v7006_v48, %v3839_v16  ;;  %v3352_v13 = vsel %vm3184_vm10, %v3351_v15, %v6973_v39 }
 0x3e3   : > { %v3696_v9 = vpop.permute.xlu0 %3695  ;;  %v3202_v41 = vsel %vm3187_vm11, %v3201_v30, %v3200_v0  ;;  %v3354_v24 = vsel %vm3187_vm11, %v3353_v49, %v3352_v13  ;;  %v3579_v12 = vrot.slane %v7011_v7, 2  ;;  %v3581_v54 = vrot.slane %v7006_v48, 1 }
 0x3e4   : > { %3701 = vst.msk [vmem:[%s6682_s14 + $0x8] sm:$0xf] %vm3324_vm15, %v3696_v9  ;;  %v3204_v50 = vpack.c.b16 %v3202_v41, %v3202_v41  ;;  %v3356_v31 = vpack.c.b16 %v3354_v24, %v3354_v24  ;;  %v3727_v23 = vrot.slane %v7011_v7, 6  ;;  %v3729_v1 = vrot.slane %v7006_v48, 5 }
 0x3e5   : > { %v3580_v39 = vsel %vm3184_vm10, %v3579_v12, %v6979_v18  ;;  %v3804_v40 = vpack.c.b16 %v7036_v56, %v7036_v56  ;;  %v3317_v18 = vpack.c.b16 %v3315_v29, %v3315_v29  ;;  %v3466_v48 = vpack.c.b16 %v3464_v59, %v3464_v59 }
 0x3e6   : > { %3281 = vrot.lane.b32.xlu1 %v3278_v11, %s4529_s17  ;;  %3209 = vst.msk [vmem:[%s6682_s14 + $0x10] sm:$0xf] %vm3207_vm12, %v3204_v50  ;;  %3360 = vst.msk [vmem:[%s6682_s14 + $0x14] sm:$0xf] %vm3207_vm12, %v3356_v31  ;;  %v3582_v46 = vsel %vm3187_vm11, %v3581_v54, %v3580_v39  ;;  %v3728_v60 = vsel %vm3184_vm10, %v3727_v23, %v6982_v62  ;;  %v3618_v62 = vpack.c.b16 %v3616_v35, %v3616_v35 }
 0x3e7   : > { %v3844_v14 = vpop.permute.xlu0 %3843  ;;  %v3584_v7 = vpack.c.b16 %v3582_v46, %v3582_v46  ;;  %v3730_v53 = vsel %vm3187_vm11, %v3729_v1, %v3728_v60  ;;  %v3766_v42 = vpack.c.b16 %v3764_v19, %v3764_v19  ;;  %v3656_v4 = vpack.c.b16 %v3654_v45, %v3654_v45 }
 0x3e8   : > { %3849 = vst.msk [vmem:[%s6682_s14 + $0xc] sm:$0xf] %vm3324_vm15, %v3844_v14  ;;  %v3732_v17 = vpack.c.b16 %v3730_v53, %v3730_v53  ;;  %v3694_v55 = vpack.c.b16 %v3692_v57, %v3692_v57  ;;  %v3842_v21 = vpack.c.b16 %v3840_v47, %v3840_v47 }
 0x3e9   : > { %3588 = vst.msk [vmem:[%s6682_s14 + $0x18] sm:$0xf] %vm3207_vm12, %v3584_v7 }
 0x3ea   : > { %3807 = vrot.lane.b32.xlu1 %v3804_v40, %s4529_s17  ;;  %3736 = vst.msk [vmem:[%s6682_s14 + $0x1c] sm:$0xf] %vm3207_vm12, %v3732_v17 }
 0x3ee   : > { %3320 = vrot.lane.b32.xlu1 %v3317_v18, %s4531_s15 }
 0x3f2   : > { %3469 = vrot.lane.b32.xlu1 %v3466_v48, %s4531_s15 }
 0x3f6   : > { %3621 = vrot.lane.b32.xlu1 %v3618_v62, %s4530_s21 }
 0x3fa   : > { %3769 = vrot.lane.b32.xlu1 %v3766_v42, %s4530_s21  ;;  %s4450_s21 = scalar_lea.vmem %s7155_s18, 512 }
 0x3fb   : > { %p4451_p11 = scmp.ne.s32.totalorder %s7155_s18, %s4450_s21 }
 0x3fd   : > { %p4452_p2 = pnand %p4451_p11, %p7241_p0 }
 0x3fe   : > { %3659 = vrot.lane.b32.xlu1 %v3656_v4, %s4529_s17  ;;  %s3852_s17 = scalar_lea.sflag [#allocation5], %s4761_s19 }
 0x3ff   : > { %p4453_p3 = pneg %p4452_p2 }
 0x402   : > { %3697 = vrot.lane.b32.xlu1 %v3694_v55, %s4531_s15 }
 0x406   : > { %3845 = vrot.lane.b32.xlu1 %v3842_v21, %s4531_s15  ;;  %s4456_s15 = scalar_lea.vmem %s4455_s20, 1024 }
 0x407   : > { %p4458_p9 = scmp.lt.s32.totalorder %s4456_s15, %s4450_s21 }
 0x409   : > { %p4459_p12 = por %p4458_p9, %p4457_p7 }
 0x40b   : > { %p4460_p1 = pnand %p4459_p12, %p4453_p3 }
 0x44c   : > { %v3432_v3 = vpop.permute.xlu1 %3431 }
 0x450   : > { %v3243_v56 = vpop.permute.xlu1 %3242 }
 0x451   : > { %3248 = vst.msk [vmem:[%s6682_s14 + $0x10] sm:$0xf] %vm3246_vm13, %v3243_v56 }
 0x454   : > { %v3394_v2 = vpop.permute.xlu1 %3393 }
 0x455   : > { %3398 = vst.msk [vmem:[%s6682_s14 + $0x14] sm:$0xf] %vm3246_vm13, %v3394_v2 }
 0x456   : > { %3436 = vst.msk [vmem:[%s6682_s14 + $0x14] sm:$0xf] %vm3285_vm14, %v3432_v3 }
 0x458   : > { %v3282_v44 = vpop.permute.xlu1 %3281 }
 0x459   : > { %3287 = vst.msk [vmem:[%s6682_s14 + $0x10] sm:$0xf] %vm3285_vm14, %v3282_v44 }
 0x45c   : > { %v3808_v37 = vpop.permute.xlu1 %3807 }
 0x460   : > { %v3321_v36 = vpop.permute.xlu1 %3320 }
 0x461   : > { %3326 = vst.msk [vmem:[%s6682_s14 + $0x10] sm:$0xf] %vm3324_vm15, %v3321_v36 }
 0x464   : > { %v3470_v8 = vpop.permute.xlu1 %3469 }
 0x465   : > { %3474 = vst.msk [vmem:[%s6682_s14 + $0x14] sm:$0xf] %vm3324_vm15, %v3470_v8 }
 0x468   : > { %v3622_v28 = vpop.permute.xlu1 %3621 }
 0x469   : > { %3626 = vst.msk [vmem:[%s6682_s14 + $0x18] sm:$0xf] %vm3246_vm13, %v3622_v28 }
 0x46c   : > { %v3770_v63 = vpop.permute.xlu1 %3769 }
 0x46d   : > { %3774 = vst.msk [vmem:[%s6682_s14 + $0x1c] sm:$0xf] %vm3246_vm13, %v3770_v63 }
 0x46e   : > { %3812 = vst.msk [vmem:[%s6682_s14 + $0x1c] sm:$0xf] %vm3285_vm14, %v3808_v37 }
 0x470   : > { %v3660_v10 = vpop.permute.xlu1 %3659 }
 0x471   : > { %3664 = vst.msk [vmem:[%s6682_s14 + $0x18] sm:$0xf] %vm3285_vm14, %v3660_v10 }
 0x474   : > { %v3698_v20 = vpop.permute.xlu1 %3697 }
 0x475   : > { %3702 = vst.msk [vmem:[%s6682_s14 + $0x18] sm:$0xf] %vm3324_vm15, %v3698_v20 }
 0x478   : > { %v3846_v34 = vpop.permute.xlu1 %3845 }
 0x479   : > { %3850 = vst.msk [vmem:[%s6682_s14 + $0x1c] sm:$0xf] %vm3324_vm15, %v3846_v34 }
 0x47a   : > { %4463 = shalt.err (!%p4460_p1)
}
 0x47b   : > { %s4464_s14 = scalar_lea.hbm %s7153_s10, 512  ;;  %s4468_s25 = scalar_lea.hbm %s7209_s8, 1024 }
 0x47c   : > { %p4465_p13 = scmp.ne.s32.totalorder %s7153_s10, %s4464_s14  ;;  %p4469_p4 = scmp.lt.u32.totalorder %s7153_s10, %s7209_s8 }
 0x47d   : > { %p4470_p5 = scmp.lt.u32.totalorder %s4468_s25, %s4464_s14  ;;  %p4472_p11 = scmp.lt.u32.totalorder %s4464_s14, %s7153_s10 }
 0x47e   : > { %p4466_p6 = pnand %p4465_p13, %p7241_p0 }
 0x47f   : > { %p4471_p8 = por %p4470_p5, %p4469_p4 }
 0x480   : > { %p4467_p10 = pneg %p4466_p6 }
 0x481   : > { %p4473_p2 = por %p4472_p11, %p4471_p8 }
 0x483   : > { %p4474_p3 = pnand %p4473_p2, %p4467_p10 }
 0x485   : > { %4477 = shalt.err (!%p4474_p3)
}
 0x486   : > { %s4533_s21 = smov 256   ;;  %s4534_s9 = smov 16  }
 0x487   : > { %4276 = dma.vmem_to_hbm [thread:$0]  (%p7241_p0), %s7155_s18, 512, %s7153_s10, %s3852_s17, %s4533_s21, %s4533_s21, %s4534_s9  }
 0x488 PF: > { %s3880_s20 = sand.u32 1, %s4508_s27   ;;  %p7242_p7 = scmp.ne.s32.totalorder %s7216_s12, 0 }
 0x489   : > { %p7243_p9 = scmp.ge.s32.totalorder %s4520_s30, 2  ;;  %s3881_s15 = scalar_lea.sflag [#allocation5], %s3880_s20 }
 0x48b   : > { %p4290_p12 = pnand %p7243_p9, %p7242_p7 }
 0x48d   : > { %4503 = dma.done.wait (!%p4290_p12), %s3881_s15, 512  }
 0x48e   : > { %4505 = vsyncadd (!%p4290_p12), %s3881_s15, 4294966784  ;;  %p22_p1 = scmp.ge.s32.totalorder %s4696_s16, 4   ;;  %s7244_s27 = smov %s4512_s28 }
 0x48f   : > { %s7245_s28 = smov %s4516_s29  ;;  %s7246_s29 = smov %s4712_s23 }
 0x490   : > { %s7247_s30 = smov %s4696_s16  ;;  %24 = sbr.rel (!%p22_p1) target bundleno = 6 (0x6), region = 107 }
 0x497   :  { %3886 = vsyncpa [#allocation4], 1 }
 0x498   :  { %3888 = vsyncpa [#allocation4 + $0x1], 1 }
 0x499   :  { %3889 = vsyncpa [#allocation7], 1 }
 0x49a   :  { %3890 = vsyncpa [#allocation5], 1 }
 0x49b   :  { %3892 = vsyncpa [#allocation5 + $0x1], 1 }

</bundles_post_ra>
